<compile_context>
chip_gen: v7x
topology: tpu7x:2x2x1
jax: 0.10.0
libtpu: 0.0.40
codegen_flags: <defaults>
</compile_context>

<pallas_src>
import functools

import jax
import jax.numpy as jnp
import numpy as np
from jax.experimental import pallas as pl
from jax.experimental.pallas import tpu as pltpu


def _round_up(x, m):
    return (x + m - 1) // m * m


def _in_conv_kernel(x_ref, w0_ref, b0_ref, w1_ref, b1_ref, w2_ref, b2_ref,
                    mask_l_ref, mask_r_ref, o_ref, xbuf,
                    *, H, W, cin, cin_pad, cout, nb, margin, neg_slope):
    """Fused conv0+BN+LReLU -> conv1+(Dropout eval)+BN+LReLU -> conv2.

    Layout: channels in sublanes, flattened (h*W + w) spatial in lanes.
      x_ref     : (nb, cin, H*W)           f32
      wX_ref    : (9, cout, K)             bf16, per-tap (Cout, Cin) matrices,
                                           BN folded for layers 0/1
      bX_ref    : (cout, 1)                f32 bias (BN folded for 0/1)
      mask_*    : (1, H*W)                 f32 row-wrap masks (0 at w==0 / w==W-1)
      o_ref     : (nb, cout, H*W)          f32 output (lane-dense)
      xbuf      : (cmax, nb*(H*W+2*margin)) bf16 activation buffer with zero
                                           lane margins of width `margin`
    """
    M = H * W
    S = M + 2 * margin                    # per-batch lane span inside xbuf

    mask_l = mask_l_ref[...]              # zero where w == 0   (left wrap)
    mask_r = mask_r_ref[...]              # zero where w == W-1 (right wrap)

    def conv3x3(base, w_ref):
        n_in = w_ref.shape[2]
        # one accumulator per dx so each wrap mask is applied exactly once
        accs = [jnp.zeros((cout, M), jnp.float32) for _ in range(3)]
        for dy in range(3):
            for dx in range(3):
                t = dy * 3 + dx
                start = base + margin + (dy - 1) * W + (dx - 1)   # static offset
                src = xbuf[0:n_in, start:start + M]               # (n_in, M) view
                accs[dx] = accs[dx] + jnp.dot(
                    w_ref[t], src, preferred_element_type=jnp.float32)
        return accs[0] * mask_l + accs[1] + accs[2] * mask_r      # (cout, M) f32

    def leaky(v):
        return jnp.where(v >= 0, v, neg_slope * v)

    for b in range(nb):                   # static, small unrolled batch loop
        base = b * S

        # ---- zero ONLY the halo/margin strips (never the whole buffer) ----
        xbuf[:, base:base + margin] = jnp.zeros((xbuf.shape[0], margin), xbuf.dtype)
        xbuf[:, base + margin + M:base + S] = jnp.zeros(
            (xbuf.shape[0], margin), xbuf.dtype)
        if cin_pad > cin:                  # padded input-channel rows must be 0
            xbuf[cin:cin_pad, base + margin:base + margin + M] = jnp.zeros(
                (cin_pad - cin, M), xbuf.dtype)

        # ---- load input (already lane-dense), cast to bf16 in VMEM --------
        xbuf[0:cin, base + margin:base + margin + M] = x_ref[b].astype(xbuf.dtype)

        # conv0 -> BN(eval, folded) -> LeakyReLU
        y = leaky(conv3x3(base, w0_ref) + b0_ref[...])
        xbuf[0:cout, base + margin:base + margin + M] = y.astype(xbuf.dtype)

        # conv1 -> Dropout2d(eval: identity) -> BN(eval, folded) -> LeakyReLU
        # TODO(synk): training-mode Dropout2d (random per-channel drop) not implemented.
        y = leaky(conv3x3(base, w1_ref) + b1_ref[...])
        xbuf[0:cout, base + margin:base + margin + M] = y.astype(xbuf.dtype)

        # conv2 (no norm / act); result is already (Cout, H*W) == NCHW layout
        y = conv3x3(base, w2_ref) + b2_ref[...]
        o_ref[b] = y.astype(o_ref.dtype)


def init_params(key, input_channels, output_channels, eps=1e-5):
    """Raw module parameters: HWIO conv weights, (1, C) biases, BN affine + stats."""
    ks = jax.random.split(key, 10)
    p = {}
    p["w0"] = 0.1 * jax.random.normal(ks[0], (3, 3, input_channels, output_channels), jnp.float32)
    p["b0"] = 0.1 * jax.random.normal(ks[1], (1, output_channels), jnp.float32)
    p["w1"] = 0.1 * jax.random.normal(ks[2], (3, 3, output_channels, output_channels), jnp.float32)
    p["b1"] = 0.1 * jax.random.normal(ks[3], (1, output_channels), jnp.float32)
    p["w2"] = 0.1 * jax.random.normal(ks[4], (3, 3, output_channels, output_channels), jnp.float32)
    p["b2"] = 0.1 * jax.random.normal(ks[5], (1, output_channels), jnp.float32)
    # BatchNorm (eval): running_mean=0, running_var=1 at init
    for i, (gk, bk) in enumerate([(ks[6], ks[7]), (ks[8], ks[9])]):
        gamma = 1.0 + 0.1 * jax.random.normal(gk, (1, output_channels), jnp.float32)
        beta = 0.1 * jax.random.normal(bk, (1, output_channels), jnp.float32)
        running_mean = jnp.zeros((1, output_channels), jnp.float32)
        running_var = jnp.ones((1, output_channels), jnp.float32)
        scale = gamma * jax.lax.rsqrt(running_var + eps)
        p[f"scale{i}"] = scale
        p[f"shift{i}"] = beta - running_mean * scale
    return p


def fold_params(params):
    """Fold eval-mode BN into conv0/conv1, rewrite weights as per-tap
    (9, Cout, Cin) bf16 matrices (Cin zero-padded to a multiple of 8),
    biases as (Cout, 1) f32."""
    cin = params["w0"].shape[2]
    cout = params["w0"].shape[3]
    cin_pad = _round_up(max(cin, 8), 8)

    def taps(w_hwio, scale=None):
        co = w_hwio.shape[3]
        t = jnp.transpose(w_hwio, (0, 1, 3, 2)).reshape(9, co, w_hwio.shape[2])
        if scale is not None:
            t = t * scale.reshape(1, co, 1)        # BN scale along output channel
        return t.astype(jnp.bfloat16)

    w0 = taps(params["w0"], params["scale0"].reshape(-1))
    if cin_pad > cin:
        w0 = jnp.pad(w0, ((0, 0), (0, 0), (0, cin_pad - cin)))
    w1 = taps(params["w1"], params["scale1"].reshape(-1))
    w2 = taps(params["w2"])

    def bias_col(b):                               # (1, C) -> (C, 1) f32
        return b.reshape(-1, 1).astype(jnp.float32)

    b0 = bias_col(params["b0"] * params["scale0"] + params["shift0"])
    b1 = bias_col(params["b1"] * params["scale1"] + params["shift1"])
    b2 = bias_col(params["b2"])
    return {"w0": w0, "b0": b0, "w1": w1, "b1": b1, "w2": w2, "b2": b2}


def in_conv_forward(x_nchw, kparams, *, neg_slope=0.01, batch_block=None):
    """Fused in_conv forward (eval mode, res=False). Input/output NCHW like PyTorch."""
    N, Cin, H, W = x_nchw.shape
    Cout = kparams["w0"].shape[1]
    cin_pad = kparams["w0"].shape[2]
    M = H * W

    # batch elements per grid step: amortize per-step overhead for small images
    if batch_block is None:
        batch_block = max(1, min(N, 8, 65536 // max(M, 1)))
    nb = 1
    for d in range(batch_block, 0, -1):
        if N % d == 0:
            nb = d
            break

    margin = W + 1                       # lane margin so every 3x3 tap is a pure lane shift
    S = M + 2 * margin
    cmax = max(cin_pad, Cout)

    x = x_nchw.reshape(N, Cin, M)        # free reshape: no transpose / cast HBM pass

    # row-wrap masks: zero the tap contributions that would wrap across image rows
    col = jnp.arange(M, dtype=jnp.int32) % W
    mask_l = (col != 0).astype(jnp.float32).reshape(1, M)
    mask_r = (col != W - 1).astype(jnp.float32).reshape(1, M)

    kernel = functools.partial(
        _in_conv_kernel, H=H, W=W, cin=Cin, cin_pad=cin_pad, cout=Cout,
        nb=nb, margin=margin, neg_slope=neg_slope)

    flops = int(2 * N * M * 9 * (Cin * Cout + 2 * Cout * Cout))
    bytes_accessed = int(N * Cin * M * 4 + N * Cout * M * 4
                         + 9 * (cin_pad + 2 * Cout) * Cout * 2
                         + 3 * Cout * 4 + 2 * M * 4)

    # VMEM accounting: scratch + double-buffered in/out blocks + f32 temporaries
    est = (cmax * nb * S * 2                       # xbuf (bf16)
           + 2 * nb * Cin * M * 4                  # input block, double buffered
           + 2 * nb * Cout * M * 4                 # output block, double buffered
           + 6 * Cout * M * 4                      # accumulator / activation f32 temps
           + 9 * (cin_pad + 2 * Cout) * Cout * 2)  # weights
    vmem_limit = int(min(64 * 2**20, max(16 * 2**20, 2 * est)))

    out = pl.pallas_call(
        kernel,
        out_shape=jax.ShapeDtypeStruct((N, Cout, M), jnp.float32),
        grid=(N // nb,),
        in_specs=[
            pl.BlockSpec((nb, Cin, M), lambda i: (i, 0, 0)),          # x
            pl.BlockSpec(kparams["w0"].shape, lambda i: (0, 0, 0)),   # w0
            pl.BlockSpec(kparams["b0"].shape, lambda i: (0, 0)),      # b0
            pl.BlockSpec(kparams["w1"].shape, lambda i: (0, 0, 0)),   # w1
            pl.BlockSpec(kparams["b1"].shape, lambda i: (0, 0)),      # b1
            pl.BlockSpec(kparams["w2"].shape, lambda i: (0, 0, 0)),   # w2
            pl.BlockSpec(kparams["b2"].shape, lambda i: (0, 0)),      # b2
            pl.BlockSpec((1, M), lambda i: (0, 0)),                   # mask_l
            pl.BlockSpec((1, M), lambda i: (0, 0)),                   # mask_r
        ],
        out_specs=pl.BlockSpec((nb, Cout, M), lambda i: (i, 0, 0)),
        scratch_shapes=[pltpu.VMEM((cmax, nb * S), jnp.bfloat16)],
        compiler_params=pltpu.CompilerParams(
            dimension_semantics=("parallel",),
            vmem_limit_bytes=vmem_limit),
        cost_estimate=pl.CostEstimate(
            flops=flops, transcendentals=0, bytes_accessed=bytes_accessed),
    )(x, kparams["w0"], kparams["b0"], kparams["w1"], kparams["b1"],
      kparams["w2"], kparams["b2"], mask_l, mask_r)

    # TODO(synk): residual path (network_kwargs['res']=True) not wired; default is False.
    # TODO(synk): for production-size images add a spatial (row-block) grid axis with a
    #             1-row halo so per-step activations/temps fit v7x's 64 MiB VMEM.
    return out.reshape(N, Cout, H, W)            # free reshape back to NCHW


# ---------------- pure-JAX reference (bf16-matched) for self-check ----------------
def _ref_conv(x_nhwc, w, b):
    y = jax.lax.conv_general_dilated(
        x_nhwc.astype(jnp.bfloat16), w.astype(jnp.bfloat16),
        window_strides=(1, 1), padding="SAME",
        dimension_numbers=("NHWC", "HWIO", "NHWC"),
        preferred_element_type=jnp.float32)
    return y + b.reshape(1, 1, 1, -1)


def _ref_forward(x_nchw, p, neg_slope=0.01):
    def lrelu(v):
        return jnp.where(v >= 0, v, neg_slope * v)
    x = jnp.transpose(x_nchw, (0, 2, 3, 1))
    x = lrelu(_ref_conv(x, p["w0"], p["b0"]) * p["scale0"].reshape(1, 1, 1, -1)
              + p["shift0"].reshape(1, 1, 1, -1))
    x = lrelu(_ref_conv(x, p["w1"], p["b1"]) * p["scale1"].reshape(1, 1, 1, -1)
              + p["shift1"].reshape(1, 1, 1, -1))
    x = _ref_conv(x, p["w2"], p["b2"])
    return jnp.transpose(x, (0, 3, 1, 2))


if __name__ == "__main__":
    key = jax.random.PRNGKey(0)
    k_x, k_p = jax.random.split(key)

    N, Cin, Cout, H, W = 2, 4, 8, 16, 16
    x = jax.random.normal(k_x, (N, Cin, H, W), jnp.float32)        # NCHW like PyTorch
    params = init_params(k_p, Cin, Cout)
    kparams = fold_params(params)

    out = jax.block_until_ready(in_conv_forward(x, kparams))
    assert out.shape == (N, Cout, H, W), out.shape

    ref = jax.block_until_ready(_ref_forward(x, params))
    np.testing.assert_allclose(np.asarray(out), np.asarray(ref), rtol=2e-2, atol=2e-2)

    print("KERNEL_OK")
</pallas_src>

<mosaic_0001>
module attributes {stable_mosaic.version = 11 : i64} {
  func.func @_in_conv_kernel(%arg0: i32, %arg1: memref<2x4x256xf32, #tpu.memory_space<vmem>>, %arg2: memref<9x8x8xbf16, #tpu.memory_space<vmem>>, %arg3: memref<8x1xf32, #tpu.memory_space<vmem>>, %arg4: memref<9x8x8xbf16, #tpu.memory_space<vmem>>, %arg5: memref<8x1xf32, #tpu.memory_space<vmem>>, %arg6: memref<9x8x8xbf16, #tpu.memory_space<vmem>>, %arg7: memref<8x1xf32, #tpu.memory_space<vmem>>, %arg8: memref<1x256xf32, #tpu.memory_space<vmem>>, %arg9: memref<1x256xf32, #tpu.memory_space<vmem>>, %arg10: memref<2x8x256xf32, #tpu.memory_space<vmem>>, %arg11: memref<8x580xbf16, #tpu.memory_space<vmem>>) attributes {dimension_semantics = [#tpu.dimension_semantics<parallel>], iteration_bounds = array<i64: 1>, scalar_prefetch = 0 : i64, scratch_operands = 1 : i64, tpu.core_type = #tpu.core_type<tc>, window_params = [{transform_indices = @transform_0, window_bounds = array<i64: 2, 4, 256>}, {pipeline_mode = #tpu.pipeline_mode<synchronous>, transform_indices = @transform_1, window_bounds = array<i64: 9, 8, 8>}, {pipeline_mode = #tpu.pipeline_mode<synchronous>, transform_indices = @transform_2, window_bounds = array<i64: 8, 1>}, {pipeline_mode = #tpu.pipeline_mode<synchronous>, transform_indices = @transform_3, window_bounds = array<i64: 9, 8, 8>}, {pipeline_mode = #tpu.pipeline_mode<synchronous>, transform_indices = @transform_4, window_bounds = array<i64: 8, 1>}, {pipeline_mode = #tpu.pipeline_mode<synchronous>, transform_indices = @transform_5, window_bounds = array<i64: 9, 8, 8>}, {pipeline_mode = #tpu.pipeline_mode<synchronous>, transform_indices = @transform_6, window_bounds = array<i64: 8, 1>}, {pipeline_mode = #tpu.pipeline_mode<synchronous>, transform_indices = @transform_7, window_bounds = array<i64: 1, 256>}, {pipeline_mode = #tpu.pipeline_mode<synchronous>, transform_indices = @transform_8, window_bounds = array<i64: 1, 256>}, {transform_indices = @transform_9, window_bounds = array<i64: 2, 8, 256>}]} {
    %c0 = arith.constant 0 : index
    %c0_0 = arith.constant 0 : index
    %0 = vector.load %arg8[%c0, %c0_0] : memref<1x256xf32, #tpu.memory_space<vmem>>, vector<1x256xf32>
    %c0_1 = arith.constant 0 : index
    %c0_2 = arith.constant 0 : index
    %1 = vector.load %arg9[%c0_1, %c0_2] : memref<1x256xf32, #tpu.memory_space<vmem>>, vector<1x256xf32>
    %cst = arith.constant 0.000000e+00 : bf16
    %2 = vector.broadcast %cst : bf16 to vector<8x17xbf16>
    %c0_3 = arith.constant 0 : index
    %c0_4 = arith.constant 0 : index
    %3 = vector.load %arg11[%c0_3, %c0_4] : memref<8x580xbf16, #tpu.memory_space<vmem>>, vector<8x17xbf16>
    tpu.vector_store %arg11[%c0_3, %c0_4], %2 {strides = array<i32>} : memref<8x580xbf16, #tpu.memory_space<vmem>>, vector<8x17xbf16>,
    %cst_5 = arith.constant 0.000000e+00 : bf16
    %4 = vector.broadcast %cst_5 : bf16 to vector<8x17xbf16>
    %c0_6 = arith.constant 0 : index
    %c273 = arith.constant 273 : index
    %5 = vector.load %arg11[%c0_6, %c273] : memref<8x580xbf16, #tpu.memory_space<vmem>>, vector<8x17xbf16>
    tpu.vector_store %arg11[%c0_6, %c273], %4 {strides = array<i32>} : memref<8x580xbf16, #tpu.memory_space<vmem>>, vector<8x17xbf16>,
    %cst_7 = arith.constant 0.000000e+00 : bf16
    %6 = vector.broadcast %cst_7 : bf16 to vector<4x256xbf16>
    %c4 = arith.constant 4 : index
    %c17 = arith.constant 17 : index
    %7 = vector.load %arg11[%c4, %c17] : memref<8x580xbf16, #tpu.memory_space<vmem>>, vector<4x256xbf16>
    tpu.vector_store %arg11[%c4, %c17], %6 {strides = array<i32>} : memref<8x580xbf16, #tpu.memory_space<vmem>>, vector<4x256xbf16>,
    %c0_8 = arith.constant 0 : index
    %c0_9 = arith.constant 0 : index
    %c0_10 = arith.constant 0 : index
    %8 = vector.load %arg1[%c0_8, %c0_9, %c0_10] : memref<2x4x256xf32, #tpu.memory_space<vmem>>, vector<1x4x256xf32>
    %9 = vector.shape_cast %8 : vector<1x4x256xf32> to vector<4x256xf32>
    %10 = arith.truncf %9 : vector<4x256xf32> to vector<4x256xbf16>
    %c0_11 = arith.constant 0 : index
    %c17_12 = arith.constant 17 : index
    %11 = vector.load %arg11[%c0_11, %c17_12] : memref<8x580xbf16, #tpu.memory_space<vmem>>, vector<4x256xbf16>
    tpu.vector_store %arg11[%c0_11, %c17_12], %10 {strides = array<i32>} : memref<8x580xbf16, #tpu.memory_space<vmem>>, vector<4x256xbf16>,
    %cst_13 = arith.constant 0.000000e+00 : f32
    %12 = vector.broadcast %cst_13 : f32 to vector<8x256xf32>
    %cst_14 = arith.constant 0.000000e+00 : f32
    %13 = vector.broadcast %cst_14 : f32 to vector<8x256xf32>
    %cst_15 = arith.constant 0.000000e+00 : f32
    %14 = vector.broadcast %cst_15 : f32 to vector<8x256xf32>
    %c0_16 = arith.constant 0 : index
    %c0_17 = arith.constant 0 : index
    %15 = vector.load %arg11[%c0_16, %c0_17] : memref<8x580xbf16, #tpu.memory_space<vmem>>, vector<8x256xbf16>
    %c0_18 = arith.constant 0 : index
    %c0_19 = arith.constant 0 : index
    %c0_20 = arith.constant 0 : index
    %16 = vector.load %arg2[%c0_18, %c0_19, %c0_20] : memref<9x8x8xbf16, #tpu.memory_space<vmem>>, vector<1x8x8xbf16>
    %17 = vector.shape_cast %16 : vector<1x8x8xbf16> to vector<8x8xbf16>
    %cst_21 = arith.constant dense<0.000000e+00> : vector<8x256xf32>
    %18 = tpu.matmul %17, %15, %cst_21 {dimension_numbers = #tpu.dot_dimension_numbers<[1], [0], [0], [1], [0, 0, 1, 1], [], []>} : vector<8x8xbf16>, vector<8x256xbf16>, vector<8x256xf32> -> vector<8x256xf32>
    %19 = arith.addf %12, %18 : vector<8x256xf32>
    %c0_22 = arith.constant 0 : index
    %c1 = arith.constant 1 : index
    %20 = vector.load %arg11[%c0_22, %c1] : memref<8x580xbf16, #tpu.memory_space<vmem>>, vector<8x256xbf16>
    %c1_23 = arith.constant 1 : index
    %c0_24 = arith.constant 0 : index
    %c0_25 = arith.constant 0 : index
    %21 = vector.load %arg2[%c1_23, %c0_24, %c0_25] : memref<9x8x8xbf16, #tpu.memory_space<vmem>>, vector<1x8x8xbf16>
    %22 = vector.shape_cast %21 : vector<1x8x8xbf16> to vector<8x8xbf16>
    %cst_26 = arith.constant dense<0.000000e+00> : vector<8x256xf32>
    %23 = tpu.matmul %22, %20, %cst_26 {dimension_numbers = #tpu.dot_dimension_numbers<[1], [0], [0], [1], [0, 0, 1, 1], [], []>} : vector<8x8xbf16>, vector<8x256xbf16>, vector<8x256xf32> -> vector<8x256xf32>
    %24 = arith.addf %13, %23 : vector<8x256xf32>
    %c0_27 = arith.constant 0 : index
    %c2 = arith.constant 2 : index
    %25 = vector.load %arg11[%c0_27, %c2] : memref<8x580xbf16, #tpu.memory_space<vmem>>, vector<8x256xbf16>
    %c2_28 = arith.constant 2 : index
    %c0_29 = arith.constant 0 : index
    %c0_30 = arith.constant 0 : index
    %26 = vector.load %arg2[%c2_28, %c0_29, %c0_30] : memref<9x8x8xbf16, #tpu.memory_space<vmem>>, vector<1x8x8xbf16>
    %27 = vector.shape_cast %26 : vector<1x8x8xbf16> to vector<8x8xbf16>
    %cst_31 = arith.constant dense<0.000000e+00> : vector<8x256xf32>
    %28 = tpu.matmul %27, %25, %cst_31 {dimension_numbers = #tpu.dot_dimension_numbers<[1], [0], [0], [1], [0, 0, 1, 1], [], []>} : vector<8x8xbf16>, vector<8x256xbf16>, vector<8x256xf32> -> vector<8x256xf32>
    %29 = arith.addf %14, %28 : vector<8x256xf32>
    %c0_32 = arith.constant 0 : index
    %c16 = arith.constant 16 : index
    %30 = vector.load %arg11[%c0_32, %c16] : memref<8x580xbf16, #tpu.memory_space<vmem>>, vector<8x256xbf16>
    %c3 = arith.constant 3 : index
    %c0_33 = arith.constant 0 : index
    %c0_34 = arith.constant 0 : index
    %31 = vector.load %arg2[%c3, %c0_33, %c0_34] : memref<9x8x8xbf16, #tpu.memory_space<vmem>>, vector<1x8x8xbf16>
    %32 = vector.shape_cast %31 : vector<1x8x8xbf16> to vector<8x8xbf16>
    %cst_35 = arith.constant dense<0.000000e+00> : vector<8x256xf32>
    %33 = tpu.matmul %32, %30, %cst_35 {dimension_numbers = #tpu.dot_dimension_numbers<[1], [0], [0], [1], [0, 0, 1, 1], [], []>} : vector<8x8xbf16>, vector<8x256xbf16>, vector<8x256xf32> -> vector<8x256xf32>
    %34 = arith.addf %19, %33 : vector<8x256xf32>
    %c0_36 = arith.constant 0 : index
    %c17_37 = arith.constant 17 : index
    %35 = vector.load %arg11[%c0_36, %c17_37] : memref<8x580xbf16, #tpu.memory_space<vmem>>, vector<8x256xbf16>
    %c4_38 = arith.constant 4 : index
    %c0_39 = arith.constant 0 : index
    %c0_40 = arith.constant 0 : index
    %36 = vector.load %arg2[%c4_38, %c0_39, %c0_40] : memref<9x8x8xbf16, #tpu.memory_space<vmem>>, vector<1x8x8xbf16>
    %37 = vector.shape_cast %36 : vector<1x8x8xbf16> to vector<8x8xbf16>
    %cst_41 = arith.constant dense<0.000000e+00> : vector<8x256xf32>
    %38 = tpu.matmul %37, %35, %cst_41 {dimension_numbers = #tpu.dot_dimension_numbers<[1], [0], [0], [1], [0, 0, 1, 1], [], []>} : vector<8x8xbf16>, vector<8x256xbf16>, vector<8x256xf32> -> vector<8x256xf32>
    %39 = arith.addf %24, %38 : vector<8x256xf32>
    %c0_42 = arith.constant 0 : index
    %c18 = arith.constant 18 : index
    %40 = vector.load %arg11[%c0_42, %c18] : memref<8x580xbf16, #tpu.memory_space<vmem>>, vector<8x256xbf16>
    %c5 = arith.constant 5 : index
    %c0_43 = arith.constant 0 : index
    %c0_44 = arith.constant 0 : index
    %41 = vector.load %arg2[%c5, %c0_43, %c0_44] : memref<9x8x8xbf16, #tpu.memory_space<vmem>>, vector<1x8x8xbf16>
    %42 = vector.shape_cast %41 : vector<1x8x8xbf16> to vector<8x8xbf16>
    %cst_45 = arith.constant dense<0.000000e+00> : vector<8x256xf32>
    %43 = tpu.matmul %42, %40, %cst_45 {dimension_numbers = #tpu.dot_dimension_numbers<[1], [0], [0], [1], [0, 0, 1, 1], [], []>} : vector<8x8xbf16>, vector<8x256xbf16>, vector<8x256xf32> -> vector<8x256xf32>
    %44 = arith.addf %29, %43 : vector<8x256xf32>
    %c0_46 = arith.constant 0 : index
    %c32 = arith.constant 32 : index
    %45 = vector.load %arg11[%c0_46, %c32] : memref<8x580xbf16, #tpu.memory_space<vmem>>, vector<8x256xbf16>
    %c6 = arith.constant 6 : index
    %c0_47 = arith.constant 0 : index
    %c0_48 = arith.constant 0 : index
    %46 = vector.load %arg2[%c6, %c0_47, %c0_48] : memref<9x8x8xbf16, #tpu.memory_space<vmem>>, vector<1x8x8xbf16>
    %47 = vector.shape_cast %46 : vector<1x8x8xbf16> to vector<8x8xbf16>
    %cst_49 = arith.constant dense<0.000000e+00> : vector<8x256xf32>
    %48 = tpu.matmul %47, %45, %cst_49 {dimension_numbers = #tpu.dot_dimension_numbers<[1], [0], [0], [1], [0, 0, 1, 1], [], []>} : vector<8x8xbf16>, vector<8x256xbf16>, vector<8x256xf32> -> vector<8x256xf32>
    %49 = arith.addf %34, %48 : vector<8x256xf32>
    %c0_50 = arith.constant 0 : index
    %c33 = arith.constant 33 : index
    %50 = vector.load %arg11[%c0_50, %c33] : memref<8x580xbf16, #tpu.memory_space<vmem>>, vector<8x256xbf16>
    %c7 = arith.constant 7 : index
    %c0_51 = arith.constant 0 : index
    %c0_52 = arith.constant 0 : index
    %51 = vector.load %arg2[%c7, %c0_51, %c0_52] : memref<9x8x8xbf16, #tpu.memory_space<vmem>>, vector<1x8x8xbf16>
    %52 = vector.shape_cast %51 : vector<1x8x8xbf16> to vector<8x8xbf16>
    %cst_53 = arith.constant dense<0.000000e+00> : vector<8x256xf32>
    %53 = tpu.matmul %52, %50, %cst_53 {dimension_numbers = #tpu.dot_dimension_numbers<[1], [0], [0], [1], [0, 0, 1, 1], [], []>} : vector<8x8xbf16>, vector<8x256xbf16>, vector<8x256xf32> -> vector<8x256xf32>
    %54 = arith.addf %39, %53 : vector<8x256xf32>
    %c0_54 = arith.constant 0 : index
    %c34 = arith.constant 34 : index
    %55 = vector.load %arg11[%c0_54, %c34] : memref<8x580xbf16, #tpu.memory_space<vmem>>, vector<8x256xbf16>
    %c8 = arith.constant 8 : index
    %c0_55 = arith.constant 0 : index
    %c0_56 = arith.constant 0 : index
    %56 = vector.load %arg2[%c8, %c0_55, %c0_56] : memref<9x8x8xbf16, #tpu.memory_space<vmem>>, vector<1x8x8xbf16>
    %57 = vector.shape_cast %56 : vector<1x8x8xbf16> to vector<8x8xbf16>
    %cst_57 = arith.constant dense<0.000000e+00> : vector<8x256xf32>
    %58 = tpu.matmul %57, %55, %cst_57 {dimension_numbers = #tpu.dot_dimension_numbers<[1], [0], [0], [1], [0, 0, 1, 1], [], []>} : vector<8x8xbf16>, vector<8x256xbf16>, vector<8x256xf32> -> vector<8x256xf32>
    %59 = arith.addf %44, %58 : vector<8x256xf32>
    %60 = vector.broadcast %0 : vector<1x256xf32> to vector<8x256xf32>
    %61 = arith.mulf %49, %60 : vector<8x256xf32>
    %62 = arith.addf %61, %54 : vector<8x256xf32>
    %63 = vector.broadcast %1 : vector<1x256xf32> to vector<8x256xf32>
    %64 = arith.mulf %59, %63 : vector<8x256xf32>
    %65 = arith.addf %62, %64 : vector<8x256xf32>
    %c0_58 = arith.constant 0 : index
    %c0_59 = arith.constant 0 : index
    %66 = vector.load %arg3[%c0_58, %c0_59] : memref<8x1xf32, #tpu.memory_space<vmem>>, vector<8x1xf32>
    %67 = vector.broadcast %66 : vector<8x1xf32> to vector<8x256xf32>
    %68 = arith.addf %65, %67 : vector<8x256xf32>
    %cst_60 = arith.constant 0.000000e+00 : f32
    %69 = vector.broadcast %cst_60 : f32 to vector<8x256xf32>
    %70 = arith.cmpf oge, %68, %69 : vector<8x256xf32>
    %cst_61 = arith.constant 0.00999999977 : f32
    %71 = vector.broadcast %cst_61 : f32 to vector<8x256xf32>
    %72 = arith.mulf %71, %68 : vector<8x256xf32>
    %73 = arith.select %70, %68, %72 : vector<8x256xi1>, vector<8x256xf32>
    %74 = arith.truncf %73 : vector<8x256xf32> to vector<8x256xbf16>
    %c0_62 = arith.constant 0 : index
    %c17_63 = arith.constant 17 : index
    %75 = vector.load %arg11[%c0_62, %c17_63] : memref<8x580xbf16, #tpu.memory_space<vmem>>, vector<8x256xbf16>
    tpu.vector_store %arg11[%c0_62, %c17_63], %74 {strides = array<i32>} : memref<8x580xbf16, #tpu.memory_space<vmem>>, vector<8x256xbf16>,
    %cst_64 = arith.constant 0.000000e+00 : f32
    %76 = vector.broadcast %cst_64 : f32 to vector<8x256xf32>
    %cst_65 = arith.constant 0.000000e+00 : f32
    %77 = vector.broadcast %cst_65 : f32 to vector<8x256xf32>
    %cst_66 = arith.constant 0.000000e+00 : f32
    %78 = vector.broadcast %cst_66 : f32 to vector<8x256xf32>
    %c0_67 = arith.constant 0 : index
    %c0_68 = arith.constant 0 : index
    %79 = vector.load %arg11[%c0_67, %c0_68] : memref<8x580xbf16, #tpu.memory_space<vmem>>, vector<8x256xbf16>
    %c0_69 = arith.constant 0 : index
    %c0_70 = arith.constant 0 : index
    %c0_71 = arith.constant 0 : index
    %80 = vector.load %arg4[%c0_69, %c0_70, %c0_71] : memref<9x8x8xbf16, #tpu.memory_space<vmem>>, vector<1x8x8xbf16>
    %81 = vector.shape_cast %80 : vector<1x8x8xbf16> to vector<8x8xbf16>
    %cst_72 = arith.constant dense<0.000000e+00> : vector<8x256xf32>
    %82 = tpu.matmul %81, %79, %cst_72 {dimension_numbers = #tpu.dot_dimension_numbers<[1], [0], [0], [1], [0, 0, 1, 1], [], []>} : vector<8x8xbf16>, vector<8x256xbf16>, vector<8x256xf32> -> vector<8x256xf32>
    %83 = arith.addf %76, %82 : vector<8x256xf32>
    %c0_73 = arith.constant 0 : index
    %c1_74 = arith.constant 1 : index
    %84 = vector.load %arg11[%c0_73, %c1_74] : memref<8x580xbf16, #tpu.memory_space<vmem>>, vector<8x256xbf16>
    %c1_75 = arith.constant 1 : index
    %c0_76 = arith.constant 0 : index
    %c0_77 = arith.constant 0 : index
    %85 = vector.load %arg4[%c1_75, %c0_76, %c0_77] : memref<9x8x8xbf16, #tpu.memory_space<vmem>>, vector<1x8x8xbf16>
    %86 = vector.shape_cast %85 : vector<1x8x8xbf16> to vector<8x8xbf16>
    %cst_78 = arith.constant dense<0.000000e+00> : vector<8x256xf32>
    %87 = tpu.matmul %86, %84, %cst_78 {dimension_numbers = #tpu.dot_dimension_numbers<[1], [0], [0], [1], [0, 0, 1, 1], [], []>} : vector<8x8xbf16>, vector<8x256xbf16>, vector<8x256xf32> -> vector<8x256xf32>
    %88 = arith.addf %77, %87 : vector<8x256xf32>
    %c0_79 = arith.constant 0 : index
    %c2_80 = arith.constant 2 : index
    %89 = vector.load %arg11[%c0_79, %c2_80] : memref<8x580xbf16, #tpu.memory_space<vmem>>, vector<8x256xbf16>
    %c2_81 = arith.constant 2 : index
    %c0_82 = arith.constant 0 : index
    %c0_83 = arith.constant 0 : index
    %90 = vector.load %arg4[%c2_81, %c0_82, %c0_83] : memref<9x8x8xbf16, #tpu.memory_space<vmem>>, vector<1x8x8xbf16>
    %91 = vector.shape_cast %90 : vector<1x8x8xbf16> to vector<8x8xbf16>
    %cst_84 = arith.constant dense<0.000000e+00> : vector<8x256xf32>
    %92 = tpu.matmul %91, %89, %cst_84 {dimension_numbers = #tpu.dot_dimension_numbers<[1], [0], [0], [1], [0, 0, 1, 1], [], []>} : vector<8x8xbf16>, vector<8x256xbf16>, vector<8x256xf32> -> vector<8x256xf32>
    %93 = arith.addf %78, %92 : vector<8x256xf32>
    %c0_85 = arith.constant 0 : index
    %c16_86 = arith.constant 16 : index
    %94 = vector.load %arg11[%c0_85, %c16_86] : memref<8x580xbf16, #tpu.memory_space<vmem>>, vector<8x256xbf16>
    %c3_87 = arith.constant 3 : index
    %c0_88 = arith.constant 0 : index
    %c0_89 = arith.constant 0 : index
    %95 = vector.load %arg4[%c3_87, %c0_88, %c0_89] : memref<9x8x8xbf16, #tpu.memory_space<vmem>>, vector<1x8x8xbf16>
    %96 = vector.shape_cast %95 : vector<1x8x8xbf16> to vector<8x8xbf16>
    %cst_90 = arith.constant dense<0.000000e+00> : vector<8x256xf32>
    %97 = tpu.matmul %96, %94, %cst_90 {dimension_numbers = #tpu.dot_dimension_numbers<[1], [0], [0], [1], [0, 0, 1, 1], [], []>} : vector<8x8xbf16>, vector<8x256xbf16>, vector<8x256xf32> -> vector<8x256xf32>
    %98 = arith.addf %83, %97 : vector<8x256xf32>
    %c0_91 = arith.constant 0 : index
    %c17_92 = arith.constant 17 : index
    %99 = vector.load %arg11[%c0_91, %c17_92] : memref<8x580xbf16, #tpu.memory_space<vmem>>, vector<8x256xbf16>
    %c4_93 = arith.constant 4 : index
    %c0_94 = arith.constant 0 : index
    %c0_95 = arith.constant 0 : index
    %100 = vector.load %arg4[%c4_93, %c0_94, %c0_95] : memref<9x8x8xbf16, #tpu.memory_space<vmem>>, vector<1x8x8xbf16>
    %101 = vector.shape_cast %100 : vector<1x8x8xbf16> to vector<8x8xbf16>
    %cst_96 = arith.constant dense<0.000000e+00> : vector<8x256xf32>
    %102 = tpu.matmul %101, %99, %cst_96 {dimension_numbers = #tpu.dot_dimension_numbers<[1], [0], [0], [1], [0, 0, 1, 1], [], []>} : vector<8x8xbf16>, vector<8x256xbf16>, vector<8x256xf32> -> vector<8x256xf32>
    %103 = arith.addf %88, %102 : vector<8x256xf32>
    %c0_97 = arith.constant 0 : index
    %c18_98 = arith.constant 18 : index
    %104 = vector.load %arg11[%c0_97, %c18_98] : memref<8x580xbf16, #tpu.memory_space<vmem>>, vector<8x256xbf16>
    %c5_99 = arith.constant 5 : index
    %c0_100 = arith.constant 0 : index
    %c0_101 = arith.constant 0 : index
    %105 = vector.load %arg4[%c5_99, %c0_100, %c0_101] : memref<9x8x8xbf16, #tpu.memory_space<vmem>>, vector<1x8x8xbf16>
    %106 = vector.shape_cast %105 : vector<1x8x8xbf16> to vector<8x8xbf16>
    %cst_102 = arith.constant dense<0.000000e+00> : vector<8x256xf32>
    %107 = tpu.matmul %106, %104, %cst_102 {dimension_numbers = #tpu.dot_dimension_numbers<[1], [0], [0], [1], [0, 0, 1, 1], [], []>} : vector<8x8xbf16>, vector<8x256xbf16>, vector<8x256xf32> -> vector<8x256xf32>
    %108 = arith.addf %93, %107 : vector<8x256xf32>
    %c0_103 = arith.constant 0 : index
    %c32_104 = arith.constant 32 : index
    %109 = vector.load %arg11[%c0_103, %c32_104] : memref<8x580xbf16, #tpu.memory_space<vmem>>, vector<8x256xbf16>
    %c6_105 = arith.constant 6 : index
    %c0_106 = arith.constant 0 : index
    %c0_107 = arith.constant 0 : index
    %110 = vector.load %arg4[%c6_105, %c0_106, %c0_107] : memref<9x8x8xbf16, #tpu.memory_space<vmem>>, vector<1x8x8xbf16>
    %111 = vector.shape_cast %110 : vector<1x8x8xbf16> to vector<8x8xbf16>
    %cst_108 = arith.constant dense<0.000000e+00> : vector<8x256xf32>
    %112 = tpu.matmul %111, %109, %cst_108 {dimension_numbers = #tpu.dot_dimension_numbers<[1], [0], [0], [1], [0, 0, 1, 1], [], []>} : vector<8x8xbf16>, vector<8x256xbf16>, vector<8x256xf32> -> vector<8x256xf32>
    %113 = arith.addf %98, %112 : vector<8x256xf32>
    %c0_109 = arith.constant 0 : index
    %c33_110 = arith.constant 33 : index
    %114 = vector.load %arg11[%c0_109, %c33_110] : memref<8x580xbf16, #tpu.memory_space<vmem>>, vector<8x256xbf16>
    %c7_111 = arith.constant 7 : index
    %c0_112 = arith.constant 0 : index
    %c0_113 = arith.constant 0 : index
    %115 = vector.load %arg4[%c7_111, %c0_112, %c0_113] : memref<9x8x8xbf16, #tpu.memory_space<vmem>>, vector<1x8x8xbf16>
    %116 = vector.shape_cast %115 : vector<1x8x8xbf16> to vector<8x8xbf16>
    %cst_114 = arith.constant dense<0.000000e+00> : vector<8x256xf32>
    %117 = tpu.matmul %116, %114, %cst_114 {dimension_numbers = #tpu.dot_dimension_numbers<[1], [0], [0], [1], [0, 0, 1, 1], [], []>} : vector<8x8xbf16>, vector<8x256xbf16>, vector<8x256xf32> -> vector<8x256xf32>
    %118 = arith.addf %103, %117 : vector<8x256xf32>
    %c0_115 = arith.constant 0 : index
    %c34_116 = arith.constant 34 : index
    %119 = vector.load %arg11[%c0_115, %c34_116] : memref<8x580xbf16, #tpu.memory_space<vmem>>, vector<8x256xbf16>
    %c8_117 = arith.constant 8 : index
    %c0_118 = arith.constant 0 : index
    %c0_119 = arith.constant 0 : index
    %120 = vector.load %arg4[%c8_117, %c0_118, %c0_119] : memref<9x8x8xbf16, #tpu.memory_space<vmem>>, vector<1x8x8xbf16>
    %121 = vector.shape_cast %120 : vector<1x8x8xbf16> to vector<8x8xbf16>
    %cst_120 = arith.constant dense<0.000000e+00> : vector<8x256xf32>
    %122 = tpu.matmul %121, %119, %cst_120 {dimension_numbers = #tpu.dot_dimension_numbers<[1], [0], [0], [1], [0, 0, 1, 1], [], []>} : vector<8x8xbf16>, vector<8x256xbf16>, vector<8x256xf32> -> vector<8x256xf32>
    %123 = arith.addf %108, %122 : vector<8x256xf32>
    %124 = vector.broadcast %0 : vector<1x256xf32> to vector<8x256xf32>
    %125 = arith.mulf %113, %124 : vector<8x256xf32>
    %126 = arith.addf %125, %118 : vector<8x256xf32>
    %127 = vector.broadcast %1 : vector<1x256xf32> to vector<8x256xf32>
    %128 = arith.mulf %123, %127 : vector<8x256xf32>
    %129 = arith.addf %126, %128 : vector<8x256xf32>
    %c0_121 = arith.constant 0 : index
    %c0_122 = arith.constant 0 : index
    %130 = vector.load %arg5[%c0_121, %c0_122] : memref<8x1xf32, #tpu.memory_space<vmem>>, vector<8x1xf32>
    %131 = vector.broadcast %130 : vector<8x1xf32> to vector<8x256xf32>
    %132 = arith.addf %129, %131 : vector<8x256xf32>
    %cst_123 = arith.constant 0.000000e+00 : f32
    %133 = vector.broadcast %cst_123 : f32 to vector<8x256xf32>
    %134 = arith.cmpf oge, %132, %133 : vector<8x256xf32>
    %cst_124 = arith.constant 0.00999999977 : f32
    %135 = vector.broadcast %cst_124 : f32 to vector<8x256xf32>
    %136 = arith.mulf %135, %132 : vector<8x256xf32>
    %137 = arith.select %134, %132, %136 : vector<8x256xi1>, vector<8x256xf32>
    %138 = arith.truncf %137 : vector<8x256xf32> to vector<8x256xbf16>
    %c0_125 = arith.constant 0 : index
    %c17_126 = arith.constant 17 : index
    %139 = vector.load %arg11[%c0_125, %c17_126] : memref<8x580xbf16, #tpu.memory_space<vmem>>, vector<8x256xbf16>
    tpu.vector_store %arg11[%c0_125, %c17_126], %138 {strides = array<i32>} : memref<8x580xbf16, #tpu.memory_space<vmem>>, vector<8x256xbf16>,
    %cst_127 = arith.constant 0.000000e+00 : f32
    %140 = vector.broadcast %cst_127 : f32 to vector<8x256xf32>
    %cst_128 = arith.constant 0.000000e+00 : f32
    %141 = vector.broadcast %cst_128 : f32 to vector<8x256xf32>
    %cst_129 = arith.constant 0.000000e+00 : f32
    %142 = vector.broadcast %cst_129 : f32 to vector<8x256xf32>
    %c0_130 = arith.constant 0 : index
    %c0_131 = arith.constant 0 : index
    %143 = vector.load %arg11[%c0_130, %c0_131] : memref<8x580xbf16, #tpu.memory_space<vmem>>, vector<8x256xbf16>
    %c0_132 = arith.constant 0 : index
    %c0_133 = arith.constant 0 : index
    %c0_134 = arith.constant 0 : index
    %144 = vector.load %arg6[%c0_132, %c0_133, %c0_134] : memref<9x8x8xbf16, #tpu.memory_space<vmem>>, vector<1x8x8xbf16>
    %145 = vector.shape_cast %144 : vector<1x8x8xbf16> to vector<8x8xbf16>
    %cst_135 = arith.constant dense<0.000000e+00> : vector<8x256xf32>
    %146 = tpu.matmul %145, %143, %cst_135 {dimension_numbers = #tpu.dot_dimension_numbers<[1], [0], [0], [1], [0, 0, 1, 1], [], []>} : vector<8x8xbf16>, vector<8x256xbf16>, vector<8x256xf32> -> vector<8x256xf32>
    %147 = arith.addf %140, %146 : vector<8x256xf32>
    %c0_136 = arith.constant 0 : index
    %c1_137 = arith.constant 1 : index
    %148 = vector.load %arg11[%c0_136, %c1_137] : memref<8x580xbf16, #tpu.memory_space<vmem>>, vector<8x256xbf16>
    %c1_138 = arith.constant 1 : index
    %c0_139 = arith.constant 0 : index
    %c0_140 = arith.constant 0 : index
    %149 = vector.load %arg6[%c1_138, %c0_139, %c0_140] : memref<9x8x8xbf16, #tpu.memory_space<vmem>>, vector<1x8x8xbf16>
    %150 = vector.shape_cast %149 : vector<1x8x8xbf16> to vector<8x8xbf16>
    %cst_141 = arith.constant dense<0.000000e+00> : vector<8x256xf32>
    %151 = tpu.matmul %150, %148, %cst_141 {dimension_numbers = #tpu.dot_dimension_numbers<[1], [0], [0], [1], [0, 0, 1, 1], [], []>} : vector<8x8xbf16>, vector<8x256xbf16>, vector<8x256xf32> -> vector<8x256xf32>
    %152 = arith.addf %141, %151 : vector<8x256xf32>
    %c0_142 = arith.constant 0 : index
    %c2_143 = arith.constant 2 : index
    %153 = vector.load %arg11[%c0_142, %c2_143] : memref<8x580xbf16, #tpu.memory_space<vmem>>, vector<8x256xbf16>
    %c2_144 = arith.constant 2 : index
    %c0_145 = arith.constant 0 : index
    %c0_146 = arith.constant 0 : index
    %154 = vector.load %arg6[%c2_144, %c0_145, %c0_146] : memref<9x8x8xbf16, #tpu.memory_space<vmem>>, vector<1x8x8xbf16>
    %155 = vector.shape_cast %154 : vector<1x8x8xbf16> to vector<8x8xbf16>
    %cst_147 = arith.constant dense<0.000000e+00> : vector<8x256xf32>
    %156 = tpu.matmul %155, %153, %cst_147 {dimension_numbers = #tpu.dot_dimension_numbers<[1], [0], [0], [1], [0, 0, 1, 1], [], []>} : vector<8x8xbf16>, vector<8x256xbf16>, vector<8x256xf32> -> vector<8x256xf32>
    %157 = arith.addf %142, %156 : vector<8x256xf32>
    %c0_148 = arith.constant 0 : index
    %c16_149 = arith.constant 16 : index
    %158 = vector.load %arg11[%c0_148, %c16_149] : memref<8x580xbf16, #tpu.memory_space<vmem>>, vector<8x256xbf16>
    %c3_150 = arith.constant 3 : index
    %c0_151 = arith.constant 0 : index
    %c0_152 = arith.constant 0 : index
    %159 = vector.load %arg6[%c3_150, %c0_151, %c0_152] : memref<9x8x8xbf16, #tpu.memory_space<vmem>>, vector<1x8x8xbf16>
    %160 = vector.shape_cast %159 : vector<1x8x8xbf16> to vector<8x8xbf16>
    %cst_153 = arith.constant dense<0.000000e+00> : vector<8x256xf32>
    %161 = tpu.matmul %160, %158, %cst_153 {dimension_numbers = #tpu.dot_dimension_numbers<[1], [0], [0], [1], [0, 0, 1, 1], [], []>} : vector<8x8xbf16>, vector<8x256xbf16>, vector<8x256xf32> -> vector<8x256xf32>
    %162 = arith.addf %147, %161 : vector<8x256xf32>
    %c0_154 = arith.constant 0 : index
    %c17_155 = arith.constant 17 : index
    %163 = vector.load %arg11[%c0_154, %c17_155] : memref<8x580xbf16, #tpu.memory_space<vmem>>, vector<8x256xbf16>
    %c4_156 = arith.constant 4 : index
    %c0_157 = arith.constant 0 : index
    %c0_158 = arith.constant 0 : index
    %164 = vector.load %arg6[%c4_156, %c0_157, %c0_158] : memref<9x8x8xbf16, #tpu.memory_space<vmem>>, vector<1x8x8xbf16>
    %165 = vector.shape_cast %164 : vector<1x8x8xbf16> to vector<8x8xbf16>
    %cst_159 = arith.constant dense<0.000000e+00> : vector<8x256xf32>
    %166 = tpu.matmul %165, %163, %cst_159 {dimension_numbers = #tpu.dot_dimension_numbers<[1], [0], [0], [1], [0, 0, 1, 1], [], []>} : vector<8x8xbf16>, vector<8x256xbf16>, vector<8x256xf32> -> vector<8x256xf32>
    %167 = arith.addf %152, %166 : vector<8x256xf32>
    %c0_160 = arith.constant 0 : index
    %c18_161 = arith.constant 18 : index
    %168 = vector.load %arg11[%c0_160, %c18_161] : memref<8x580xbf16, #tpu.memory_space<vmem>>, vector<8x256xbf16>
    %c5_162 = arith.constant 5 : index
    %c0_163 = arith.constant 0 : index
    %c0_164 = arith.constant 0 : index
    %169 = vector.load %arg6[%c5_162, %c0_163, %c0_164] : memref<9x8x8xbf16, #tpu.memory_space<vmem>>, vector<1x8x8xbf16>
    %170 = vector.shape_cast %169 : vector<1x8x8xbf16> to vector<8x8xbf16>
    %cst_165 = arith.constant dense<0.000000e+00> : vector<8x256xf32>
    %171 = tpu.matmul %170, %168, %cst_165 {dimension_numbers = #tpu.dot_dimension_numbers<[1], [0], [0], [1], [0, 0, 1, 1], [], []>} : vector<8x8xbf16>, vector<8x256xbf16>, vector<8x256xf32> -> vector<8x256xf32>
    %172 = arith.addf %157, %171 : vector<8x256xf32>
    %c0_166 = arith.constant 0 : index
    %c32_167 = arith.constant 32 : index
    %173 = vector.load %arg11[%c0_166, %c32_167] : memref<8x580xbf16, #tpu.memory_space<vmem>>, vector<8x256xbf16>
    %c6_168 = arith.constant 6 : index
    %c0_169 = arith.constant 0 : index
    %c0_170 = arith.constant 0 : index
    %174 = vector.load %arg6[%c6_168, %c0_169, %c0_170] : memref<9x8x8xbf16, #tpu.memory_space<vmem>>, vector<1x8x8xbf16>
    %175 = vector.shape_cast %174 : vector<1x8x8xbf16> to vector<8x8xbf16>
    %cst_171 = arith.constant dense<0.000000e+00> : vector<8x256xf32>
    %176 = tpu.matmul %175, %173, %cst_171 {dimension_numbers = #tpu.dot_dimension_numbers<[1], [0], [0], [1], [0, 0, 1, 1], [], []>} : vector<8x8xbf16>, vector<8x256xbf16>, vector<8x256xf32> -> vector<8x256xf32>
    %177 = arith.addf %162, %176 : vector<8x256xf32>
    %c0_172 = arith.constant 0 : index
    %c33_173 = arith.constant 33 : index
    %178 = vector.load %arg11[%c0_172, %c33_173] : memref<8x580xbf16, #tpu.memory_space<vmem>>, vector<8x256xbf16>
    %c7_174 = arith.constant 7 : index
    %c0_175 = arith.constant 0 : index
    %c0_176 = arith.constant 0 : index
    %179 = vector.load %arg6[%c7_174, %c0_175, %c0_176] : memref<9x8x8xbf16, #tpu.memory_space<vmem>>, vector<1x8x8xbf16>
    %180 = vector.shape_cast %179 : vector<1x8x8xbf16> to vector<8x8xbf16>
    %cst_177 = arith.constant dense<0.000000e+00> : vector<8x256xf32>
    %181 = tpu.matmul %180, %178, %cst_177 {dimension_numbers = #tpu.dot_dimension_numbers<[1], [0], [0], [1], [0, 0, 1, 1], [], []>} : vector<8x8xbf16>, vector<8x256xbf16>, vector<8x256xf32> -> vector<8x256xf32>
    %182 = arith.addf %167, %181 : vector<8x256xf32>
    %c0_178 = arith.constant 0 : index
    %c34_179 = arith.constant 34 : index
    %183 = vector.load %arg11[%c0_178, %c34_179] : memref<8x580xbf16, #tpu.memory_space<vmem>>, vector<8x256xbf16>
    %c8_180 = arith.constant 8 : index
    %c0_181 = arith.constant 0 : index
    %c0_182 = arith.constant 0 : index
    %184 = vector.load %arg6[%c8_180, %c0_181, %c0_182] : memref<9x8x8xbf16, #tpu.memory_space<vmem>>, vector<1x8x8xbf16>
    %185 = vector.shape_cast %184 : vector<1x8x8xbf16> to vector<8x8xbf16>
    %cst_183 = arith.constant dense<0.000000e+00> : vector<8x256xf32>
    %186 = tpu.matmul %185, %183, %cst_183 {dimension_numbers = #tpu.dot_dimension_numbers<[1], [0], [0], [1], [0, 0, 1, 1], [], []>} : vector<8x8xbf16>, vector<8x256xbf16>, vector<8x256xf32> -> vector<8x256xf32>
    %187 = arith.addf %172, %186 : vector<8x256xf32>
    %188 = vector.broadcast %0 : vector<1x256xf32> to vector<8x256xf32>
    %189 = arith.mulf %177, %188 : vector<8x256xf32>
    %190 = arith.addf %189, %182 : vector<8x256xf32>
    %191 = vector.broadcast %1 : vector<1x256xf32> to vector<8x256xf32>
    %192 = arith.mulf %187, %191 : vector<8x256xf32>
    %193 = arith.addf %190, %192 : vector<8x256xf32>
    %c0_184 = arith.constant 0 : index
    %c0_185 = arith.constant 0 : index
    %194 = vector.load %arg7[%c0_184, %c0_185] : memref<8x1xf32, #tpu.memory_space<vmem>>, vector<8x1xf32>
    %195 = vector.broadcast %194 : vector<8x1xf32> to vector<8x256xf32>
    %196 = arith.addf %193, %195 : vector<8x256xf32>
    %c0_186 = arith.constant 0 : index
    %c0_187 = arith.constant 0 : index
    %c0_188 = arith.constant 0 : index
    %197 = vector.load %arg10[%c0_186, %c0_187, %c0_188] : memref<2x8x256xf32, #tpu.memory_space<vmem>>, vector<1x8x256xf32>
    %198 = vector.shape_cast %197 : vector<1x8x256xf32> to vector<8x256xf32>
    %199 = vector.shape_cast %196 : vector<8x256xf32> to vector<1x8x256xf32>
    tpu.vector_store %arg10[%c0_186, %c0_187, %c0_188], %199 {strides = array<i32>} : memref<2x8x256xf32, #tpu.memory_space<vmem>>, vector<1x8x256xf32>,
    %cst_189 = arith.constant 0.000000e+00 : bf16
    %200 = vector.broadcast %cst_189 : bf16 to vector<8x17xbf16>
    %c0_190 = arith.constant 0 : index
    %c290 = arith.constant 290 : index
    %201 = vector.load %arg11[%c0_190, %c290] : memref<8x580xbf16, #tpu.memory_space<vmem>>, vector<8x17xbf16>
    tpu.vector_store %arg11[%c0_190, %c290], %200 {strides = array<i32>} : memref<8x580xbf16, #tpu.memory_space<vmem>>, vector<8x17xbf16>,
    %cst_191 = arith.constant 0.000000e+00 : bf16
    %202 = vector.broadcast %cst_191 : bf16 to vector<8x17xbf16>
    %c0_192 = arith.constant 0 : index
    %c563 = arith.constant 563 : index
    %203 = vector.load %arg11[%c0_192, %c563] : memref<8x580xbf16, #tpu.memory_space<vmem>>, vector<8x17xbf16>
    tpu.vector_store %arg11[%c0_192, %c563], %202 {strides = array<i32>} : memref<8x580xbf16, #tpu.memory_space<vmem>>, vector<8x17xbf16>,
    %cst_193 = arith.constant 0.000000e+00 : bf16
    %204 = vector.broadcast %cst_193 : bf16 to vector<4x256xbf16>
    %c4_194 = arith.constant 4 : index
    %c307 = arith.constant 307 : index
    %205 = vector.load %arg11[%c4_194, %c307] : memref<8x580xbf16, #tpu.memory_space<vmem>>, vector<4x256xbf16>
    tpu.vector_store %arg11[%c4_194, %c307], %204 {strides = array<i32>} : memref<8x580xbf16, #tpu.memory_space<vmem>>, vector<4x256xbf16>,
    %c1_195 = arith.constant 1 : index
    %c0_196 = arith.constant 0 : index
    %c0_197 = arith.constant 0 : index
    %206 = vector.load %arg1[%c1_195, %c0_196, %c0_197] : memref<2x4x256xf32, #tpu.memory_space<vmem>>, vector<1x4x256xf32>
    %207 = vector.shape_cast %206 : vector<1x4x256xf32> to vector<4x256xf32>
    %208 = arith.truncf %207 : vector<4x256xf32> to vector<4x256xbf16>
    %c0_198 = arith.constant 0 : index
    %c307_199 = arith.constant 307 : index
    %209 = vector.load %arg11[%c0_198, %c307_199] : memref<8x580xbf16, #tpu.memory_space<vmem>>, vector<4x256xbf16>
    tpu.vector_store %arg11[%c0_198, %c307_199], %208 {strides = array<i32>} : memref<8x580xbf16, #tpu.memory_space<vmem>>, vector<4x256xbf16>,
    %cst_200 = arith.constant 0.000000e+00 : f32
    %210 = vector.broadcast %cst_200 : f32 to vector<8x256xf32>
    %cst_201 = arith.constant 0.000000e+00 : f32
    %211 = vector.broadcast %cst_201 : f32 to vector<8x256xf32>
    %cst_202 = arith.constant 0.000000e+00 : f32
    %212 = vector.broadcast %cst_202 : f32 to vector<8x256xf32>
    %c0_203 = arith.constant 0 : index
    %c290_204 = arith.constant 290 : index
    %213 = vector.load %arg11[%c0_203, %c290_204] : memref<8x580xbf16, #tpu.memory_space<vmem>>, vector<8x256xbf16>
    %c0_205 = arith.constant 0 : index
    %c0_206 = arith.constant 0 : index
    %c0_207 = arith.constant 0 : index
    %214 = vector.load %arg2[%c0_205, %c0_206, %c0_207] : memref<9x8x8xbf16, #tpu.memory_space<vmem>>, vector<1x8x8xbf16>
    %215 = vector.shape_cast %214 : vector<1x8x8xbf16> to vector<8x8xbf16>
    %cst_208 = arith.constant dense<0.000000e+00> : vector<8x256xf32>
    %216 = tpu.matmul %215, %213, %cst_208 {dimension_numbers = #tpu.dot_dimension_numbers<[1], [0], [0], [1], [0, 0, 1, 1], [], []>} : vector<8x8xbf16>, vector<8x256xbf16>, vector<8x256xf32> -> vector<8x256xf32>
    %217 = arith.addf %210, %216 : vector<8x256xf32>
    %c0_209 = arith.constant 0 : index
    %c291 = arith.constant 291 : index
    %218 = vector.load %arg11[%c0_209, %c291] : memref<8x580xbf16, #tpu.memory_space<vmem>>, vector<8x256xbf16>
    %c1_210 = arith.constant 1 : index
    %c0_211 = arith.constant 0 : index
    %c0_212 = arith.constant 0 : index
    %219 = vector.load %arg2[%c1_210, %c0_211, %c0_212] : memref<9x8x8xbf16, #tpu.memory_space<vmem>>, vector<1x8x8xbf16>
    %220 = vector.shape_cast %219 : vector<1x8x8xbf16> to vector<8x8xbf16>
    %cst_213 = arith.constant dense<0.000000e+00> : vector<8x256xf32>
    %221 = tpu.matmul %220, %218, %cst_213 {dimension_numbers = #tpu.dot_dimension_numbers<[1], [0], [0], [1], [0, 0, 1, 1], [], []>} : vector<8x8xbf16>, vector<8x256xbf16>, vector<8x256xf32> -> vector<8x256xf32>
    %222 = arith.addf %211, %221 : vector<8x256xf32>
    %c0_214 = arith.constant 0 : index
    %c292 = arith.constant 292 : index
    %223 = vector.load %arg11[%c0_214, %c292] : memref<8x580xbf16, #tpu.memory_space<vmem>>, vector<8x256xbf16>
    %c2_215 = arith.constant 2 : index
    %c0_216 = arith.constant 0 : index
    %c0_217 = arith.constant 0 : index
    %224 = vector.load %arg2[%c2_215, %c0_216, %c0_217] : memref<9x8x8xbf16, #tpu.memory_space<vmem>>, vector<1x8x8xbf16>
    %225 = vector.shape_cast %224 : vector<1x8x8xbf16> to vector<8x8xbf16>
    %cst_218 = arith.constant dense<0.000000e+00> : vector<8x256xf32>
    %226 = tpu.matmul %225, %223, %cst_218 {dimension_numbers = #tpu.dot_dimension_numbers<[1], [0], [0], [1], [0, 0, 1, 1], [], []>} : vector<8x8xbf16>, vector<8x256xbf16>, vector<8x256xf32> -> vector<8x256xf32>
    %227 = arith.addf %212, %226 : vector<8x256xf32>
    %c0_219 = arith.constant 0 : index
    %c306 = arith.constant 306 : index
    %228 = vector.load %arg11[%c0_219, %c306] : memref<8x580xbf16, #tpu.memory_space<vmem>>, vector<8x256xbf16>
    %c3_220 = arith.constant 3 : index
    %c0_221 = arith.constant 0 : index
    %c0_222 = arith.constant 0 : index
    %229 = vector.load %arg2[%c3_220, %c0_221, %c0_222] : memref<9x8x8xbf16, #tpu.memory_space<vmem>>, vector<1x8x8xbf16>
    %230 = vector.shape_cast %229 : vector<1x8x8xbf16> to vector<8x8xbf16>
    %cst_223 = arith.constant dense<0.000000e+00> : vector<8x256xf32>
    %231 = tpu.matmul %230, %228, %cst_223 {dimension_numbers = #tpu.dot_dimension_numbers<[1], [0], [0], [1], [0, 0, 1, 1], [], []>} : vector<8x8xbf16>, vector<8x256xbf16>, vector<8x256xf32> -> vector<8x256xf32>
    %232 = arith.addf %217, %231 : vector<8x256xf32>
    %c0_224 = arith.constant 0 : index
    %c307_225 = arith.constant 307 : index
    %233 = vector.load %arg11[%c0_224, %c307_225] : memref<8x580xbf16, #tpu.memory_space<vmem>>, vector<8x256xbf16>
    %c4_226 = arith.constant 4 : index
    %c0_227 = arith.constant 0 : index
    %c0_228 = arith.constant 0 : index
    %234 = vector.load %arg2[%c4_226, %c0_227, %c0_228] : memref<9x8x8xbf16, #tpu.memory_space<vmem>>, vector<1x8x8xbf16>
    %235 = vector.shape_cast %234 : vector<1x8x8xbf16> to vector<8x8xbf16>
    %cst_229 = arith.constant dense<0.000000e+00> : vector<8x256xf32>
    %236 = tpu.matmul %235, %233, %cst_229 {dimension_numbers = #tpu.dot_dimension_numbers<[1], [0], [0], [1], [0, 0, 1, 1], [], []>} : vector<8x8xbf16>, vector<8x256xbf16>, vector<8x256xf32> -> vector<8x256xf32>
    %237 = arith.addf %222, %236 : vector<8x256xf32>
    %c0_230 = arith.constant 0 : index
    %c308 = arith.constant 308 : index
    %238 = vector.load %arg11[%c0_230, %c308] : memref<8x580xbf16, #tpu.memory_space<vmem>>, vector<8x256xbf16>
    %c5_231 = arith.constant 5 : index
    %c0_232 = arith.constant 0 : index
    %c0_233 = arith.constant 0 : index
    %239 = vector.load %arg2[%c5_231, %c0_232, %c0_233] : memref<9x8x8xbf16, #tpu.memory_space<vmem>>, vector<1x8x8xbf16>
    %240 = vector.shape_cast %239 : vector<1x8x8xbf16> to vector<8x8xbf16>
    %cst_234 = arith.constant dense<0.000000e+00> : vector<8x256xf32>
    %241 = tpu.matmul %240, %238, %cst_234 {dimension_numbers = #tpu.dot_dimension_numbers<[1], [0], [0], [1], [0, 0, 1, 1], [], []>} : vector<8x8xbf16>, vector<8x256xbf16>, vector<8x256xf32> -> vector<8x256xf32>
    %242 = arith.addf %227, %241 : vector<8x256xf32>
    %c0_235 = arith.constant 0 : index
    %c322 = arith.constant 322 : index
    %243 = vector.load %arg11[%c0_235, %c322] : memref<8x580xbf16, #tpu.memory_space<vmem>>, vector<8x256xbf16>
    %c6_236 = arith.constant 6 : index
    %c0_237 = arith.constant 0 : index
    %c0_238 = arith.constant 0 : index
    %244 = vector.load %arg2[%c6_236, %c0_237, %c0_238] : memref<9x8x8xbf16, #tpu.memory_space<vmem>>, vector<1x8x8xbf16>
    %245 = vector.shape_cast %244 : vector<1x8x8xbf16> to vector<8x8xbf16>
    %cst_239 = arith.constant dense<0.000000e+00> : vector<8x256xf32>
    %246 = tpu.matmul %245, %243, %cst_239 {dimension_numbers = #tpu.dot_dimension_numbers<[1], [0], [0], [1], [0, 0, 1, 1], [], []>} : vector<8x8xbf16>, vector<8x256xbf16>, vector<8x256xf32> -> vector<8x256xf32>
    %247 = arith.addf %232, %246 : vector<8x256xf32>
    %c0_240 = arith.constant 0 : index
    %c323 = arith.constant 323 : index
    %248 = vector.load %arg11[%c0_240, %c323] : memref<8x580xbf16, #tpu.memory_space<vmem>>, vector<8x256xbf16>
    %c7_241 = arith.constant 7 : index
    %c0_242 = arith.constant 0 : index
    %c0_243 = arith.constant 0 : index
    %249 = vector.load %arg2[%c7_241, %c0_242, %c0_243] : memref<9x8x8xbf16, #tpu.memory_space<vmem>>, vector<1x8x8xbf16>
    %250 = vector.shape_cast %249 : vector<1x8x8xbf16> to vector<8x8xbf16>
    %cst_244 = arith.constant dense<0.000000e+00> : vector<8x256xf32>
    %251 = tpu.matmul %250, %248, %cst_244 {dimension_numbers = #tpu.dot_dimension_numbers<[1], [0], [0], [1], [0, 0, 1, 1], [], []>} : vector<8x8xbf16>, vector<8x256xbf16>, vector<8x256xf32> -> vector<8x256xf32>
    %252 = arith.addf %237, %251 : vector<8x256xf32>
    %c0_245 = arith.constant 0 : index
    %c324 = arith.constant 324 : index
    %253 = vector.load %arg11[%c0_245, %c324] : memref<8x580xbf16, #tpu.memory_space<vmem>>, vector<8x256xbf16>
    %c8_246 = arith.constant 8 : index
    %c0_247 = arith.constant 0 : index
    %c0_248 = arith.constant 0 : index
    %254 = vector.load %arg2[%c8_246, %c0_247, %c0_248] : memref<9x8x8xbf16, #tpu.memory_space<vmem>>, vector<1x8x8xbf16>
    %255 = vector.shape_cast %254 : vector<1x8x8xbf16> to vector<8x8xbf16>
    %cst_249 = arith.constant dense<0.000000e+00> : vector<8x256xf32>
    %256 = tpu.matmul %255, %253, %cst_249 {dimension_numbers = #tpu.dot_dimension_numbers<[1], [0], [0], [1], [0, 0, 1, 1], [], []>} : vector<8x8xbf16>, vector<8x256xbf16>, vector<8x256xf32> -> vector<8x256xf32>
    %257 = arith.addf %242, %256 : vector<8x256xf32>
    %258 = vector.broadcast %0 : vector<1x256xf32> to vector<8x256xf32>
    %259 = arith.mulf %247, %258 : vector<8x256xf32>
    %260 = arith.addf %259, %252 : vector<8x256xf32>
    %261 = vector.broadcast %1 : vector<1x256xf32> to vector<8x256xf32>
    %262 = arith.mulf %257, %261 : vector<8x256xf32>
    %263 = arith.addf %260, %262 : vector<8x256xf32>
    %c0_250 = arith.constant 0 : index
    %c0_251 = arith.constant 0 : index
    %264 = vector.load %arg3[%c0_250, %c0_251] : memref<8x1xf32, #tpu.memory_space<vmem>>, vector<8x1xf32>
    %265 = vector.broadcast %264 : vector<8x1xf32> to vector<8x256xf32>
    %266 = arith.addf %263, %265 : vector<8x256xf32>
    %cst_252 = arith.constant 0.000000e+00 : f32
    %267 = vector.broadcast %cst_252 : f32 to vector<8x256xf32>
    %268 = arith.cmpf oge, %266, %267 : vector<8x256xf32>
    %cst_253 = arith.constant 0.00999999977 : f32
    %269 = vector.broadcast %cst_253 : f32 to vector<8x256xf32>
    %270 = arith.mulf %269, %266 : vector<8x256xf32>
    %271 = arith.select %268, %266, %270 : vector<8x256xi1>, vector<8x256xf32>
    %272 = arith.truncf %271 : vector<8x256xf32> to vector<8x256xbf16>
    %c0_254 = arith.constant 0 : index
    %c307_255 = arith.constant 307 : index
    %273 = vector.load %arg11[%c0_254, %c307_255] : memref<8x580xbf16, #tpu.memory_space<vmem>>, vector<8x256xbf16>
    tpu.vector_store %arg11[%c0_254, %c307_255], %272 {strides = array<i32>} : memref<8x580xbf16, #tpu.memory_space<vmem>>, vector<8x256xbf16>,
    %cst_256 = arith.constant 0.000000e+00 : f32
    %274 = vector.broadcast %cst_256 : f32 to vector<8x256xf32>
    %cst_257 = arith.constant 0.000000e+00 : f32
    %275 = vector.broadcast %cst_257 : f32 to vector<8x256xf32>
    %cst_258 = arith.constant 0.000000e+00 : f32
    %276 = vector.broadcast %cst_258 : f32 to vector<8x256xf32>
    %c0_259 = arith.constant 0 : index
    %c290_260 = arith.constant 290 : index
    %277 = vector.load %arg11[%c0_259, %c290_260] : memref<8x580xbf16, #tpu.memory_space<vmem>>, vector<8x256xbf16>
    %c0_261 = arith.constant 0 : index
    %c0_262 = arith.constant 0 : index
    %c0_263 = arith.constant 0 : index
    %278 = vector.load %arg4[%c0_261, %c0_262, %c0_263] : memref<9x8x8xbf16, #tpu.memory_space<vmem>>, vector<1x8x8xbf16>
    %279 = vector.shape_cast %278 : vector<1x8x8xbf16> to vector<8x8xbf16>
    %cst_264 = arith.constant dense<0.000000e+00> : vector<8x256xf32>
    %280 = tpu.matmul %279, %277, %cst_264 {dimension_numbers = #tpu.dot_dimension_numbers<[1], [0], [0], [1], [0, 0, 1, 1], [], []>} : vector<8x8xbf16>, vector<8x256xbf16>, vector<8x256xf32> -> vector<8x256xf32>
    %281 = arith.addf %274, %280 : vector<8x256xf32>
    %c0_265 = arith.constant 0 : index
    %c291_266 = arith.constant 291 : index
    %282 = vector.load %arg11[%c0_265, %c291_266] : memref<8x580xbf16, #tpu.memory_space<vmem>>, vector<8x256xbf16>
    %c1_267 = arith.constant 1 : index
    %c0_268 = arith.constant 0 : index
    %c0_269 = arith.constant 0 : index
    %283 = vector.load %arg4[%c1_267, %c0_268, %c0_269] : memref<9x8x8xbf16, #tpu.memory_space<vmem>>, vector<1x8x8xbf16>
    %284 = vector.shape_cast %283 : vector<1x8x8xbf16> to vector<8x8xbf16>
    %cst_270 = arith.constant dense<0.000000e+00> : vector<8x256xf32>
    %285 = tpu.matmul %284, %282, %cst_270 {dimension_numbers = #tpu.dot_dimension_numbers<[1], [0], [0], [1], [0, 0, 1, 1], [], []>} : vector<8x8xbf16>, vector<8x256xbf16>, vector<8x256xf32> -> vector<8x256xf32>
    %286 = arith.addf %275, %285 : vector<8x256xf32>
    %c0_271 = arith.constant 0 : index
    %c292_272 = arith.constant 292 : index
    %287 = vector.load %arg11[%c0_271, %c292_272] : memref<8x580xbf16, #tpu.memory_space<vmem>>, vector<8x256xbf16>
    %c2_273 = arith.constant 2 : index
    %c0_274 = arith.constant 0 : index
    %c0_275 = arith.constant 0 : index
    %288 = vector.load %arg4[%c2_273, %c0_274, %c0_275] : memref<9x8x8xbf16, #tpu.memory_space<vmem>>, vector<1x8x8xbf16>
    %289 = vector.shape_cast %288 : vector<1x8x8xbf16> to vector<8x8xbf16>
    %cst_276 = arith.constant dense<0.000000e+00> : vector<8x256xf32>
    %290 = tpu.matmul %289, %287, %cst_276 {dimension_numbers = #tpu.dot_dimension_numbers<[1], [0], [0], [1], [0, 0, 1, 1], [], []>} : vector<8x8xbf16>, vector<8x256xbf16>, vector<8x256xf32> -> vector<8x256xf32>
    %291 = arith.addf %276, %290 : vector<8x256xf32>
    %c0_277 = arith.constant 0 : index
    %c306_278 = arith.constant 306 : index
    %292 = vector.load %arg11[%c0_277, %c306_278] : memref<8x580xbf16, #tpu.memory_space<vmem>>, vector<8x256xbf16>
    %c3_279 = arith.constant 3 : index
    %c0_280 = arith.constant 0 : index
    %c0_281 = arith.constant 0 : index
    %293 = vector.load %arg4[%c3_279, %c0_280, %c0_281] : memref<9x8x8xbf16, #tpu.memory_space<vmem>>, vector<1x8x8xbf16>
    %294 = vector.shape_cast %293 : vector<1x8x8xbf16> to vector<8x8xbf16>
    %cst_282 = arith.constant dense<0.000000e+00> : vector<8x256xf32>
    %295 = tpu.matmul %294, %292, %cst_282 {dimension_numbers = #tpu.dot_dimension_numbers<[1], [0], [0], [1], [0, 0, 1, 1], [], []>} : vector<8x8xbf16>, vector<8x256xbf16>, vector<8x256xf32> -> vector<8x256xf32>
    %296 = arith.addf %281, %295 : vector<8x256xf32>
    %c0_283 = arith.constant 0 : index
    %c307_284 = arith.constant 307 : index
    %297 = vector.load %arg11[%c0_283, %c307_284] : memref<8x580xbf16, #tpu.memory_space<vmem>>, vector<8x256xbf16>
    %c4_285 = arith.constant 4 : index
    %c0_286 = arith.constant 0 : index
    %c0_287 = arith.constant 0 : index
    %298 = vector.load %arg4[%c4_285, %c0_286, %c0_287] : memref<9x8x8xbf16, #tpu.memory_space<vmem>>, vector<1x8x8xbf16>
    %299 = vector.shape_cast %298 : vector<1x8x8xbf16> to vector<8x8xbf16>
    %cst_288 = arith.constant dense<0.000000e+00> : vector<8x256xf32>
    %300 = tpu.matmul %299, %297, %cst_288 {dimension_numbers = #tpu.dot_dimension_numbers<[1], [0], [0], [1], [0, 0, 1, 1], [], []>} : vector<8x8xbf16>, vector<8x256xbf16>, vector<8x256xf32> -> vector<8x256xf32>
    %301 = arith.addf %286, %300 : vector<8x256xf32>
    %c0_289 = arith.constant 0 : index
    %c308_290 = arith.constant 308 : index
    %302 = vector.load %arg11[%c0_289, %c308_290] : memref<8x580xbf16, #tpu.memory_space<vmem>>, vector<8x256xbf16>
    %c5_291 = arith.constant 5 : index
    %c0_292 = arith.constant 0 : index
    %c0_293 = arith.constant 0 : index
    %303 = vector.load %arg4[%c5_291, %c0_292, %c0_293] : memref<9x8x8xbf16, #tpu.memory_space<vmem>>, vector<1x8x8xbf16>
    %304 = vector.shape_cast %303 : vector<1x8x8xbf16> to vector<8x8xbf16>
    %cst_294 = arith.constant dense<0.000000e+00> : vector<8x256xf32>
    %305 = tpu.matmul %304, %302, %cst_294 {dimension_numbers = #tpu.dot_dimension_numbers<[1], [0], [0], [1], [0, 0, 1, 1], [], []>} : vector<8x8xbf16>, vector<8x256xbf16>, vector<8x256xf32> -> vector<8x256xf32>
    %306 = arith.addf %291, %305 : vector<8x256xf32>
    %c0_295 = arith.constant 0 : index
    %c322_296 = arith.constant 322 : index
    %307 = vector.load %arg11[%c0_295, %c322_296] : memref<8x580xbf16, #tpu.memory_space<vmem>>, vector<8x256xbf16>
    %c6_297 = arith.constant 6 : index
    %c0_298 = arith.constant 0 : index
    %c0_299 = arith.constant 0 : index
    %308 = vector.load %arg4[%c6_297, %c0_298, %c0_299] : memref<9x8x8xbf16, #tpu.memory_space<vmem>>, vector<1x8x8xbf16>
    %309 = vector.shape_cast %308 : vector<1x8x8xbf16> to vector<8x8xbf16>
    %cst_300 = arith.constant dense<0.000000e+00> : vector<8x256xf32>
    %310 = tpu.matmul %309, %307, %cst_300 {dimension_numbers = #tpu.dot_dimension_numbers<[1], [0], [0], [1], [0, 0, 1, 1], [], []>} : vector<8x8xbf16>, vector<8x256xbf16>, vector<8x256xf32> -> vector<8x256xf32>
    %311 = arith.addf %296, %310 : vector<8x256xf32>
    %c0_301 = arith.constant 0 : index
    %c323_302 = arith.constant 323 : index
    %312 = vector.load %arg11[%c0_301, %c323_302] : memref<8x580xbf16, #tpu.memory_space<vmem>>, vector<8x256xbf16>
    %c7_303 = arith.constant 7 : index
    %c0_304 = arith.constant 0 : index
    %c0_305 = arith.constant 0 : index
    %313 = vector.load %arg4[%c7_303, %c0_304, %c0_305] : memref<9x8x8xbf16, #tpu.memory_space<vmem>>, vector<1x8x8xbf16>
    %314 = vector.shape_cast %313 : vector<1x8x8xbf16> to vector<8x8xbf16>
    %cst_306 = arith.constant dense<0.000000e+00> : vector<8x256xf32>
    %315 = tpu.matmul %314, %312, %cst_306 {dimension_numbers = #tpu.dot_dimension_numbers<[1], [0], [0], [1], [0, 0, 1, 1], [], []>} : vector<8x8xbf16>, vector<8x256xbf16>, vector<8x256xf32> -> vector<8x256xf32>
    %316 = arith.addf %301, %315 : vector<8x256xf32>
    %c0_307 = arith.constant 0 : index
    %c324_308 = arith.constant 324 : index
    %317 = vector.load %arg11[%c0_307, %c324_308] : memref<8x580xbf16, #tpu.memory_space<vmem>>, vector<8x256xbf16>
    %c8_309 = arith.constant 8 : index
    %c0_310 = arith.constant 0 : index
    %c0_311 = arith.constant 0 : index
    %318 = vector.load %arg4[%c8_309, %c0_310, %c0_311] : memref<9x8x8xbf16, #tpu.memory_space<vmem>>, vector<1x8x8xbf16>
    %319 = vector.shape_cast %318 : vector<1x8x8xbf16> to vector<8x8xbf16>
    %cst_312 = arith.constant dense<0.000000e+00> : vector<8x256xf32>
    %320 = tpu.matmul %319, %317, %cst_312 {dimension_numbers = #tpu.dot_dimension_numbers<[1], [0], [0], [1], [0, 0, 1, 1], [], []>} : vector<8x8xbf16>, vector<8x256xbf16>, vector<8x256xf32> -> vector<8x256xf32>
    %321 = arith.addf %306, %320 : vector<8x256xf32>
    %322 = vector.broadcast %0 : vector<1x256xf32> to vector<8x256xf32>
    %323 = arith.mulf %311, %322 : vector<8x256xf32>
    %324 = arith.addf %323, %316 : vector<8x256xf32>
    %325 = vector.broadcast %1 : vector<1x256xf32> to vector<8x256xf32>
    %326 = arith.mulf %321, %325 : vector<8x256xf32>
    %327 = arith.addf %324, %326 : vector<8x256xf32>
    %c0_313 = arith.constant 0 : index
    %c0_314 = arith.constant 0 : index
    %328 = vector.load %arg5[%c0_313, %c0_314] : memref<8x1xf32, #tpu.memory_space<vmem>>, vector<8x1xf32>
    %329 = vector.broadcast %328 : vector<8x1xf32> to vector<8x256xf32>
    %330 = arith.addf %327, %329 : vector<8x256xf32>
    %cst_315 = arith.constant 0.000000e+00 : f32
    %331 = vector.broadcast %cst_315 : f32 to vector<8x256xf32>
    %332 = arith.cmpf oge, %330, %331 : vector<8x256xf32>
    %cst_316 = arith.constant 0.00999999977 : f32
    %333 = vector.broadcast %cst_316 : f32 to vector<8x256xf32>
    %334 = arith.mulf %333, %330 : vector<8x256xf32>
    %335 = arith.select %332, %330, %334 : vector<8x256xi1>, vector<8x256xf32>
    %336 = arith.truncf %335 : vector<8x256xf32> to vector<8x256xbf16>
    %c0_317 = arith.constant 0 : index
    %c307_318 = arith.constant 307 : index
    %337 = vector.load %arg11[%c0_317, %c307_318] : memref<8x580xbf16, #tpu.memory_space<vmem>>, vector<8x256xbf16>
    tpu.vector_store %arg11[%c0_317, %c307_318], %336 {strides = array<i32>} : memref<8x580xbf16, #tpu.memory_space<vmem>>, vector<8x256xbf16>,
    %cst_319 = arith.constant 0.000000e+00 : f32
    %338 = vector.broadcast %cst_319 : f32 to vector<8x256xf32>
    %cst_320 = arith.constant 0.000000e+00 : f32
    %339 = vector.broadcast %cst_320 : f32 to vector<8x256xf32>
    %cst_321 = arith.constant 0.000000e+00 : f32
    %340 = vector.broadcast %cst_321 : f32 to vector<8x256xf32>
    %c0_322 = arith.constant 0 : index
    %c290_323 = arith.constant 290 : index
    %341 = vector.load %arg11[%c0_322, %c290_323] : memref<8x580xbf16, #tpu.memory_space<vmem>>, vector<8x256xbf16>
    %c0_324 = arith.constant 0 : index
    %c0_325 = arith.constant 0 : index
    %c0_326 = arith.constant 0 : index
    %342 = vector.load %arg6[%c0_324, %c0_325, %c0_326] : memref<9x8x8xbf16, #tpu.memory_space<vmem>>, vector<1x8x8xbf16>
    %343 = vector.shape_cast %342 : vector<1x8x8xbf16> to vector<8x8xbf16>
    %cst_327 = arith.constant dense<0.000000e+00> : vector<8x256xf32>
    %344 = tpu.matmul %343, %341, %cst_327 {dimension_numbers = #tpu.dot_dimension_numbers<[1], [0], [0], [1], [0, 0, 1, 1], [], []>} : vector<8x8xbf16>, vector<8x256xbf16>, vector<8x256xf32> -> vector<8x256xf32>
    %345 = arith.addf %338, %344 : vector<8x256xf32>
    %c0_328 = arith.constant 0 : index
    %c291_329 = arith.constant 291 : index
    %346 = vector.load %arg11[%c0_328, %c291_329] : memref<8x580xbf16, #tpu.memory_space<vmem>>, vector<8x256xbf16>
    %c1_330 = arith.constant 1 : index
    %c0_331 = arith.constant 0 : index
    %c0_332 = arith.constant 0 : index
    %347 = vector.load %arg6[%c1_330, %c0_331, %c0_332] : memref<9x8x8xbf16, #tpu.memory_space<vmem>>, vector<1x8x8xbf16>
    %348 = vector.shape_cast %347 : vector<1x8x8xbf16> to vector<8x8xbf16>
    %cst_333 = arith.constant dense<0.000000e+00> : vector<8x256xf32>
    %349 = tpu.matmul %348, %346, %cst_333 {dimension_numbers = #tpu.dot_dimension_numbers<[1], [0], [0], [1], [0, 0, 1, 1], [], []>} : vector<8x8xbf16>, vector<8x256xbf16>, vector<8x256xf32> -> vector<8x256xf32>
    %350 = arith.addf %339, %349 : vector<8x256xf32>
    %c0_334 = arith.constant 0 : index
    %c292_335 = arith.constant 292 : index
    %351 = vector.load %arg11[%c0_334, %c292_335] : memref<8x580xbf16, #tpu.memory_space<vmem>>, vector<8x256xbf16>
    %c2_336 = arith.constant 2 : index
    %c0_337 = arith.constant 0 : index
    %c0_338 = arith.constant 0 : index
    %352 = vector.load %arg6[%c2_336, %c0_337, %c0_338] : memref<9x8x8xbf16, #tpu.memory_space<vmem>>, vector<1x8x8xbf16>
    %353 = vector.shape_cast %352 : vector<1x8x8xbf16> to vector<8x8xbf16>
    %cst_339 = arith.constant dense<0.000000e+00> : vector<8x256xf32>
    %354 = tpu.matmul %353, %351, %cst_339 {dimension_numbers = #tpu.dot_dimension_numbers<[1], [0], [0], [1], [0, 0, 1, 1], [], []>} : vector<8x8xbf16>, vector<8x256xbf16>, vector<8x256xf32> -> vector<8x256xf32>
    %355 = arith.addf %340, %354 : vector<8x256xf32>
    %c0_340 = arith.constant 0 : index
    %c306_341 = arith.constant 306 : index
    %356 = vector.load %arg11[%c0_340, %c306_341] : memref<8x580xbf16, #tpu.memory_space<vmem>>, vector<8x256xbf16>
    %c3_342 = arith.constant 3 : index
    %c0_343 = arith.constant 0 : index
    %c0_344 = arith.constant 0 : index
    %357 = vector.load %arg6[%c3_342, %c0_343, %c0_344] : memref<9x8x8xbf16, #tpu.memory_space<vmem>>, vector<1x8x8xbf16>
    %358 = vector.shape_cast %357 : vector<1x8x8xbf16> to vector<8x8xbf16>
    %cst_345 = arith.constant dense<0.000000e+00> : vector<8x256xf32>
    %359 = tpu.matmul %358, %356, %cst_345 {dimension_numbers = #tpu.dot_dimension_numbers<[1], [0], [0], [1], [0, 0, 1, 1], [], []>} : vector<8x8xbf16>, vector<8x256xbf16>, vector<8x256xf32> -> vector<8x256xf32>
    %360 = arith.addf %345, %359 : vector<8x256xf32>
    %c0_346 = arith.constant 0 : index
    %c307_347 = arith.constant 307 : index
    %361 = vector.load %arg11[%c0_346, %c307_347] : memref<8x580xbf16, #tpu.memory_space<vmem>>, vector<8x256xbf16>
    %c4_348 = arith.constant 4 : index
    %c0_349 = arith.constant 0 : index
    %c0_350 = arith.constant 0 : index
    %362 = vector.load %arg6[%c4_348, %c0_349, %c0_350] : memref<9x8x8xbf16, #tpu.memory_space<vmem>>, vector<1x8x8xbf16>
    %363 = vector.shape_cast %362 : vector<1x8x8xbf16> to vector<8x8xbf16>
    %cst_351 = arith.constant dense<0.000000e+00> : vector<8x256xf32>
    %364 = tpu.matmul %363, %361, %cst_351 {dimension_numbers = #tpu.dot_dimension_numbers<[1], [0], [0], [1], [0, 0, 1, 1], [], []>} : vector<8x8xbf16>, vector<8x256xbf16>, vector<8x256xf32> -> vector<8x256xf32>
    %365 = arith.addf %350, %364 : vector<8x256xf32>
    %c0_352 = arith.constant 0 : index
    %c308_353 = arith.constant 308 : index
    %366 = vector.load %arg11[%c0_352, %c308_353] : memref<8x580xbf16, #tpu.memory_space<vmem>>, vector<8x256xbf16>
    %c5_354 = arith.constant 5 : index
    %c0_355 = arith.constant 0 : index
    %c0_356 = arith.constant 0 : index
    %367 = vector.load %arg6[%c5_354, %c0_355, %c0_356] : memref<9x8x8xbf16, #tpu.memory_space<vmem>>, vector<1x8x8xbf16>
    %368 = vector.shape_cast %367 : vector<1x8x8xbf16> to vector<8x8xbf16>
    %cst_357 = arith.constant dense<0.000000e+00> : vector<8x256xf32>
    %369 = tpu.matmul %368, %366, %cst_357 {dimension_numbers = #tpu.dot_dimension_numbers<[1], [0], [0], [1], [0, 0, 1, 1], [], []>} : vector<8x8xbf16>, vector<8x256xbf16>, vector<8x256xf32> -> vector<8x256xf32>
    %370 = arith.addf %355, %369 : vector<8x256xf32>
    %c0_358 = arith.constant 0 : index
    %c322_359 = arith.constant 322 : index
    %371 = vector.load %arg11[%c0_358, %c322_359] : memref<8x580xbf16, #tpu.memory_space<vmem>>, vector<8x256xbf16>
    %c6_360 = arith.constant 6 : index
    %c0_361 = arith.constant 0 : index
    %c0_362 = arith.constant 0 : index
    %372 = vector.load %arg6[%c6_360, %c0_361, %c0_362] : memref<9x8x8xbf16, #tpu.memory_space<vmem>>, vector<1x8x8xbf16>
    %373 = vector.shape_cast %372 : vector<1x8x8xbf16> to vector<8x8xbf16>
    %cst_363 = arith.constant dense<0.000000e+00> : vector<8x256xf32>
    %374 = tpu.matmul %373, %371, %cst_363 {dimension_numbers = #tpu.dot_dimension_numbers<[1], [0], [0], [1], [0, 0, 1, 1], [], []>} : vector<8x8xbf16>, vector<8x256xbf16>, vector<8x256xf32> -> vector<8x256xf32>
    %375 = arith.addf %360, %374 : vector<8x256xf32>
    %c0_364 = arith.constant 0 : index
    %c323_365 = arith.constant 323 : index
    %376 = vector.load %arg11[%c0_364, %c323_365] : memref<8x580xbf16, #tpu.memory_space<vmem>>, vector<8x256xbf16>
    %c7_366 = arith.constant 7 : index
    %c0_367 = arith.constant 0 : index
    %c0_368 = arith.constant 0 : index
    %377 = vector.load %arg6[%c7_366, %c0_367, %c0_368] : memref<9x8x8xbf16, #tpu.memory_space<vmem>>, vector<1x8x8xbf16>
    %378 = vector.shape_cast %377 : vector<1x8x8xbf16> to vector<8x8xbf16>
    %cst_369 = arith.constant dense<0.000000e+00> : vector<8x256xf32>
    %379 = tpu.matmul %378, %376, %cst_369 {dimension_numbers = #tpu.dot_dimension_numbers<[1], [0], [0], [1], [0, 0, 1, 1], [], []>} : vector<8x8xbf16>, vector<8x256xbf16>, vector<8x256xf32> -> vector<8x256xf32>
    %380 = arith.addf %365, %379 : vector<8x256xf32>
    %c0_370 = arith.constant 0 : index
    %c324_371 = arith.constant 324 : index
    %381 = vector.load %arg11[%c0_370, %c324_371] : memref<8x580xbf16, #tpu.memory_space<vmem>>, vector<8x256xbf16>
    %c8_372 = arith.constant 8 : index
    %c0_373 = arith.constant 0 : index
    %c0_374 = arith.constant 0 : index
    %382 = vector.load %arg6[%c8_372, %c0_373, %c0_374] : memref<9x8x8xbf16, #tpu.memory_space<vmem>>, vector<1x8x8xbf16>
    %383 = vector.shape_cast %382 : vector<1x8x8xbf16> to vector<8x8xbf16>
    %cst_375 = arith.constant dense<0.000000e+00> : vector<8x256xf32>
    %384 = tpu.matmul %383, %381, %cst_375 {dimension_numbers = #tpu.dot_dimension_numbers<[1], [0], [0], [1], [0, 0, 1, 1], [], []>} : vector<8x8xbf16>, vector<8x256xbf16>, vector<8x256xf32> -> vector<8x256xf32>
    %385 = arith.addf %370, %384 : vector<8x256xf32>
    %386 = vector.broadcast %0 : vector<1x256xf32> to vector<8x256xf32>
    %387 = arith.mulf %375, %386 : vector<8x256xf32>
    %388 = arith.addf %387, %380 : vector<8x256xf32>
    %389 = vector.broadcast %1 : vector<1x256xf32> to vector<8x256xf32>
    %390 = arith.mulf %385, %389 : vector<8x256xf32>
    %391 = arith.addf %388, %390 : vector<8x256xf32>
    %c0_376 = arith.constant 0 : index
    %c0_377 = arith.constant 0 : index
    %392 = vector.load %arg7[%c0_376, %c0_377] : memref<8x1xf32, #tpu.memory_space<vmem>>, vector<8x1xf32>
    %393 = vector.broadcast %392 : vector<8x1xf32> to vector<8x256xf32>
    %394 = arith.addf %391, %393 : vector<8x256xf32>
    %c1_378 = arith.constant 1 : index
    %c0_379 = arith.constant 0 : index
    %c0_380 = arith.constant 0 : index
    %395 = vector.load %arg10[%c1_378, %c0_379, %c0_380] : memref<2x8x256xf32, #tpu.memory_space<vmem>>, vector<1x8x256xf32>
    %396 = vector.shape_cast %395 : vector<1x8x256xf32> to vector<8x256xf32>
    %397 = vector.shape_cast %394 : vector<8x256xf32> to vector<1x8x256xf32>
    tpu.vector_store %arg10[%c1_378, %c0_379, %c0_380], %397 {strides = array<i32>} : memref<2x8x256xf32, #tpu.memory_space<vmem>>, vector<1x8x256xf32>,
    return
  }
  func.func @transform_0(%arg0: i32) -> (i32, i32, i32) {
    %c0_i32 = arith.constant 0 : i32
    %c0_i32_0 = arith.constant 0 : i32
    %c0_i32_1 = arith.constant 0 : i32
    return %arg0, %c0_i32, %c0_i32_0 : i32, i32, i32
  }
  func.func @transform_1(%arg0: i32) -> (i32, i32, i32) {
    %c0_i32 = arith.constant 0 : i32
    %c0_i32_0 = arith.constant 0 : i32
    %c0_i32_1 = arith.constant 0 : i32
    %c0_i32_2 = arith.constant 0 : i32
    return %c0_i32, %c0_i32_0, %c0_i32_1 : i32, i32, i32
  }
  func.func @transform_2(%arg0: i32) -> (i32, i32) {
    %c0_i32 = arith.constant 0 : i32
    %c0_i32_0 = arith.constant 0 : i32
    %c0_i32_1 = arith.constant 0 : i32
    return %c0_i32, %c0_i32_0 : i32, i32
  }
  func.func @transform_3(%arg0: i32) -> (i32, i32, i32) {
    %c0_i32 = arith.constant 0 : i32
    %c0_i32_0 = arith.constant 0 : i32
    %c0_i32_1 = arith.constant 0 : i32
    %c0_i32_2 = arith.constant 0 : i32
    return %c0_i32, %c0_i32_0, %c0_i32_1 : i32, i32, i32
  }
  func.func @transform_4(%arg0: i32) -> (i32, i32) {
    %c0_i32 = arith.constant 0 : i32
    %c0_i32_0 = arith.constant 0 : i32
    %c0_i32_1 = arith.constant 0 : i32
    return %c0_i32, %c0_i32_0 : i32, i32
  }
  func.func @transform_5(%arg0: i32) -> (i32, i32, i32) {
    %c0_i32 = arith.constant 0 : i32
    %c0_i32_0 = arith.constant 0 : i32
    %c0_i32_1 = arith.constant 0 : i32
    %c0_i32_2 = arith.constant 0 : i32
    return %c0_i32, %c0_i32_0, %c0_i32_1 : i32, i32, i32
  }
  func.func @transform_6(%arg0: i32) -> (i32, i32) {
    %c0_i32 = arith.constant 0 : i32
    %c0_i32_0 = arith.constant 0 : i32
    %c0_i32_1 = arith.constant 0 : i32
    return %c0_i32, %c0_i32_0 : i32, i32
  }
  func.func @transform_7(%arg0: i32) -> (i32, i32) {
    %c0_i32 = arith.constant 0 : i32
    %c0_i32_0 = arith.constant 0 : i32
    %c0_i32_1 = arith.constant 0 : i32
    return %c0_i32, %c0_i32_0 : i32, i32
  }
  func.func @transform_8(%arg0: i32) -> (i32, i32) {
    %c0_i32 = arith.constant 0 : i32
    %c0_i32_0 = arith.constant 0 : i32
    %c0_i32_1 = arith.constant 0 : i32
    return %c0_i32, %c0_i32_0 : i32, i32
  }
  func.func @transform_9(%arg0: i32) -> (i32, i32, i32) {
    %c0_i32 = arith.constant 0 : i32
    %c0_i32_0 = arith.constant 0 : i32
    %c0_i32_1 = arith.constant 0 : i32
    return %arg0, %c0_i32, %c0_i32_0 : i32, i32, i32
  }
}

</mosaic_0001>

<bundles_post_ra>
// kernel: tpu_custom_call.1
= control target key start
LH: loop header
LB: loop body
LE: loop exit
PB: predicated region body
PF: predicated region fallthrough
CT: control target
= control target key end

     0   :  { %vm36_vm0 = vcmask 134144   ;;  %vm38_vm1 = vcmask 273544   ;;  %vm40_vm2 = vcmask 1043594   ;;  %vm4866_vm3 = vcmask 1047558   ;;  %s3980_s11 = smov 17   ;;  %s4856_s0 = inlined_call_operand.vmem [shape: f32[2,4,256], index: 0, kind: input, shape index: {}]   ;;  %s4857_s1 = inlined_call_operand.vmem [shape: bf16[9,8,8], index: 1, kind: input, shape index: {}]   ;;  %s4858_s2 = inlined_call_operand.vmem [shape: f32[8,1], index: 2, kind: input, shape index: {}]   ;;  %s4859_s3 = inlined_call_operand.vmem [shape: bf16[9,8,8], index: 3, kind: input, shape index: {}]   ;;  %s4860_s4 = inlined_call_operand.vmem [shape: f32[8,1], index: 4, kind: input, shape index: {}]   ;;  %s4861_s5 = inlined_call_operand.vmem [shape: bf16[9,8,8], index: 5, kind: input, shape index: {}]   ;;  %s4862_s6 = inlined_call_operand.vmem [shape: f32[8,1], index: 6, kind: input, shape index: {}]   ;;  %s4863_s7 = inlined_call_operand.vmem [shape: f32[1,256], index: 7, kind: input, shape index: {}]   ;;  %s4864_s8 = inlined_call_operand.vmem [shape: f32[1,256], index: 8, kind: input, shape index: {}]   ;;  %s4865_s9 = inlined_call_operand.hbm [shape: f32[2,8,256], index: 9, kind: output, shape index: {}]  }
   0x1   :  { %v46_v0 = vld [vmem:[%s4856_s0] sm:$0xff]  ;;  %v3979_v3 = vmov 0   ;;  %vm42_vm4 = vmor %vm4866_vm3, %vm40_vm2  ;;  %vm44_vm5 = vcmask 134146  }
   0x2   :  { %v48_v1 = vcombine.high %v46_v0, %v46_v0  ;;  %37 = vst.msk [vmem:[#allocation2] sm:$0xf] %vm36_vm0, %v3979_v3  ;;  %139 = vmatprep.mubr.bf16.mxu0 %v3979_v3  ;;  %309 = vmatprep.mubr.bf16.mxu1 %v3979_v3 }
   0x3   :  { %39 = vst.msk [vmem:[#allocation2 + $0x8] sm:$0xf] %vm38_vm1, %v3979_v3  ;;  %3937 = vset.pattern.permute.xlu1 %v3979_v3  ;;  %3938 = vset.pattern.permute.xlu0 %v3979_v3 }
   0x4   :  { %v3813_v2 = vpack.c.bf16 %v48_v1, %v46_v0  ;;  %43 = vst.msk [vmem:[#allocation2] sm:$0xcc] %vm42_vm4, %v3979_v3 }
   0x5   :  { %45 = vst.msk [vmem:[#allocation2 + $0x8] sm:$0xc] %vm44_vm5, %v3979_v3 }
   0x6   :  { %57 = vrot.lane.b32.xlu0 %v3813_v2, %s3980_s11 }
   0x7   :  { %14 = vsyncpa [#allocation4], 0  ;;  %vm64_vm6 = vcmask 1041544   ;;  %vm4867_vm7 = vcmask 1045508   ;;  %vm60_vm8 = vcmask 138240   ;;  %vm68_vm9 = vcmask 132096  }
   0x8   :  { %vm66_vm10 = vmor %vm4867_vm7, %vm64_vm6  ;;  %s3981_s12 = smov 112   ;;  %s3982_s13 = smov 111   ;;  %v4094_v11 = vld [vmem:[%s4858_s2] sm:$0xff]  ;;  %vm93_vm11 = vcmask 916480   ;;  %vm100_vm12 = vcmask 1043456   ;;  %vm96_vm13 = vcmask 64512  }
   0x9   :  { %s3983_s14 = smov 110   ;;  %s3984_s15 = smov 126   ;;  %v3635_v19 = vld [vmem:[%s4857_s1 + $0xc] sm:$0xf]  ;;  %vm206_vm14 = vcmask 908288   ;;  %vm4872_vm15 = vcmask 900096  }
   0xa   :  { %s3985_s16 = smov 127   ;;  %s3986_s17 = smov 96   ;;  %v71_v29 = vld [vmem:[%s4857_s1] sm:$0xf]  ;;  %vm4871_vm1 = vcmask 1031168   ;;  %vm265_vm2 = vcmask 1039360  }
   0xb   :  { %s3987_s18 = smov 95   ;;  %s3988_s19 = smov 94   ;;  %v3643_v37 = vld [vmem:[%s4857_s1 + $0x10] sm:$0xf]  ;;  %vm4870_vm4 = vcmask 785408   ;;  %vm4873_vm5 = vcmask 777216  }
   0xc   :  { %v3633_v48 = vld [vmem:[%s4857_s1 + $0x4] sm:$0xf]  ;;  %v3648_v49 = vld [vmem:[%s4857_s1 + $0x14] sm:$0xf]  ;;  %v3656_v59 = vld [vmem:[%s4857_s1 + $0x1c] sm:$0xf] }
   0xd   :  { %v3634_v61 = vld [vmem:[%s4857_s1 + $0x8] sm:$0xf]  ;;  %vm4868_vm6 = vcmask 769024   ;;  %vm684_vm3 = vcmask 1043592   ;;  %vm4869_vm7 = vcmask 1047556   ;;  %s3989_s2 = smov 51  }
   0xe   :  { %s3991_s23 = smov 77  }
  0x78   :  { %v58_v4 = vpop.permute.xlu0 %57 }
  0x79   :  { %v59_v5 = vrot.slane %v58_v4, 4 }
  0x7b   :  { %v61_v6 = vsel %vm60_vm8, %v59_v5, %v58_v4  ;;  %69 = vst.msk [vmem:[#allocation2 + $0x8] sm:$0x3] %vm68_vm9, %v59_v5  ;;  %v3653_v4 = vld [vmem:[%s4857_s1 + $0x18] sm:$0xf] }
  0x7c   :  { %67 = vst.msk [vmem:[#allocation2] sm:$0x33] %vm66_vm10, %v61_v6  ;;  %v3659_v6 = vld [vmem:[%s4857_s1 + $0x20] sm:$0xf] }
  0x82   :  { %v3942_v10 = vld [vmem:[#allocation2 + $0x8] ss:$0 sps:$4 sm:$0xff]  }
  0x83   :  { %v70_v7 = vld [vmem:[#allocation2] sm:$0xff] }
  0x84   :  { %v3637_v8 = vcombine.high %v70_v7, %v70_v7  ;;  %v3636_v9 = vcombine.low %v70_v7, %v70_v7 }
  0x86   :  { %89 = vrot.lane.b32.xlu1 %v3637_v8, %s3981_s12  ;;  %87 = vrot.lane.b32.xlu0 %v3636_v9, %s3981_s12  ;;  %v152_v22 = vsel %vm100_vm12, %v3636_v9, 0 }
  0x8a   :  { %91 = vrot.lane.b32.xlu1 %v3942_v10, %s3981_s12  ;;  %204 = vrot.lane.b32.xlu0 %v3942_v10, %s3982_s13 }
  0x8e   :  { %202 = vrot.lane.b32.xlu1 %v3637_v8, %s3982_s13  ;;  %200 = vrot.lane.b32.xlu0 %v3636_v9, %s3982_s13 }
  0x92   :  { %324 = vrot.lane.b32.xlu1 %v3942_v10, %s3983_s14  ;;  %383 = vrot.lane.b32.xlu0 %v3942_v10, %s3984_s15 }
  0x96   :  { %320 = vrot.lane.b32.xlu1 %v3636_v9, %s3983_s14  ;;  %322 = vrot.lane.b32.xlu0 %v3637_v8, %s3983_s14 }
  0x9a   :  { %263 = vrot.lane.b32.xlu1 %v3942_v10, %s3985_s16  ;;  %444 = vrot.lane.b32.xlu0 %v3942_v10, %s3986_s17 }
  0x9e   :  { %507 = vrot.lane.b32.xlu1 %v3942_v10, %s3987_s18  ;;  %379 = vrot.lane.b32.xlu0 %v3636_v9, %s3984_s15 }
  0xa2   :  { %381 = vrot.lane.b32.xlu1 %v3637_v8, %s3984_s15  ;;  %261 = vrot.lane.b32.xlu0 %v3637_v8, %s3985_s16 }
  0xa6   :  { %259 = vrot.lane.b32.xlu1 %v3636_v9, %s3985_s16  ;;  %440 = vrot.lane.b32.xlu0 %v3636_v9, %s3986_s17 }
  0xaa   :  { %442 = vrot.lane.b32.xlu1 %v3637_v8, %s3986_s17  ;;  %505 = vrot.lane.b32.xlu0 %v3637_v8, %s3987_s18 }
  0xae   :  { %503 = vrot.lane.b32.xlu1 %v3636_v9, %s3987_s18  ;;  %566 = vrot.lane.b32.xlu0 %v3636_v9, %s3988_s19 }
  0xb2   :  { %568 = vrot.lane.b32.xlu1 %v3637_v8, %s3988_s19  ;;  %570 = vrot.lane.b32.xlu0 %v3942_v10, %s3988_s19 }
  0xb6   :  { %660 = vperm.xlu1 %3937, %v4094_v11  }
  0xf8   :  { %v90_v12 = vpop.permute.xlu1 %89  ;;  %v88_v13 = vpop.permute.xlu0 %87 }
  0xf9   :  { %v94_v14 = vsel %vm93_vm11, %v88_v13, %v90_v12 }
  0xfa   :  { %v102_v18 = vsel %vm100_vm12, %v94_v14, 0 }
  0xfc   :  { %v92_v15 = vpop.permute.xlu1 %91  ;;  %v205_v16 = vpop.permute.xlu0 %204 }
  0xfd   :  { %v95_v17 = vsel %vm93_vm11, %v90_v12, %v92_v15 }
  0xfe   :  { %3639 = vmatprep.subr.msk.bf16.mxu0 %vm100_vm12, %v95_v17 }
  0xff   :  { %108 = vmatpush1.bf16.msra.mxu0 %v102_v18  ;;  %v628_v18 = vlaneseq }
 0x100   :  { %v203_v20 = vpop.permute.xlu1 %202  ;;  %3641 = vmatprep.subr.msk.bf16.mxu0 %vm100_vm12, %v3637_v8  ;;  %v201_v21 = vpop.permute.xlu0 %200 }
 0x101   :  { %v208_v23 = vsel %vm206_vm14, %v203_v20, %v205_v16  ;;  %v207_v28 = vsel %vm206_vm14, %v201_v21, %v203_v20 }
 0x102   :  { %3640 = vmatmul.mubr.msk.bf16.vlgmr.msra.gmra.mrb[0].mxu0 %vm96_vm13, %v3635_v19  ;;  %v213_v32 = vsel %vm100_vm12, %v207_v28, 0 }
 0x103   :  { %158 = vmatpush1.bf16.msra.mxu0 %v152_v22  ;;  %189 = vmatprep.mubr.bf16.mxu0 %v3979_v3  ;;  %v629_v22 = vshrl.u32 %v628_v18, 7 }
 0x104   :  { %v325_v24 = vpop.permute.xlu1 %324  ;;  %v384_v25 = vpop.permute.xlu0 %383  ;;  %3644 = vmatprep.subr.msk.bf16.mxu0 %vm100_vm12, %v208_v23 }
 0x105   :  { %v634_v28 = vsub.s32 1, %v629_v22 }
 0x108   :  { %v321_v26 = vpop.permute.xlu1 %320  ;;  %v323_v27 = vpop.permute.xlu0 %322 }
 0x109   :  { %v328_v33 = vsel %vm4872_vm15, %v323_v27, %v325_v24  ;;  %v327_v36 = vsel %vm4872_vm15, %v321_v26, %v323_v27  ;;  %v630_v26 = vsub.s32 0, %v629_v22  ;;  %v34_v27 = vld [vmem:[%s4863_s7] sm:$0x3] }
 0x10a   :  { %v333_v42 = vsel %vm100_vm12, %v327_v36, 0  ;;  %v35_v36 = vld [vmem:[%s4864_s8] sm:$0x3] }
 0x10b   :  { %v690_v22 = vld [vmem:[%s4859_s3] sm:$0xf] }
 0x10c   :  { %v264_v30 = vpop.permute.xlu1 %263  ;;  %v445_v31 = vpop.permute.xlu0 %444 }
 0x10e   :  { %3642 = vmatmul.mubr.msk.bf16.vlgmr.msra.gmra.mrb[0].mxu0 %vm96_vm13, %v71_v29  ;;  %v4179_v29 = vrot.slane %v34_v27, %v630_v26 }
 0x10f   :  { %219 = vmatpush1.bf16.msra.mxu0 %v213_v32  ;;  %250 = vmatprep.mubr.bf16.mxu0 %v3979_v3 }
 0x110   :  { %3649 = vmatprep.subr.msk.bf16.mxu0 %vm100_vm12, %v328_v33  ;;  %v508_v34 = vpop.permute.xlu1 %507  ;;  %v380_v35 = vpop.permute.xlu0 %379 }
 0x114   :  { %v382_v38 = vpop.permute.xlu1 %381  ;;  %v262_v39 = vpop.permute.xlu0 %261 }
 0x115   :  { %v267_v40 = vsel %vm265_vm2, %v262_v39, %v264_v30  ;;  %v387_v41 = vsel %vm4871_vm1, %v382_v38, %v384_v25  ;;  %v386_v47 = vsel %vm4871_vm1, %v380_v35, %v382_v38  ;;  %v4181_v30 = vrot.slane %v34_v27, %v634_v28 }
 0x116   :  { %3645 = vmatmul.mubr.msk.bf16.vlgmr.msra.gmra.mrb[4].mxu0 %vm96_vm13, %v3643_v37  ;;  %3646 = vmatprep.subr.msk.bf16.mxu1 %vm100_vm12, %v267_v40  ;;  %v392_v54 = vsel %vm100_vm12, %v386_v47, 0  ;;  %v4188_v40 = vrot.slane %v35_v36, %v630_v26 }
 0x117   :  { %339 = vmatpush1.bf16.msra.mxu0 %v333_v42  ;;  %370 = vmatprep.mubr.bf16.mxu0 %v3979_v3 }
 0x118   :  { %3651 = vmatprep.subr.msk.bf16.mxu0 %vm100_vm12, %v387_v41  ;;  %v260_v43 = vpop.permute.xlu1 %259  ;;  %v441_v44 = vpop.permute.xlu0 %440  ;;  %v4190_v41 = vrot.slane %v35_v36, %v634_v28 }
 0x119   :  { %v266_v45 = vsel %vm265_vm2, %v260_v43, %v262_v39 }
 0x11a   :  { %v272_v46 = vsel %vm100_vm12, %v266_v45, 0 }
 0x11b   :  { %278 = vmatpush1.bf16.msra.mxu1 %v272_v46 }
 0x11c   :  { %v443_v50 = vpop.permute.xlu1 %442  ;;  %v506_v51 = vpop.permute.xlu0 %505 }
 0x11d   :  { %v511_v52 = vsel %vm4873_vm5, %v506_v51, %v508_v34  ;;  %v448_v53 = vsel %vm4870_vm4, %v443_v50, %v445_v31  ;;  %v447_v60 = vsel %vm4870_vm4, %v441_v44, %v443_v50 }
 0x11e   :  { %3647 = vmatmul.mubr.msk.bf16.vlgmr.msra.gmra.mrb[0].mxu1 %vm96_vm13, %v3633_v48  ;;  %3650 = vmatmul.mubr.msk.bf16.vlgmr.msra.gmra.mrb[8].mxu0 %vm96_vm13, %v3648_v49  ;;  %v453_v0 = vsel %vm100_vm12, %v447_v60, 0 }
 0x11f   :  { %398 = vmatpush1.bf16.msra.mxu0 %v392_v54  ;;  %3657 = vmatprep.subr.msk.bf16.mxu1 %vm100_vm12, %v511_v52 }
 0x120   :  { %3654 = vmatprep.subr.msk.bf16.mxu0 %vm100_vm12, %v448_v53  ;;  %v504_v55 = vpop.permute.xlu1 %503  ;;  %553 = vmatprep.mubr.bf16.mxu1 %v3979_v3  ;;  %v567_v58 = vpop.permute.xlu0 %566 }
 0x121   :  { %v510_v56 = vsel %vm4873_vm5, %v504_v55, %v506_v51  ;;  %429 = vmatprep.mubr.bf16.mxu0 %v3979_v3 }
 0x122   :  { %v516_v57 = vsel %vm100_vm12, %v510_v56, 0 }
 0x123   :  { %522 = vmatpush1.bf16.msra.mxu1 %v516_v57 }
 0x124   :  { %v569_v62 = vpop.permute.xlu1 %568  ;;  %v571_v63 = vpop.permute.xlu0 %570 }
 0x125   :  { %v574_v1 = vsel %vm4868_vm6, %v569_v62, %v571_v63  ;;  %v573_v2 = vsel %vm4868_vm6, %v567_v58, %v569_v62  ;;  %vm4196_vm6 = vmor %vm4869_vm7, %vm684_vm3  ;;  %vm4877_vm3 = vcmask 769024   ;;  %vm4879_vm7 = vcmask 1045508  }
 0x126   :  { %3658 = vmatmul.mubr.msk.bf16.vlgmr.msra.gmra.mrb[4].mxu1 %vm96_vm13, %v3656_v59  ;;  %v579_v5 = vsel %vm100_vm12, %v573_v2, 0  ;;  %v1244_v2 = vld [vmem:[%s4860_s4] sm:$0xff] }
 0x127   :  { %755 = vmatprep.mubr.bf16.mxu1 %v3979_v3 }
 0x12a   :  { %3652 = vmatmul.mubr.msk.bf16.vlgmr.msra.gmra.mrb[8].mxu0 %vm96_vm13, %v3634_v61 }
 0x12b   :  { %459 = vmatpush1.bf16.msra.mxu0 %v453_v0  ;;  %490 = vmatprep.mubr.bf16.mxu0 %v3979_v3 }
 0x12c   :  { %3660 = vmatprep.subr.msk.bf16.mxu0 %vm100_vm12, %v574_v1 }
 0x132   :  { %3655 = vmatmul.mubr.msk.bf16.vlgmr.msra.gmra.mrb[0].mxu0 %vm96_vm13, %v3653_v4 }
 0x133   :  { %585 = vmatpush1.bf16.msra.mxu0 %v579_v5  ;;  %616 = vmatprep.mubr.bf16.mxu0 %v3979_v3 }
 0x135   :  { %v661_v47 = vpop.permute.xlu1 %660 }
 0x13a   :  { %3661 = vmatmul.mubr.msk.bf16.vlgmr.msra.gmra.mrb[8].mxu0 %vm96_vm13, %v3659_v6 }
 0x13b   :  { %923 = vmatprep.mubr.bf16.mxu0 %v3979_v3 }
 0x1e9   :  { %v252_v7 = vpop.f32.mrb[4].mxu0 }
 0x1ea   :  { %v254_v8 = vpop.f32.mrb[5].mxu0 }
 0x1eb   :  { %v256_v9 = vpop.f32.mrb[6].mxu0 }
 0x1ec   :  { %v257_v10 = vpop.f32.mrb[7].mxu0 }
 0x1f1   :  { %v311_v12 = vpop.f32.mrb[0].mxu1 }
 0x1f2   :  { %v312_v13 = vadd.f32 %v311_v12, %v252_v7  ;;  %v313_v14 = vpop.f32.mrb[1].mxu1  ;;  %v3665_v12 = vld [vmem:[%s4859_s3 + $0xc] sm:$0xf] }
 0x1f3   :  { %v314_v15 = vadd.f32 %v313_v14, %v254_v8  ;;  %v315_v16 = vpop.f32.mrb[2].mxu1 }
 0x1f4   :  { %v316_v17 = vpop.f32.mrb[3].mxu1 }
 0x1f9   :  { %v555_v19 = vpop.f32.mrb[4].mxu1 }
 0x1fa   :  { %v562_v20 = vadd.f32 %v555_v19, %v312_v13  ;;  %v557_v21 = vpop.f32.mrb[5].mxu1 }
 0x1fb   :  { %v563_v23 = vadd.f32 %v557_v21, %v314_v15  ;;  %v559_v24 = vpop.f32.mrb[6].mxu1 }
 0x1fc   :  { %v560_v25 = vpop.f32.mrb[7].mxu1 }
 0x205   :  { %v492_v31 = vpop.f32.mrb[0].mxu0 }
 0x206   :  { %v638_v32 = vmul.f32 %v4179_v29, %v492_v31  ;;  %v494_v33 = vpop.f32.mrb[1].mxu0 }
 0x207   :  { %v639_v34 = vmul.f32 %v4181_v30, %v494_v33  ;;  %v496_v35 = vpop.f32.mrb[2].mxu0 }
 0x208   :  { %v640_v37 = vadd.f32 %v638_v32, %v562_v20  ;;  %v497_v38 = vpop.f32.mrb[3].mxu0  ;;  %v3673_v32 = vld [vmem:[%s4859_s3 + $0x10] sm:$0xf] }
 0x209   :  { %v641_v39 = vadd.f32 %v639_v34, %v563_v23 }
 0x20d   :  { %v618_v42 = vpop.f32.mrb[8].mxu0 }
 0x20e   :  { %v653_v43 = vmul.f32 %v4188_v40, %v618_v42  ;;  %v620_v44 = vpop.f32.mrb[9].mxu0 }
 0x20f   :  { %v654_v45 = vmul.f32 %v4190_v41, %v620_v44  ;;  %v622_v46 = vpop.f32.mrb[10].mxu0 }
 0x210   :  { %v655_v48 = vadd.f32 %v653_v43, %v640_v37  ;;  %v623_v49 = vpop.f32.mrb[11].mxu0  ;;  %v3678_v46 = vld [vmem:[%s4859_s3 + $0x14] sm:$0xf] }
 0x211   :  { %v656_v50 = vadd.f32 %v654_v45, %v641_v39  ;;  %v3663_v45 = vld [vmem:[%s4859_s3 + $0x4] sm:$0xf] }
 0x212   :  { %v663_v51 = vadd.f32 %v661_v47, %v655_v48 }
 0x213   :  { %v664_v52 = vadd.f32 %v661_v47, %v656_v50 }
 0x214   :  { %v667_v53 = vmul.f32 0.01, %v663_v51  ;;  %vm665_vm9 = vcmp.ge.f32.partialorder %v663_v51, 0.0 }
 0x215   :  { %v668_v54 = vmul.f32 0.01, %v664_v52  ;;  %vm666_vm10 = vcmp.ge.f32.partialorder %v664_v52, 0.0 }
 0x216   :  { %v669_v55 = vsel %vm665_vm9, %v663_v51, %v667_v53  ;;  %vm4878_vm9 = vmmov %vm4877_vm3 }
 0x217   :  { %v670_v56 = vsel %vm666_vm10, %v664_v52, %v668_v54  ;;  %vm1840_vm10 = vcmask 552344  }
 0x218   :  { %v3814_v57 = vpack.c.bf16 %v670_v56, %v669_v55  ;;  %v3686_v56 = vld [vmem:[%s4859_s3 + $0x1c] sm:$0xf]  ;;  %1841 = vst.msk [vmem:[#allocation2 + $0x10] sm:$0xf] %vm1840_vm10, %v3979_v3 }
 0x21a   :  { %678 = vrot.lane.b32.xlu0 %v3814_v57, %s3980_s11 }
 0x28c   :  { %v679_v58 = vpop.permute.xlu0 %678 }
 0x28d   :  { %v680_v60 = vrot.slane %v679_v58, 4 }
 0x28f   :  { %v681_v61 = vsel %vm60_vm8, %v680_v60, %v679_v58  ;;  %688 = vst.msk [vmem:[#allocation2 + $0x8] sm:$0xf] %vm36_vm0, %v680_v60  ;;  %v3664_v58 = vld [vmem:[%s4859_s3 + $0x8] sm:$0xf] }
 0x290   :  { %687 = vst.msk [vmem:[#allocation2] sm:$0xff] %vm4196_vm6, %v681_v61 }
 0x296   :  { %v3945_v1 = vld [vmem:[#allocation2 + $0x8] ss:$0 sps:$4 sm:$0xff]  }
 0x297   :  { %v689_v62 = vld [vmem:[#allocation2] sm:$0xff] }
 0x298   :  { %v3667_v63 = vcombine.high %v689_v62, %v689_v62  ;;  %v3666_v0 = vcombine.low %v689_v62, %v689_v62 }
 0x29a   :  { %708 = vrot.lane.b32.xlu0 %v3667_v63, %s3981_s12  ;;  %706 = vrot.lane.b32.xlu1 %v3666_v0, %s3981_s12  ;;  %v768_v15 = vsel %vm100_vm12, %v3666_v0, 0 }
 0x29e   :  { %820 = vrot.lane.b32.xlu0 %v3945_v1, %s3982_s13  ;;  %710 = vrot.lane.b32.xlu1 %v3945_v1, %s3981_s12 }
 0x2a2   :  { %816 = vrot.lane.b32.xlu0 %v3666_v0, %s3982_s13  ;;  %818 = vrot.lane.b32.xlu1 %v3667_v63, %s3982_s13 }
 0x2a6   :  { %996 = vrot.lane.b32.xlu0 %v3945_v1, %s3984_s15  ;;  %938 = vrot.lane.b32.xlu1 %v3945_v1, %s3983_s14 }
 0x2aa   :  { %936 = vrot.lane.b32.xlu0 %v3667_v63, %s3983_s14  ;;  %934 = vrot.lane.b32.xlu1 %v3666_v0, %s3983_s14 }
 0x2ae   :  { %1056 = vrot.lane.b32.xlu0 %v3945_v1, %s3986_s17  ;;  %878 = vrot.lane.b32.xlu1 %v3945_v1, %s3985_s16 }
 0x2b2   :  { %992 = vrot.lane.b32.xlu0 %v3666_v0, %s3984_s15  ;;  %1118 = vrot.lane.b32.xlu1 %v3945_v1, %s3987_s18 }
 0x2b6   :  { %876 = vrot.lane.b32.xlu0 %v3667_v63, %s3985_s16  ;;  %994 = vrot.lane.b32.xlu1 %v3667_v63, %s3984_s15 }
 0x2ba   :  { %1052 = vrot.lane.b32.xlu0 %v3666_v0, %s3986_s17  ;;  %874 = vrot.lane.b32.xlu1 %v3666_v0, %s3985_s16 }
 0x2be   :  { %1116 = vrot.lane.b32.xlu0 %v3667_v63, %s3987_s18  ;;  %1054 = vrot.lane.b32.xlu1 %v3667_v63, %s3986_s17 }
 0x2c2   :  { %1176 = vrot.lane.b32.xlu0 %v3666_v0, %s3988_s19  ;;  %1114 = vrot.lane.b32.xlu1 %v3666_v0, %s3987_s18 }
 0x2c6   :  { %1180 = vrot.lane.b32.xlu0 %v3945_v1, %s3988_s19  ;;  %1178 = vrot.lane.b32.xlu1 %v3667_v63, %s3988_s19  ;;  %v3683_v1 = vld [vmem:[%s4859_s3 + $0x18] sm:$0xf] }
 0x2ca   :  { %1247 = vperm.xlu1 %3937, %v1244_v2  }
 0x30c   :  { %v709_v4 = vpop.permute.xlu0 %708  ;;  %v707_v5 = vpop.permute.xlu1 %706 }
 0x30d   :  { %v712_v6 = vsel %vm93_vm11, %v707_v5, %v709_v4  ;;  %v3722_v5 = vld [vmem:[%s4856_s0 + $0x8] sm:$0xff]  ;;  %s3990_s0 = smov 78  }
 0x30e   :  { %v718_v10 = vsel %vm100_vm12, %v712_v6, 0  ;;  %v1850_v6 = vcombine.high %v3722_v5, %v3722_v5 }
 0x310   :  { %v821_v7 = vpop.permute.xlu0 %820  ;;  %v711_v8 = vpop.permute.xlu1 %710 }
 0x311   :  { %v713_v9 = vsel %vm93_vm11, %v709_v4, %v711_v8  ;;  %v3689_v4 = vld [vmem:[%s4859_s3 + $0x20] sm:$0xf] }
 0x312   :  { %3669 = vmatprep.subr.msk.bf16.mxu1 %vm100_vm12, %v713_v9 }
 0x313   :  { %724 = vmatpush1.bf16.msra.mxu1 %v718_v10 }
 0x314   :  { %v817_v13 = vpop.permute.xlu0 %816  ;;  %3671 = vmatprep.subr.msk.bf16.mxu1 %vm100_vm12, %v3667_v63  ;;  %v819_v14 = vpop.permute.xlu1 %818 }
 0x315   :  { %v823_v16 = vsel %vm206_vm14, %v819_v14, %v821_v7  ;;  %v822_v21 = vsel %vm206_vm14, %v817_v13, %v819_v14  ;;  %v3816_v7 = vpack.c.bf16 %v1850_v6, %v3722_v5 }
 0x316   :  { %3670 = vmatmul.mubr.msk.bf16.vlgmr.msra.gmra.mrb[8].mxu1 %vm96_vm13, %v3665_v12  ;;  %v828_v25 = vsel %vm100_vm12, %v822_v21, 0 }
 0x317   :  { %774 = vmatpush1.bf16.msra.mxu1 %v768_v15  ;;  %805 = vmatprep.mubr.bf16.mxu1 %v3979_v3 }
 0x318   :  { %v997_v17 = vpop.permute.xlu0 %996  ;;  %v939_v18 = vpop.permute.xlu1 %938  ;;  %3674 = vmatprep.subr.msk.bf16.mxu1 %vm100_vm12, %v823_v16  ;;  %1859 = vrot.lane.b32.xlu1 %v3816_v7, %s3989_s2 }
 0x31c   :  { %v937_v19 = vpop.permute.xlu0 %936  ;;  %v935_v20 = vpop.permute.xlu1 %934 }
 0x31d   :  { %v941_v26 = vsel %vm4872_vm15, %v937_v19, %v939_v18  ;;  %v940_v31 = vsel %vm4872_vm15, %v935_v20, %v937_v19  ;;  %vm4880_vm15 = vcmask 1047558  }
 0x31e   :  { %v946_v37 = vsel %vm100_vm12, %v940_v31, 0 }
 0x320   :  { %v1057_v23 = vpop.permute.xlu0 %1056  ;;  %v879_v24 = vpop.permute.xlu1 %878 }
 0x322   :  { %3672 = vmatmul.mubr.msk.bf16.vlgmr.msra.gmra.mrb[8].mxu1 %vm96_vm13, %v690_v22 }
 0x323   :  { %834 = vmatpush1.bf16.msra.mxu1 %v828_v25  ;;  %865 = vmatprep.mubr.bf16.mxu1 %v3979_v3 }
 0x324   :  { %3679 = vmatprep.subr.msk.bf16.mxu1 %vm100_vm12, %v941_v26  ;;  %v993_v27 = vpop.permute.xlu0 %992  ;;  %v1119_v28 = vpop.permute.xlu1 %1118 }
 0x328   :  { %v877_v33 = vpop.permute.xlu0 %876  ;;  %v995_v34 = vpop.permute.xlu1 %994 }
 0x329   :  { %v881_v35 = vsel %vm265_vm2, %v877_v33, %v879_v24  ;;  %v999_v36 = vsel %vm4871_vm1, %v995_v34, %v997_v17  ;;  %v998_v44 = vsel %vm4871_vm1, %v993_v27, %v995_v34  ;;  %vm1838_vm1 = vcmask 412944  }
 0x32a   :  { %3675 = vmatmul.mubr.msk.bf16.vlgmr.msra.gmra.mrb[12].mxu1 %vm96_vm13, %v3673_v32  ;;  %3676 = vmatprep.subr.msk.bf16.mxu0 %vm100_vm12, %v881_v35  ;;  %v1004_v51 = vsel %vm100_vm12, %v998_v44, 0 }
 0x32b   :  { %952 = vmatpush1.bf16.msra.mxu1 %v946_v37  ;;  %983 = vmatprep.mubr.bf16.mxu1 %v3979_v3 }
 0x32c   :  { %3681 = vmatprep.subr.msk.bf16.mxu1 %vm100_vm12, %v999_v36  ;;  %v1053_v38 = vpop.permute.xlu0 %1052  ;;  %v875_v39 = vpop.permute.xlu1 %874 }
 0x32d   :  { %v880_v42 = vsel %vm265_vm2, %v875_v39, %v877_v33 }
 0x32e   :  { %v886_v43 = vsel %vm100_vm12, %v880_v42, 0 }
 0x32f   :  { %892 = vmatpush1.bf16.msra.mxu0 %v886_v43 }
 0x330   :  { %v1117_v47 = vpop.permute.xlu0 %1116  ;;  %v1055_v48 = vpop.permute.xlu1 %1054 }
 0x331   :  { %v1121_v49 = vsel %vm4873_vm5, %v1117_v47, %v1119_v28  ;;  %v1059_v50 = vsel %vm4870_vm4, %v1055_v48, %v1057_v23  ;;  %v1058_v57 = vsel %vm4870_vm4, %v1053_v38, %v1055_v48 }
 0x332   :  { %3677 = vmatmul.mubr.msk.bf16.vlgmr.msra.gmra.mrb[12].mxu0 %vm96_vm13, %v3663_v45  ;;  %3680 = vmatmul.mubr.msk.bf16.vlgmr.msra.gmra.mrb[16].mxu1 %vm96_vm13, %v3678_v46  ;;  %v1064_v62 = vsel %vm100_vm12, %v1058_v57, 0 }
 0x333   :  { %1010 = vmatpush1.bf16.msra.mxu1 %v1004_v51  ;;  %3687 = vmatprep.subr.msk.bf16.mxu0 %vm100_vm12, %v1121_v49 }
 0x334   :  { %3684 = vmatprep.subr.msk.bf16.mxu1 %vm100_vm12, %v1059_v50  ;;  %v1115_v52 = vpop.permute.xlu1 %1114  ;;  %1163 = vmatprep.mubr.bf16.mxu0 %v3979_v3  ;;  %v1177_v54 = vpop.permute.xlu0 %1176 }
 0x335   :  { %v1120_v53 = vsel %vm4873_vm5, %v1115_v52, %v1117_v47  ;;  %1041 = vmatprep.mubr.bf16.mxu1 %v3979_v3 }
 0x336   :  { %v1126_v55 = vsel %vm100_vm12, %v1120_v53, 0 }
 0x337   :  { %1132 = vmatpush1.bf16.msra.mxu0 %v1126_v55 }
 0x338   :  { %v1181_v60 = vpop.permute.xlu0 %1180  ;;  %v1179_v61 = vpop.permute.xlu1 %1178 }
 0x339   :  { %v1183_v63 = vsel %vm4877_vm3, %v1179_v61, %v1181_v60  ;;  %v1182_v0 = vsel %vm4878_vm9, %v1177_v54, %v1179_v61  ;;  %vm1845_vm3 = vcmask 412674   ;;  %vm1869_vm9 = vcmask 410624  }
 0x33a   :  { %3688 = vmatmul.mubr.msk.bf16.vlgmr.msra.gmra.mrb[16].mxu0 %vm96_vm13, %v3686_v56  ;;  %v1188_v2 = vsel %vm100_vm12, %v1182_v0, 0  ;;  %1846 = vst.msk [vmem:[#allocation2 + $0x10] sm:$0xc] %vm1845_vm3, %v3979_v3 }
 0x33b   :  { %1339 = vmatprep.mubr.bf16.mxu0 %v3979_v3 }
 0x33e   :  { %3682 = vmatmul.mubr.msk.bf16.vlgmr.msra.gmra.mrb[16].mxu1 %vm96_vm13, %v3664_v58 }
 0x33f   :  { %1070 = vmatpush1.bf16.msra.mxu1 %v1064_v62  ;;  %1101 = vmatprep.mubr.bf16.mxu1 %v3979_v3 }
 0x340   :  { %3690 = vmatprep.subr.msk.bf16.mxu1 %vm100_vm12, %v1183_v63 }
 0x346   :  { %3685 = vmatmul.mubr.msk.bf16.vlgmr.msra.gmra.mrb[8].mxu1 %vm96_vm13, %v3683_v1 }
 0x347   :  { %1194 = vmatpush1.bf16.msra.mxu1 %v1188_v2  ;;  %1225 = vmatprep.mubr.bf16.mxu1 %v3979_v3 }
 0x349   :  { %v1248_v25 = vpop.permute.xlu1 %1247 }
 0x34e   :  { %3691 = vmatmul.mubr.msk.bf16.vlgmr.msra.gmra.mrb[16].mxu1 %vm96_vm13, %v3689_v4 }
 0x34f   :  { %1507 = vmatprep.mubr.bf16.mxu1 %v3979_v3 }
 0x38a   :  { %v1860_v27 = vpop.permute.xlu1 %1859 }
 0x38b   :  { %v1861_v32 = vrot.slane %v1860_v27, 4 }
 0x38d   :  { %1870 = vst.msk [vmem:[#allocation2 + $0x10] sm:$0x3] %vm1869_vm9, %v1861_v32  ;;  %vm1866_vm9 = vcmask 1041816  }
 0x38e   :  { %vm1867_vm4 = vmor %vm4879_vm7, %vm1866_vm9 }
 0x394   :  { %v1872_v45 = vld [vmem:[#allocation2 + $0x10] sm:$0xf] }
 0x395   :  { %v4320_v48 = vcombine.low %v1872_v45, %v1872_v45 }
 0x397   :  { %1889 = vrot.lane.b32.xlu1 %v4320_v48, %s3990_s0 }
 0x39b   :  { %2007 = vrot.lane.b32.xlu1 %v4320_v48, %s3991_s23 }
 0x3fd   :  { %v867_v8 = vpop.f32.mrb[12].mxu1 }
 0x3fe   :  { %v869_v9 = vpop.f32.mrb[13].mxu1 }
 0x3ff   :  { %v871_v10 = vpop.f32.mrb[14].mxu1 }
 0x400   :  { %v872_v12 = vpop.f32.mrb[15].mxu1 }
 0x405   :  { %v925_v13 = vpop.f32.mrb[12].mxu0 }
 0x406   :  { %v926_v14 = vadd.f32 %v925_v13, %v867_v8  ;;  %v927_v15 = vpop.f32.mrb[13].mxu0 }
 0x407   :  { %v928_v16 = vadd.f32 %v927_v15, %v869_v9  ;;  %v929_v17 = vpop.f32.mrb[14].mxu0 }
 0x408   :  { %v930_v18 = vpop.f32.mrb[15].mxu0 }
 0x409   :  { %v4413_v6 = vpop.permute.xlu1 %1889 }
 0x40d   :  { %v1165_v19 = vpop.f32.mrb[16].mxu0  ;;  %v4415_v7 = vpop.permute.xlu1 %2007 }
 0x40e   :  { %v1172_v20 = vadd.f32 %v1165_v19, %v926_v14  ;;  %v1167_v21 = vpop.f32.mrb[17].mxu0 }
 0x40f   :  { %v1173_v22 = vadd.f32 %v1167_v21, %v928_v16  ;;  %v1169_v23 = vpop.f32.mrb[18].mxu0 }
 0x410   :  { %v1170_v24 = vpop.f32.mrb[19].mxu0 }
 0x419   :  { %v1103_v26 = vpop.f32.mrb[8].mxu1 }
 0x41a   :  { %v1236_v28 = vmul.f32 %v1103_v26, %v4179_v29  ;;  %v1105_v31 = vpop.f32.mrb[9].mxu1 }
 0x41b   :  { %v1237_v33 = vmul.f32 %v1105_v31, %v4181_v30  ;;  %v1107_v34 = vpop.f32.mrb[10].mxu1 }
 0x41c   :  { %v1238_v35 = vadd.f32 %v1236_v28, %v1172_v20  ;;  %v1108_v36 = vpop.f32.mrb[11].mxu1 }
 0x41d   :  { %v1239_v37 = vadd.f32 %v1237_v33, %v1173_v22  ;;  %v3695_v22 = vld [vmem:[%s4861_s5 + $0xc] sm:$0xf]  ;;  %v3693_v33 = vld [vmem:[%s4861_s5 + $0x4] sm:$0xf] }
 0x421   :  { %v1227_v38 = vpop.f32.mrb[16].mxu1 }
 0x422   :  { %v1240_v39 = vmul.f32 %v1227_v38, %v4188_v40  ;;  %v1229_v42 = vpop.f32.mrb[17].mxu1 }
 0x423   :  { %v1241_v43 = vmul.f32 %v1229_v42, %v4190_v41  ;;  %v1231_v44 = vpop.f32.mrb[18].mxu1 }
 0x424   :  { %v1242_v46 = vadd.f32 %v1240_v39, %v1238_v35  ;;  %v1232_v47 = vpop.f32.mrb[19].mxu1  ;;  %v3716_v44 = vld [vmem:[%s4861_s5 + $0x1c] sm:$0xf] }
 0x425   :  { %v1243_v49 = vadd.f32 %v1241_v43, %v1239_v37  ;;  %v1274_v43 = vld [vmem:[%s4861_s5] sm:$0xf] }
 0x426   :  { %v1250_v50 = vadd.f32 %v1248_v25, %v1242_v46 }
 0x427   :  { %v1251_v51 = vadd.f32 %v1248_v25, %v1243_v49 }
 0x428   :  { %v1254_v52 = vmul.f32 0.01, %v1250_v50  ;;  %vm1252_vm10 = vcmp.ge.f32.partialorder %v1250_v50, 0.0 }
 0x429   :  { %v1255_v53 = vmul.f32 0.01, %v1251_v51  ;;  %vm1253_vm3 = vcmp.ge.f32.partialorder %v1251_v51, 0.0 }
 0x42a   :  { %v1256_v54 = vsel %vm1252_vm10, %v1250_v50, %v1254_v52  ;;  %vm1842_vm10 = vcmask 1043866   ;;  %v3703_v52 = vld [vmem:[%s4861_s5 + $0x10] sm:$0xf] }
 0x42b   :  { %v1257_v55 = vsel %vm1253_vm3, %v1251_v51, %v1255_v53  ;;  %vm1862_vm3 = vcmask 416768   ;;  %vm1843_vm5 = vmor %vm4880_vm15, %vm1842_vm10  ;;  %vm4885_vm15 = vcmask 1031168  }
 0x42c   :  { %v3815_v56 = vpack.c.bf16 %v1257_v55, %v1256_v54  ;;  %v1863_v62 = vsel %vm1862_vm3, %v1861_v32, %v1860_v27 }
 0x42e   :  { %1265 = vrot.lane.b32.xlu0 %v3815_v56, %s3980_s11  ;;  %s3992_s11 = smov 76  }
 0x432   :  { %1948 = vrot.lane.b32.xlu0 %v4320_v48, %s3988_s19 }
 0x4a0   :  { %v1266_v57 = vpop.permute.xlu0 %1265 }
 0x4a1   :  { %v1267_v58 = vrot.slane %v1266_v57, 4 }
 0x4a3   :  { %v1268_v60 = vsel %vm60_vm8, %v1267_v58, %v1266_v57  ;;  %1272 = vst.msk [vmem:[#allocation2 + $0x8] sm:$0xf] %vm36_vm0, %v1267_v58  ;;  %vm4881_vm0 = vcmask 777216   ;;  %vm4883_vm8 = vcmask 900096  }
 0x4a4   :  { %1271 = vst.msk [vmem:[#allocation2] sm:$0xff] %vm4196_vm6, %v1268_v60  ;;  %v4417_v8 = vpop.permute.xlu0 %1948  ;;  %vm4882_vm7 = vmmov %vm4881_vm0  ;;  %vm2009_vm6 = vcmask 629760  }
 0x4aa   :  { %v1275_v61 = vld [vmem:[#allocation2 + $0x8] sm:$0xf] }
 0x4ab   :  { %1839 = vst.msk [vmem:[#allocation2 + $0x8] sm:$0xf] %vm1838_vm1, %v3979_v3  ;;  %v3698_v63 = vcombine.low %v1275_v61, %v1275_v61  ;;  %v1273_v59 = vld [vmem:[#allocation2] sm:$0xff]  ;;  %v3726_v61 = vld [vmem:[%s4857_s1 + $0xc] sm:$0xf]  ;;  %vm4886_vm1 = vcmask 769024  }
 0x4ac   :  { %1844 = vst.msk [vmem:[#allocation2 + $0x8] sm:$0xcc] %vm1843_vm5, %v3979_v3  ;;  %v4342_v0 = vcombine.high %v1273_v59, %v1273_v59  ;;  %v4347_v1 = vcombine.low %v1273_v59, %v1273_v59  ;;  %vm4889_vm5 = vmmov %vm4886_vm1 }
 0x4ad   :  { %1868 = vst.msk [vmem:[#allocation2 + $0x8] sm:$0x33] %vm1867_vm4, %v1863_v62  ;;  %1462 = vrot.lane.b32.xlu1 %v3698_v63, %s3985_s16  ;;  %1294 = vrot.lane.b32.xlu0 %v3698_v63, %s3981_s12  ;;  %vm4888_vm4 = vcmask 785408   ;;  %vm4891_vm10 = vmmov %vm4886_vm1 }
 0x4ae   :  { %v1352_v28 = vsel %vm100_vm12, %v4347_v1, 0  ;;  %vm4890_vm9 = vmmov %vm4888_vm4 }
 0x4b1   :  { %1522 = vrot.lane.b32.xlu1 %v3698_v63, %s3983_s14  ;;  %1702 = vrot.lane.b32.xlu0 %v3698_v63, %s3987_s18 }
 0x4b4   :  { %v1871_v2 = vld [vmem:[#allocation2 + $0x8] sm:$0xff] }
 0x4b5   :  { %1404 = vrot.lane.b32.xlu0 %v3698_v63, %s3982_s13  ;;  %1292 = vrot.lane.b32.xlu1 %v4342_v0, %s3981_s12  ;;  %v3727_v4 = vcombine.low %v1871_v2, %v1871_v2  ;;  %v3728_v5 = vcombine.high %v1871_v2, %v1871_v2 }
 0x4b9   :  { %1580 = vrot.lane.b32.xlu0 %v3698_v63, %s3984_s15  ;;  %1458 = vrot.lane.b32.xlu1 %v4347_v1, %s3985_s16 }
 0x4bd   :  { %1700 = vrot.lane.b32.xlu1 %v4342_v0, %s3987_s18  ;;  %1290 = vrot.lane.b32.xlu0 %v4347_v1, %s3981_s12  ;;  %s3993_s12 = smov 93  }
 0x4c1   :  { %1402 = vrot.lane.b32.xlu1 %v4342_v0, %s3982_s13  ;;  %1460 = vrot.lane.b32.xlu0 %v4342_v0, %s3985_s16  ;;  %s3997_s16 = smov 60  }
 0x4c5   :  { %1518 = vrot.lane.b32.xlu1 %v4347_v1, %s3983_s14  ;;  %1698 = vrot.lane.b32.xlu0 %v4347_v1, %s3987_s18 }
 0x4c9   :  { %1578 = vrot.lane.b32.xlu1 %v4342_v0, %s3984_s15  ;;  %1400 = vrot.lane.b32.xlu0 %v4347_v1, %s3982_s13  ;;  %s3994_s13 = smov 92  }
 0x4cd   :  { %1885 = vrot.lane.b32.xlu1 %v3727_v4, %s3990_s0  ;;  %1520 = vrot.lane.b32.xlu0 %v4342_v0, %s3983_s14  ;;  %s3995_s14 = smov 61  }
 0x4d1   :  { %2126 = vrot.lane.b32.xlu1 %v4320_v48, %s3992_s11  ;;  %1576 = vrot.lane.b32.xlu0 %v4347_v1, %s3984_s15  ;;  %s3996_s15 = smov 62  }
 0x4d5   :  { %1638 = vrot.lane.b32.xlu1 %v4342_v0, %s3986_s17  ;;  %1887 = vrot.lane.b32.xlu0 %v3728_v5, %s3990_s0 }
 0x4d9   :  { %1946 = vrot.lane.b32.xlu1 %v3728_v5, %s3988_s19  ;;  %1636 = vrot.lane.b32.xlu0 %v4347_v1, %s3986_s17 }
 0x4dd   :  { %1760 = vrot.lane.b32.xlu1 %v4347_v1, %s3988_s19  ;;  %1640 = vrot.lane.b32.xlu0 %v3698_v63, %s3986_s17  ;;  %v3708_v1 = vld [vmem:[%s4861_s5 + $0x14] sm:$0xf] }
 0x4e1   :  { %2003 = vrot.lane.b32.xlu1 %v3727_v4, %s3991_s23  ;;  %1944 = vrot.lane.b32.xlu0 %v3727_v4, %s3988_s19 }
 0x4e5   :  { %1764 = vrot.lane.b32.xlu1 %v3698_v63, %s3988_s19  ;;  %1762 = vrot.lane.b32.xlu0 %v4342_v0, %s3988_s19 }
 0x4e9   :  { %2122 = vrot.lane.b32.xlu1 %v3727_v4, %s3992_s11  ;;  %2005 = vrot.lane.b32.xlu0 %v3728_v5, %s3991_s23 }
 0x4ed   :  { %2066 = vrot.lane.b32.xlu1 %v4320_v48, %s3993_s12  ;;  %2185 = vrot.lane.b32.xlu0 %v4320_v48, %s3994_s13 }
 0x4f1   :  { %2307 = vrot.lane.b32.xlu1 %v4320_v48, %s3995_s14  ;;  %2124 = vrot.lane.b32.xlu0 %v3728_v5, %s3992_s11 }
 0x4f5   :  { %2183 = vrot.lane.b32.xlu1 %v3728_v5, %s3994_s13  ;;  %2245 = vrot.lane.b32.xlu0 %v4320_v48, %s3996_s15 }
 0x4f9   :  { %2062 = vrot.lane.b32.xlu1 %v3727_v4, %s3993_s12  ;;  %2181 = vrot.lane.b32.xlu0 %v3727_v4, %s3994_s13 }
 0x4fd   :  { %2243 = vrot.lane.b32.xlu1 %v3728_v5, %s3996_s15  ;;  %2064 = vrot.lane.b32.xlu0 %v3728_v5, %s3993_s12 }
 0x501   :  { %2303 = vrot.lane.b32.xlu1 %v3727_v4, %s3995_s14  ;;  %2241 = vrot.lane.b32.xlu0 %v3727_v4, %s3996_s15 }
 0x505   :  { %2367 = vrot.lane.b32.xlu1 %v3728_v5, %s3997_s16  ;;  %2305 = vrot.lane.b32.xlu0 %v3728_v5, %s3995_s14 }
 0x509   :  { %2437 = vperm.xlu1 %3937, %v4094_v11   ;;  %2365 = vrot.lane.b32.xlu0 %v3727_v4, %s3997_s16 }
 0x50d   :  { %2369 = vrot.lane.b32.xlu0 %v4320_v48, %s3997_s16 }
 0x51f   :  { %v1463_v9 = vpop.permute.xlu1 %1462  ;;  %v1295_v10 = vpop.permute.xlu0 %1294 }
 0x523   :  { %v1523_v12 = vpop.permute.xlu1 %1522  ;;  %v1703_v13 = vpop.permute.xlu0 %1702 }
 0x527   :  { %v1293_v14 = vpop.permute.xlu1 %1292  ;;  %v1405_v15 = vpop.permute.xlu0 %1404 }
 0x528   :  { %v1297_v16 = vsel %vm93_vm11, %v1293_v14, %v1295_v10 }
 0x529   :  { %3699 = vmatprep.subr.msk.bf16.mxu0 %vm100_vm12, %v1297_v16 }
 0x52b   :  { %v1459_v11 = vpop.permute.xlu1 %1458  ;;  %v1581_v17 = vpop.permute.xlu0 %1580 }
 0x52f   :  { %v1701_v18 = vpop.permute.xlu1 %1700  ;;  %v1291_v19 = vpop.permute.xlu0 %1290 }
 0x530   :  { %v1296_v20 = vsel %vm93_vm11, %v1291_v19, %v1293_v14  ;;  %v1705_v32 = vsel %vm4881_vm0, %v1701_v18, %v1703_v13  ;;  %vm1891_vm11 = vcmask 637952   ;;  %v1873_v13 = vld [vmem:[%s4857_s1] sm:$0xf]  ;;  %vm2128_vm0 = vcmask 621568  }
 0x531   :  { %v1302_v21 = vsel %vm100_vm12, %v1296_v20, 0 }
 0x532   :  { %1308 = vmatpush1.bf16.msra.mxu0 %v1302_v21 }
 0x533   :  { %v1403_v23 = vpop.permute.xlu1 %1402  ;;  %3701 = vmatprep.subr.msk.bf16.mxu0 %vm100_vm12, %v4342_v0  ;;  %v1461_v24 = vpop.permute.xlu0 %1460 }
 0x534   :  { %v1464_v25 = vsel %vm265_vm2, %v1459_v11, %v1461_v24  ;;  %v1465_v26 = vsel %vm265_vm2, %v1461_v24, %v1463_v9  ;;  %v1407_v31 = vsel %vm206_vm14, %v1403_v23, %v1405_v15  ;;  %vm4887_vm2 = vmmov %vm4885_vm15  ;;  %v3694_v11 = vld [vmem:[%s4861_s5 + $0x8] sm:$0xf]  ;;  %v3734_v24 = vld [vmem:[%s4857_s1 + $0x10] sm:$0xf] }
 0x535   :  { %v1470_v27 = vsel %vm100_vm12, %v1464_v25, 0  ;;  %3700 = vmatmul.mubr.msk.bf16.vlgmr.msra.gmra.mrb[20].mxu0 %vm96_vm13, %v3695_v22  ;;  %3706 = vmatprep.subr.msk.bf16.mxu1 %vm100_vm12, %v1465_v26 }
 0x536   :  { %1358 = vmatpush1.bf16.msra.mxu0 %v1352_v28  ;;  %1476 = vmatpush1.bf16.msra.mxu1 %v1470_v27  ;;  %v3713_v27 = vld [vmem:[%s4861_s5 + $0x18] sm:$0xf] }
 0x537   :  { %v1519_v34 = vpop.permute.xlu1 %1518  ;;  %3704 = vmatprep.subr.msk.bf16.mxu0 %vm100_vm12, %v1407_v31  ;;  %3717 = vmatprep.subr.msk.bf16.mxu1 %vm100_vm12, %v1705_v32  ;;  %v1699_v35 = vpop.permute.xlu0 %1698 }
 0x538   :  { %v1704_v36 = vsel %vm4882_vm7, %v1699_v35, %v1701_v18  ;;  %1389 = vmatprep.mubr.bf16.mxu0 %v3979_v3  ;;  %vm4892_vm7 = vmmov %vm4886_vm1 }
 0x539   :  { %v1710_v37 = vsel %vm100_vm12, %v1704_v36, 0  ;;  %3707 = vmatmul.mubr.msk.bf16.vlgmr.msra.gmra.mrb[20].mxu1 %vm96_vm13, %v3693_v33  ;;  %v3739_v36 = vld [vmem:[%s4857_s1 + $0x14] sm:$0xf] }
 0x53a   :  { %1716 = vmatpush1.bf16.msra.mxu1 %v1710_v37  ;;  %1747 = vmatprep.mubr.bf16.mxu1 %v3979_v3 }
 0x53b   :  { %v1579_v38 = vpop.permute.xlu1 %1578  ;;  %v1401_v39 = vpop.permute.xlu0 %1400 }
 0x53c   :  { %v1406_v42 = vsel %vm206_vm14, %v1401_v39, %v1403_v23  ;;  %vm4884_vm14 = vmmov %vm4883_vm8  ;;  %v1583_v60 = vsel %vm4885_vm15, %v1579_v38, %v1581_v17  ;;  %vm2068_vm15 = vcmask 760832  }
 0x53d   :  { %v1412_v48 = vsel %vm100_vm12, %v1406_v42, 0  ;;  %v3719_v42 = vld [vmem:[%s4861_s5 + $0x20] sm:$0xf] }
 0x53f   :  { %v1886_v45 = vpop.permute.xlu1 %1885  ;;  %v1521_v46 = vpop.permute.xlu0 %1520 }
 0x540   :  { %v1525_v47 = vsel %vm4883_vm8, %v1521_v46, %v1523_v12  ;;  %v1524_v51 = vsel %vm4884_vm14, %v1519_v34, %v1521_v46  ;;  %vm2187_vm8 = vcmask 752640   ;;  %vm2247_vm14 = vcmask 506880  }
 0x541   :  { %3702 = vmatmul.mubr.msk.bf16.vlgmr.msra.gmra.mrb[20].mxu0 %vm96_vm13, %v1274_v43  ;;  %3718 = vmatmul.mubr.msk.bf16.vlgmr.msra.gmra.mrb[24].mxu1 %vm96_vm13, %v3716_v44  ;;  %v1530_v57 = vsel %vm100_vm12, %v1524_v51, 0 }
 0x542   :  { %1418 = vmatpush1.bf16.msra.mxu0 %v1412_v48  ;;  %1449 = vmatprep.mubr.bf16.mxu0 %v3979_v3 }
 0x543   :  { %3709 = vmatprep.subr.msk.bf16.mxu0 %vm100_vm12, %v1525_v47  ;;  %v4460_v49 = vpop.permute.xlu1 %2126  ;;  %v1577_v50 = vpop.permute.xlu0 %1576  ;;  %1935 = vmatprep.mubr.bf16.mxu1 %v3979_v3 }
 0x544   :  { %v1582_v0 = vsel %vm4887_vm2, %v1577_v50, %v1579_v38  ;;  %vm4874_vm2 = vcmask 490496  }
 0x547   :  { %v1639_v53 = vpop.permute.xlu1 %1638  ;;  %v1888_v54 = vpop.permute.xlu0 %1887 }
 0x548   :  { %v1892_v55 = vsel %vm1891_vm11, %v1886_v45, %v1888_v54  ;;  %v1893_v56 = vsel %vm1891_vm11, %v1888_v54, %v4413_v6  ;;  %v1588_v6 = vsel %vm100_vm12, %v1582_v0, 0  ;;  %v3725_v54 = vld [vmem:[%s4857_s1 + $0x8] sm:$0xf]  ;;  %v3747_v0 = vld [vmem:[%s4857_s1 + $0x1c] sm:$0xf] }
 0x549   :  { %v1898_v58 = vsel %vm100_vm12, %v1892_v55, 0  ;;  %3705 = vmatmul.mubr.msk.bf16.vlgmr.msra.gmra.mrb[24].mxu0 %vm96_vm13, %v3703_v52  ;;  %3730 = vmatprep.subr.msk.bf16.mxu1 %vm100_vm12, %v1893_v56 }
 0x54a   :  { %1536 = vmatpush1.bf16.msra.mxu0 %v1530_v57  ;;  %1904 = vmatpush1.bf16.msra.mxu1 %v1898_v58 }
 0x54b   :  { %3711 = vmatprep.subr.msk.bf16.mxu0 %vm100_vm12, %v1583_v60  ;;  %v1947_v62 = vpop.permute.xlu1 %1946  ;;  %v1637_v63 = vpop.permute.xlu0 %1636  ;;  %1567 = vmatprep.mubr.bf16.mxu0 %v3979_v3 }
 0x54c   :  { %v1951_v59 = vsel %vm4886_vm1, %v1947_v62, %v4417_v8  ;;  %v1642_v16 = vsel %vm4890_vm9, %v1637_v63, %v1639_v53  ;;  %vm2309_vm1 = vcmask 498688   ;;  %vm2461_vm9 = vcmask 1043864  }
 0x54d   :  { %3731 = vmatmul.mubr.msk.bf16.vlgmr.msra.gmra.mrb[28].mxu1 %vm96_vm13, %v3726_v61  ;;  %3732 = vmatprep.subr.msk.bf16.mxu1 %vm100_vm12, %v1951_v59  ;;  %v1648_v21 = vsel %vm100_vm12, %v1642_v16, 0  ;;  %v3744_v59 = vld [vmem:[%s4857_s1 + $0x18] sm:$0xf] }
 0x54e   :  { %1993 = vmatprep.mubr.bf16.mxu1 %v3979_v3 }
 0x54f   :  { %v1761_v2 = vpop.permute.xlu1 %1760  ;;  %v1641_v4 = vpop.permute.xlu0 %1640 }
 0x550   :  { %v1643_v5 = vsel %vm4888_vm4, %v1639_v53, %v1641_v4  ;;  %v3724_v53 = vld [vmem:[%s4857_s1 + $0x4] sm:$0xf] }
 0x551   :  { %3710 = vmatmul.mubr.msk.bf16.vlgmr.msra.gmra.mrb[28].mxu0 %vm96_vm13, %v3708_v1 }
 0x552   :  { %1594 = vmatpush1.bf16.msra.mxu0 %v1588_v6  ;;  %1625 = vmatprep.mubr.bf16.mxu0 %v3979_v3 }
 0x553   :  { %3714 = vmatprep.subr.msk.bf16.mxu0 %vm100_vm12, %v1643_v5  ;;  %v2004_v8 = vpop.permute.xlu1 %2003  ;;  %v1945_v9 = vpop.permute.xlu0 %1944 }
 0x554   :  { %v1950_v10 = vsel %vm4889_vm5, %v1945_v9, %v1947_v62  ;;  %v3750_v9 = vld [vmem:[%s4857_s1 + $0x20] sm:$0xf] }
 0x555   :  { %v1956_v12 = vsel %vm100_vm12, %v1950_v10, 0 }
 0x556   :  { %1962 = vmatpush1.bf16.msra.mxu1 %v1956_v12 }
 0x557   :  { %v1765_v14 = vpop.permute.xlu1 %1764  ;;  %v1763_v15 = vpop.permute.xlu0 %1762 }
 0x558   :  { %v1767_v23 = vsel %vm4891_vm10, %v1763_v15, %v1765_v14  ;;  %v1766_v26 = vsel %vm4892_vm7, %v1761_v2, %v1763_v15  ;;  %vm2464_vm10 = vcmask 412672   ;;  %vm4893_vm7 = vcmask 1047556  }
 0x559   :  { %3733 = vmatmul.mubr.msk.bf16.vlgmr.msra.gmra.mrb[28].mxu1 %vm96_vm13, %v1873_v13  ;;  %v1772_v34 = vsel %vm100_vm12, %v1766_v26, 0 }
 0x55a   :  { %2053 = vmatprep.mubr.bf16.mxu1 %v3979_v3 }
 0x55b   :  { %v2123_v17 = vpop.permute.xlu1 %2122  ;;  %v2006_v18 = vpop.permute.xlu0 %2005 }
 0x55c   :  { %v2010_v19 = vsel %vm2009_vm6, %v2004_v8, %v2006_v18  ;;  %v2011_v20 = vsel %vm2009_vm6, %v2006_v18, %v4415_v7 }
 0x55d   :  { %v2016_v22 = vsel %vm100_vm12, %v2010_v19, 0  ;;  %3712 = vmatmul.mubr.msk.bf16.vlgmr.msra.gmra.mrb[28].mxu0 %vm96_vm13, %v3694_v11  ;;  %3735 = vmatprep.subr.msk.bf16.mxu1 %vm100_vm12, %v2011_v20 }
 0x55e   :  { %1654 = vmatpush1.bf16.msra.mxu0 %v1648_v21  ;;  %2022 = vmatpush1.bf16.msra.mxu1 %v2016_v22 }
 0x55f   :  { %3720 = vmatprep.subr.msk.bf16.mxu0 %vm100_vm12, %v1767_v23  ;;  %v2067_v25 = vpop.permute.xlu1 %2066  ;;  %v2186_v7 = vpop.permute.xlu0 %2185  ;;  %1685 = vmatprep.mubr.bf16.mxu0 %v3979_v3 }
 0x561   :  { %3736 = vmatmul.mubr.msk.bf16.vlgmr.msra.gmra.mrb[32].mxu1 %vm96_vm13, %v3734_v24 }
 0x562   :  { %2172 = vmatprep.mubr.bf16.mxu1 %v3979_v3 }
 0x563   :  { %v2308_v28 = vpop.permute.xlu1 %2307  ;;  %v2125_v31 = vpop.permute.xlu0 %2124 }
 0x564   :  { %v2129_v32 = vsel %vm2128_vm0, %v2123_v17, %v2125_v31  ;;  %v2130_v33 = vsel %vm2128_vm0, %v2125_v31, %v4460_v49 }
 0x565   :  { %v2135_v35 = vsel %vm100_vm12, %v2129_v32, 0  ;;  %3715 = vmatmul.mubr.msk.bf16.vlgmr.msra.gmra.mrb[20].mxu0 %vm96_vm13, %v3713_v27  ;;  %3740 = vmatprep.subr.msk.bf16.mxu1 %vm100_vm12, %v2130_v33 }
 0x566   :  { %1778 = vmatpush1.bf16.msra.mxu0 %v1772_v34  ;;  %2141 = vmatpush1.bf16.msra.mxu1 %v2135_v35 }
 0x567   :  { %v2184_v37 = vpop.permute.xlu1 %2183  ;;  %v2246_v38 = vpop.permute.xlu0 %2245  ;;  %1809 = vmatprep.mubr.bf16.mxu0 %v3979_v3 }
 0x568   :  { %v2189_v39 = vsel %vm2187_vm8, %v2184_v37, %v2186_v7 }
 0x569   :  { %3741 = vmatmul.mubr.msk.bf16.vlgmr.msra.gmra.mrb[36].mxu1 %vm96_vm13, %v3739_v36  ;;  %3742 = vmatprep.subr.msk.bf16.mxu1 %vm100_vm12, %v2189_v39 }
 0x56a   :  { %2231 = vmatprep.mubr.bf16.mxu1 %v3979_v3 }
 0x56b   :  { %v2063_v43 = vpop.permute.xlu1 %2062  ;;  %v2182_v44 = vpop.permute.xlu0 %2181 }
 0x56c   :  { %v2188_v45 = vsel %vm2187_vm8, %v2182_v44, %v2184_v37 }
 0x56d   :  { %v2194_v46 = vsel %vm100_vm12, %v2188_v45, 0  ;;  %3721 = vmatmul.mubr.msk.bf16.vlgmr.msra.gmra.mrb[28].mxu0 %vm96_vm13, %v3719_v42 }
 0x56e   :  { %2200 = vmatpush1.bf16.msra.mxu1 %v2194_v46  ;;  %2112 = vmatprep.mubr.bf16.mxu0 %v3979_v3 }
 0x56f   :  { %v2244_v47 = vpop.permute.xlu1 %2243  ;;  %v2065_v48 = vpop.permute.xlu0 %2064 }
 0x570   :  { %v2249_v49 = vsel %vm2247_vm14, %v2244_v47, %v2246_v38  ;;  %v2069_v50 = vsel %vm2068_vm15, %v2063_v43, %v2065_v48  ;;  %v2070_v51 = vsel %vm2068_vm15, %v2065_v48, %v2067_v25 }
 0x571   :  { %v2075_v52 = vsel %vm100_vm12, %v2069_v50, 0  ;;  %3737 = vmatprep.subr.msk.bf16.mxu0 %vm100_vm12, %v2070_v51  ;;  %3745 = vmatprep.subr.msk.bf16.mxu1 %vm100_vm12, %v2249_v49 }
 0x572   :  { %2081 = vmatpush1.bf16.msra.mxu0 %v2075_v52 }
 0x573   :  { %v2242_v55 = vpop.permute.xlu0 %2241  ;;  %v2304_v58 = vpop.permute.xlu1 %2303 }
 0x574   :  { %v2248_v56 = vsel %vm2247_vm14, %v2242_v55, %v2244_v47 }
 0x575   :  { %v2254_v57 = vsel %vm100_vm12, %v2248_v56, 0  ;;  %3738 = vmatmul.mubr.msk.bf16.vlgmr.msra.gmra.mrb[32].mxu0 %vm96_vm13, %v3724_v53  ;;  %3743 = vmatmul.mubr.msk.bf16.vlgmr.msra.gmra.mrb[36].mxu1 %vm96_vm13, %v3725_v54 }
 0x576   :  { %2260 = vmatpush1.bf16.msra.mxu1 %v2254_v57  ;;  %2291 = vmatprep.mubr.bf16.mxu1 %v3979_v3 }
 0x577   :  { %v2306_v60 = vpop.permute.xlu0 %2305  ;;  %2353 = vmatprep.mubr.bf16.mxu0 %v3979_v3  ;;  %v2368_v2 = vpop.permute.xlu1 %2367 }
 0x578   :  { %v2310_v61 = vsel %vm2309_vm1, %v2304_v58, %v2306_v60  ;;  %v2311_v62 = vsel %vm2309_vm1, %v2306_v60, %v2308_v28 }
 0x579   :  { %v2316_v63 = vsel %vm100_vm12, %v2310_v61, 0  ;;  %3748 = vmatprep.subr.msk.bf16.mxu0 %vm100_vm12, %v2311_v62 }
 0x57a   :  { %2322 = vmatpush1.bf16.msra.mxu0 %v2316_v63 }
 0x57b   :  { %v2366_v1 = vpop.permute.xlu0 %2365 }
 0x57c   :  { %v2372_v4 = vsel %vm4874_vm2, %v2366_v1, %v2368_v2 }
 0x57d   :  { %3746 = vmatmul.mubr.msk.bf16.vlgmr.msra.gmra.mrb[28].mxu1 %vm96_vm13, %v3744_v59  ;;  %3749 = vmatmul.mubr.msk.bf16.vlgmr.msra.gmra.mrb[36].mxu0 %vm96_vm13, %v3747_v0  ;;  %v2378_v8 = vsel %vm100_vm12, %v2372_v4, 0 }
 0x57e   :  { %2415 = vmatprep.mubr.bf16.mxu1 %v3979_v3  ;;  %2529 = vmatprep.mubr.bf16.mxu0 %v3979_v3 }
 0x57f   :  { %v2370_v5 = vpop.permute.xlu0 %2369 }
 0x580   :  { %v2373_v6 = vsel %vm4874_vm2, %v2368_v2, %v2370_v5  ;;  %vm4601_vm2 = vmor %vm4893_vm7, %vm2461_vm9  ;;  %vm4898_vm9 = vcmask 490496  }
 0x581   :  { %3751 = vmatprep.subr.msk.bf16.mxu1 %vm100_vm12, %v2373_v6  ;;  %vm4899_vm7 = vmmov %vm4898_vm9 }
 0x582   :  { %2384 = vmatpush1.bf16.msra.mxu1 %v2378_v8 }
 0x585   :  { %3752 = vmatmul.mubr.msk.bf16.vlgmr.msra.gmra.mrb[36].mxu1 %vm96_vm13, %v3750_v9 }
 0x586   :  { %2704 = vmatprep.mubr.bf16.mxu1 %v3979_v3 }
 0x60c   :  { %v1509_v10 = vpop.f32.mrb[20].mxu1 }
 0x60d   :  { %v1511_v12 = vpop.f32.mrb[21].mxu1 }
 0x60e   :  { %v1513_v13 = vpop.f32.mrb[22].mxu1 }
 0x60f   :  { %v1514_v14 = vpop.f32.mrb[23].mxu1 }
 0x614   :  { %v1749_v15 = vpop.f32.mrb[24].mxu1 }
 0x615   :  { %v1751_v16 = vpop.f32.mrb[25].mxu1 }
 0x616   :  { %v1753_v11 = vpop.f32.mrb[26].mxu1 }
 0x617   :  { %v1754_v17 = vpop.f32.mrb[27].mxu1 }
 0x61c   :  { %v1451_v18 = vpop.f32.mrb[24].mxu0 }
 0x61d   :  { %v1510_v19 = vadd.f32 %v1509_v10, %v1451_v18  ;;  %v1453_v20 = vpop.f32.mrb[25].mxu0 }
 0x61e   :  { %v1512_v21 = vadd.f32 %v1511_v12, %v1453_v20  ;;  %v1455_v22 = vpop.f32.mrb[26].mxu0 }
 0x61f   :  { %v1756_v23 = vadd.f32 %v1749_v15, %v1510_v19  ;;  %v1456_v24 = vpop.f32.mrb[27].mxu0  ;;  %v2438_v15 = vpop.permute.xlu1 %2437 }
 0x620   :  { %v1757_v25 = vadd.f32 %v1751_v16, %v1512_v21  ;;  %v1828_v24 = vld [vmem:[%s4862_s6] sm:$0xff] }
 0x634   :  { %v2055_v7 = vpop.f32.mrb[32].mxu1 }
 0x635   :  { %v2057_v26 = vpop.f32.mrb[33].mxu1 }
 0x636   :  { %v2059_v27 = vpop.f32.mrb[34].mxu1 }
 0x637   :  { %v2060_v28 = vpop.f32.mrb[35].mxu1 }
 0x638   :  { %v1687_v31 = vpop.f32.mrb[20].mxu0 }
 0x639   :  { %v1820_v32 = vmul.f32 %v1687_v31, %v4179_v29  ;;  %v1689_v33 = vpop.f32.mrb[21].mxu0 }
 0x63a   :  { %v1821_v34 = vmul.f32 %v1689_v33, %v4181_v30  ;;  %v1691_v35 = vpop.f32.mrb[22].mxu0 }
 0x63b   :  { %v1822_v36 = vadd.f32 %v1820_v32, %v1756_v23  ;;  %v1692_v37 = vpop.f32.mrb[23].mxu0  ;;  %v3021_v32 = vld [vmem:[%s4860_s4] sm:$0xff] }
 0x63c   :  { %v1823_v38 = vadd.f32 %v1821_v34, %v1757_v25 }
 0x640   :  { %v1811_v39 = vpop.f32.mrb[28].mxu0 }
 0x641   :  { %v1824_v42 = vmul.f32 %v1811_v39, %v4188_v40  ;;  %v1813_v43 = vpop.f32.mrb[29].mxu0 }
 0x642   :  { %v1825_v44 = vmul.f32 %v1813_v43, %v4190_v41  ;;  %v1815_v45 = vpop.f32.mrb[30].mxu0 }
 0x643   :  { %v1816_v46 = vpop.f32.mrb[31].mxu0  ;;  %v4591_v47 = vadd.f32 %v1824_v42, %v1822_v36  ;;  %v3756_v42 = vld [vmem:[%s4859_s3 + $0xc] sm:$0xf] }
 0x644   :  { %v4593_v48 = vadd.f32 %v1825_v44, %v1823_v38 }
 0x648   :  { %v2114_v49 = vpop.f32.mrb[32].mxu0 }
 0x649   :  { %v2115_v50 = vadd.f32 %v2114_v49, %v2055_v7  ;;  %v2116_v51 = vpop.f32.mrb[33].mxu0 }
 0x64a   :  { %v2117_v52 = vadd.f32 %v2116_v51, %v2057_v26  ;;  %v2118_v53 = vpop.f32.mrb[34].mxu0 }
 0x64b   :  { %v2119_v54 = vpop.f32.mrb[35].mxu0 }
 0x650   :  { %v2293_v55 = vpop.f32.mrb[28].mxu1  ;;  %v2355_v56 = vpop.f32.mrb[36].mxu0 }
 0x651   :  { %v2426_v57 = vmul.f32 %v2293_v55, %v4179_v29  ;;  %v2362_v58 = vadd.f32 %v2355_v56, %v2115_v50  ;;  %v2295_v60 = vpop.f32.mrb[29].mxu1  ;;  %v2357_v61 = vpop.f32.mrb[37].mxu0  ;;  %v2468_v56 = vld [vmem:[%s4859_s3] sm:$0xf] }
 0x652   :  { %v2427_v62 = vmul.f32 %v2295_v60, %v4181_v30  ;;  %v2363_v63 = vadd.f32 %v2357_v61, %v2117_v52  ;;  %v2297_v59 = vpop.f32.mrb[30].mxu1  ;;  %v2359_v0 = vpop.f32.mrb[38].mxu0 }
 0x653   :  { %v2428_v1 = vadd.f32 %v2426_v57, %v2362_v58  ;;  %v2298_v2 = vpop.f32.mrb[31].mxu1  ;;  %v2360_v4 = vpop.f32.mrb[39].mxu0  ;;  %v3764_v0 = vld [vmem:[%s4859_s3 + $0x10] sm:$0xf] }
 0x654   :  { %v2429_v5 = vadd.f32 %v2427_v62, %v2363_v63 }
 0x658   :  { %v2417_v6 = vpop.f32.mrb[36].mxu1 }
 0x659   :  { %v2430_v8 = vmul.f32 %v2417_v6, %v4188_v40  ;;  %v2419_v9 = vpop.f32.mrb[37].mxu1 }
 0x65a   :  { %v2431_v10 = vmul.f32 %v2419_v9, %v4190_v41  ;;  %v2421_v12 = vpop.f32.mrb[38].mxu1 }
 0x65b   :  { %v2432_v13 = vadd.f32 %v2430_v8, %v2428_v1  ;;  %v2422_v14 = vpop.f32.mrb[39].mxu1 }
 0x65c   :  { %v2433_v16 = vadd.f32 %v2431_v10, %v2429_v5  ;;  %v3769_v10 = vld [vmem:[%s4859_s3 + $0x14] sm:$0xf] }
 0x65d   :  { %v2440_v11 = vadd.f32 %v2438_v15, %v2432_v13 }
 0x65e   :  { %v2441_v17 = vadd.f32 %v2438_v15, %v2433_v16 }
 0x65f   :  { %vm2442_vm4 = vcmp.ge.f32.partialorder %v2440_v11, 0.0  ;;  %v2444_v18 = vmul.f32 0.01, %v2440_v11 }
 0x660   :  { %vm2443_vm5 = vcmp.ge.f32.partialorder %v2441_v17, 0.0  ;;  %v2445_v19 = vmul.f32 0.01, %v2441_v17 }
 0x661   :  { %v2446_v20 = vsel %vm2442_vm4, %v2440_v11, %v2444_v18  ;;  %vm4896_vm4 = vcmask 769024  }
 0x662   :  { %v2447_v21 = vsel %vm2443_vm5, %v2441_v17, %v2445_v19  ;;  %vm4897_vm5 = vmmov %vm4896_vm4  ;;  %v3754_v17 = vld [vmem:[%s4859_s3 + $0x4] sm:$0xf] }
 0x663   :  { %v3817_v22 = vpack.c.bf16 %v2447_v21, %v2446_v20 }
 0x665   :  { %2455 = vrot.lane.b32.xlu0 %v3817_v22, %s3989_s2 }
 0x6d7   :  { %v2456_v23 = vpop.permute.xlu0 %2455 }
 0x6d8   :  { %v2457_v25 = vrot.slane %v2456_v23, 4 }
 0x6da   :  { %v2458_v7 = vsel %vm1862_vm3, %v2457_v25, %v2456_v23  ;;  %2465 = vst.msk [vmem:[#allocation2 + $0x10] sm:$0xf] %vm2464_vm10, %v2457_v25 }
 0x6db   :  { %2463 = vst.msk [vmem:[#allocation2 + $0x8] sm:$0xff] %vm4601_vm2, %v2458_v7 }
 0x6e1   :  { %v3951_v31 = vld [vmem:[#allocation2 + $0x10] ss:$0 sps:$4 sm:$0xff]  }
 0x6e2   :  { %v2466_v26 = vld [vmem:[#allocation2 + $0x8] sm:$0xff] }
 0x6e3   :  { %v3758_v27 = vcombine.high %v2466_v26, %v2466_v26  ;;  %v3757_v28 = vcombine.low %v2466_v26, %v2466_v26 }
 0x6e5   :  { %2482 = vrot.lane.b32.xlu0 %v3758_v27, %s3990_s0  ;;  %2480 = vrot.lane.b32.xlu1 %v3757_v28, %s3990_s0 }
 0x6e9   :  { %2538 = vrot.lane.b32.xlu0 %v3757_v28, %s3988_s19  ;;  %2484 = vrot.lane.b32.xlu1 %v3951_v31, %s3990_s0 }
 0x6ed   :  { %2542 = vrot.lane.b32.xlu0 %v3951_v31, %s3988_s19  ;;  %2540 = vrot.lane.b32.xlu1 %v3758_v27, %s3988_s19 }
 0x6f1   :  { %2599 = vrot.lane.b32.xlu0 %v3758_v27, %s3991_s23  ;;  %2601 = vrot.lane.b32.xlu1 %v3951_v31, %s3991_s23 }
 0x6f5   :  { %2718 = vrot.lane.b32.xlu0 %v3951_v31, %s3992_s11  ;;  %2597 = vrot.lane.b32.xlu1 %v3757_v28, %s3991_s23 }
 0x6f9   :  { %2714 = vrot.lane.b32.xlu0 %v3757_v28, %s3992_s11  ;;  %2776 = vrot.lane.b32.xlu1 %v3951_v31, %s3994_s13 }
 0x6fd   :  { %2659 = vrot.lane.b32.xlu0 %v3951_v31, %s3993_s12  ;;  %2716 = vrot.lane.b32.xlu1 %v3758_v27, %s3992_s11 }
 0x701   :  { %2896 = vrot.lane.b32.xlu0 %v3951_v31, %s3995_s14  ;;  %2835 = vrot.lane.b32.xlu1 %v3951_v31, %s3996_s15 }
 0x705   :  { %2774 = vrot.lane.b32.xlu0 %v3758_v27, %s3994_s13  ;;  %2772 = vrot.lane.b32.xlu1 %v3757_v28, %s3994_s13 }
 0x709   :  { %2655 = vrot.lane.b32.xlu0 %v3757_v28, %s3993_s12  ;;  %2657 = vrot.lane.b32.xlu1 %v3758_v27, %s3993_s12 }
 0x70d   :  { %2833 = vrot.lane.b32.xlu0 %v3758_v27, %s3996_s15  ;;  %2831 = vrot.lane.b32.xlu1 %v3757_v28, %s3996_s15 }
 0x711   :  { %2892 = vrot.lane.b32.xlu0 %v3757_v28, %s3995_s14  ;;  %2894 = vrot.lane.b32.xlu1 %v3758_v27, %s3995_s14 }
 0x715   :  { %2955 = vrot.lane.b32.xlu0 %v3758_v27, %s3997_s16  ;;  %2953 = vrot.lane.b32.xlu1 %v3757_v28, %s3997_s16  ;;  %v3755_v27 = vld [vmem:[%s4859_s3 + $0x8] sm:$0xf]  ;;  %v3777_v28 = vld [vmem:[%s4859_s3 + $0x1c] sm:$0xf] }
 0x719   :  { %2957 = vrot.lane.b32.xlu1 %v3951_v31, %s3997_s16  ;;  %3024 = vperm.xlu0 %3938, %v3021_v32  }
 0x757   :  { %v2483_v33 = vpop.permute.xlu0 %2482  ;;  %v2481_v34 = vpop.permute.xlu1 %2480 }
 0x758   :  { %v2486_v35 = vsel %vm1891_vm11, %v2481_v34, %v2483_v33 }
 0x759   :  { %v2492_v39 = vsel %vm100_vm12, %v2486_v35, 0 }
 0x75b   :  { %v2539_v36 = vpop.permute.xlu0 %2538  ;;  %v2485_v37 = vpop.permute.xlu1 %2484 }
 0x75c   :  { %v2487_v38 = vsel %vm1891_vm11, %v2483_v33, %v2485_v37  ;;  %v3774_v37 = vld [vmem:[%s4859_s3 + $0x18] sm:$0xf] }
 0x75d   :  { %3760 = vmatprep.subr.msk.bf16.mxu0 %vm100_vm12, %v2487_v38 }
 0x75e   :  { %2498 = vmatpush1.bf16.msra.mxu0 %v2492_v39  ;;  %v3780_v39 = vld [vmem:[%s4859_s3 + $0x20] sm:$0xf] }
 0x75f   :  { %v2543_v43 = vpop.permute.xlu0 %2542  ;;  %v2541_v44 = vpop.permute.xlu1 %2540 }
 0x760   :  { %v2544_v45 = vsel %vm4896_vm4, %v2539_v36, %v2541_v44  ;;  %v2545_v46 = vsel %vm4897_vm5, %v2541_v44, %v2543_v43 }
 0x761   :  { %v2550_v49 = vsel %vm100_vm12, %v2544_v45, 0  ;;  %3761 = vmatmul.mubr.msk.bf16.vlgmr.msra.gmra.mrb[40].mxu0 %vm96_vm13, %v3756_v42  ;;  %3762 = vmatprep.subr.msk.bf16.mxu0 %vm100_vm12, %v2545_v46 }
 0x762   :  { %2556 = vmatpush1.bf16.msra.mxu0 %v2550_v49  ;;  %2587 = vmatprep.mubr.bf16.mxu0 %v3979_v3 }
 0x763   :  { %v2600_v50 = vpop.permute.xlu0 %2599  ;;  %v2602_v51 = vpop.permute.xlu1 %2601 }
 0x764   :  { %v2604_v52 = vsel %vm2009_vm6, %v2600_v50, %v2602_v51 }
 0x765   :  { %3765 = vmatprep.subr.msk.bf16.mxu0 %vm100_vm12, %v2604_v52 }
 0x767   :  { %v2719_v53 = vpop.permute.xlu0 %2718  ;;  %v2598_v54 = vpop.permute.xlu1 %2597 }
 0x768   :  { %v2603_v55 = vsel %vm2009_vm6, %v2598_v54, %v2600_v50 }
 0x769   :  { %v2609_v60 = vsel %vm100_vm12, %v2603_v55, 0 }
 0x76b   :  { %v2715_v57 = vpop.permute.xlu0 %2714  ;;  %v2777_v58 = vpop.permute.xlu1 %2776 }
 0x76d   :  { %3763 = vmatmul.mubr.msk.bf16.vlgmr.msra.gmra.mrb[40].mxu0 %vm96_vm13, %v2468_v56 }
 0x76e   :  { %2615 = vmatpush1.bf16.msra.mxu0 %v2609_v60  ;;  %2646 = vmatprep.mubr.bf16.mxu0 %v3979_v3 }
 0x76f   :  { %v2660_v61 = vpop.permute.xlu0 %2659  ;;  %v2717_v62 = vpop.permute.xlu1 %2716 }
 0x770   :  { %v2721_v63 = vsel %vm2128_vm0, %v2717_v62, %v2719_v53  ;;  %v2720_v59 = vsel %vm2128_vm0, %v2715_v57, %v2717_v62 }
 0x771   :  { %3770 = vmatprep.subr.msk.bf16.mxu0 %vm100_vm12, %v2721_v63  ;;  %v2726_v4 = vsel %vm100_vm12, %v2720_v59, 0 }
 0x773   :  { %v2897_v1 = vpop.permute.xlu0 %2896  ;;  %v2836_v2 = vpop.permute.xlu1 %2835 }
 0x775   :  { %3766 = vmatmul.mubr.msk.bf16.vlgmr.msra.gmra.mrb[44].mxu0 %vm96_vm13, %v3764_v0 }
 0x776   :  { %2732 = vmatpush1.bf16.msra.mxu0 %v2726_v4  ;;  %2763 = vmatprep.mubr.bf16.mxu0 %v3979_v3 }
 0x777   :  { %v2775_v5 = vpop.permute.xlu0 %2774  ;;  %v2773_v6 = vpop.permute.xlu1 %2772 }
 0x778   :  { %v2779_v8 = vsel %vm2187_vm8, %v2775_v5, %v2777_v58  ;;  %v2778_v9 = vsel %vm2187_vm8, %v2773_v6, %v2775_v5 }
 0x779   :  { %3772 = vmatprep.subr.msk.bf16.mxu0 %vm100_vm12, %v2779_v8  ;;  %v2784_v16 = vsel %vm100_vm12, %v2778_v9, 0 }
 0x77b   :  { %v2656_v12 = vpop.permute.xlu0 %2655  ;;  %v2658_v13 = vpop.permute.xlu1 %2657 }
 0x77c   :  { %v2661_v14 = vsel %vm2068_vm15, %v2656_v12, %v2658_v13  ;;  %v2662_v15 = vsel %vm2068_vm15, %v2658_v13, %v2660_v61 }
 0x77d   :  { %v2667_v11 = vsel %vm100_vm12, %v2661_v14, 0  ;;  %3767 = vmatprep.subr.msk.bf16.mxu1 %vm100_vm12, %v2662_v15  ;;  %3771 = vmatmul.mubr.msk.bf16.vlgmr.msra.gmra.mrb[48].mxu0 %vm96_vm13, %v3769_v10 }
 0x77e   :  { %2790 = vmatpush1.bf16.msra.mxu0 %v2784_v16  ;;  %2673 = vmatpush1.bf16.msra.mxu1 %v2667_v11 }
 0x77f   :  { %v2834_v18 = vpop.permute.xlu0 %2833  ;;  %v2832_v19 = vpop.permute.xlu1 %2831  ;;  %2821 = vmatprep.mubr.bf16.mxu0 %v3979_v3 }
 0x780   :  { %v2838_v20 = vsel %vm2247_vm14, %v2834_v18, %v2836_v2  ;;  %v2837_v26 = vsel %vm2247_vm14, %v2832_v19, %v2834_v18 }
 0x781   :  { %3768 = vmatmul.mubr.msk.bf16.vlgmr.msra.gmra.mrb[40].mxu1 %vm96_vm13, %v3754_v17  ;;  %3775 = vmatprep.subr.msk.bf16.mxu0 %vm100_vm12, %v2838_v20  ;;  %v2843_v32 = vsel %vm100_vm12, %v2837_v26, 0 }
 0x782   :  { %2941 = vmatprep.mubr.bf16.mxu1 %v3979_v3 }
 0x783   :  { %v2893_v21 = vpop.permute.xlu0 %2892  ;;  %v2895_v22 = vpop.permute.xlu1 %2894 }
 0x784   :  { %v2898_v23 = vsel %vm2309_vm1, %v2893_v21, %v2895_v22  ;;  %v2899_v25 = vsel %vm2309_vm1, %v2895_v22, %v2897_v1 }
 0x785   :  { %v2904_v7 = vsel %vm100_vm12, %v2898_v23, 0  ;;  %3778 = vmatprep.subr.msk.bf16.mxu1 %vm100_vm12, %v2899_v25 }
 0x786   :  { %2910 = vmatpush1.bf16.msra.mxu1 %v2904_v7 }
 0x787   :  { %v2954_v31 = vpop.permute.xlu1 %2953  ;;  %v2956_v33 = vpop.permute.xlu0 %2955 }
 0x788   :  { %v2959_v36 = vsel %vm4899_vm7, %v2954_v31, %v2956_v33 }
 0x789   :  { %3773 = vmatmul.mubr.msk.bf16.vlgmr.msra.gmra.mrb[48].mxu0 %vm96_vm13, %v3755_v27  ;;  %3779 = vmatmul.mubr.msk.bf16.vlgmr.msra.gmra.mrb[44].mxu1 %vm96_vm13, %v3777_v28  ;;  %v2965_v38 = vsel %vm100_vm12, %v2959_v36, 0 }
 0x78a   :  { %2849 = vmatpush1.bf16.msra.mxu0 %v2843_v32  ;;  %2880 = vmatprep.mubr.bf16.mxu0 %v3979_v3 }
 0x78b   :  { %v2958_v34 = vpop.permute.xlu1 %2957  ;;  %3113 = vmatprep.mubr.bf16.mxu1 %v3979_v3 }
 0x78c   :  { %v2960_v35 = vsel %vm4898_vm9, %v2956_v33, %v2958_v34 }
 0x78d   :  { %3781 = vmatprep.subr.msk.bf16.mxu0 %vm100_vm12, %v2960_v35 }
 0x791   :  { %3776 = vmatmul.mubr.msk.bf16.vlgmr.msra.gmra.mrb[40].mxu0 %vm96_vm13, %v3774_v37 }
 0x792   :  { %2971 = vmatpush1.bf16.msra.mxu0 %v2965_v38  ;;  %3002 = vmatprep.mubr.bf16.mxu0 %v3979_v3  ;;  %v3786_v38 = vld [vmem:[%s4861_s5 + $0xc] sm:$0xf] }
 0x798   :  { %v3025_v12 = vpop.permute.xlu0 %3024 }
 0x799   :  { %3782 = vmatmul.mubr.msk.bf16.vlgmr.msra.gmra.mrb[48].mxu0 %vm96_vm13, %v3780_v39 }
 0x79a   :  { %3288 = vmatprep.mubr.bf16.mxu0 %v3979_v3 }
 0x848   :  { %v2648_v42 = vpop.f32.mrb[44].mxu0 }
 0x849   :  { %v2650_v43 = vpop.f32.mrb[45].mxu0 }
 0x84a   :  { %v2652_v44 = vpop.f32.mrb[46].mxu0 }
 0x84b   :  { %v2653_v45 = vpop.f32.mrb[47].mxu0 }
 0x854   :  { %v2706_v46 = vpop.f32.mrb[40].mxu1 }
 0x855   :  { %v2707_v49 = vadd.f32 %v2706_v46, %v2648_v42  ;;  %v2708_v50 = vpop.f32.mrb[41].mxu1 }
 0x856   :  { %v2709_v51 = vadd.f32 %v2708_v50, %v2650_v43  ;;  %v2710_v52 = vpop.f32.mrb[42].mxu1 }
 0x857   :  { %v2711_v53 = vpop.f32.mrb[43].mxu1 }
 0x85c   :  { %v2943_v54 = vpop.f32.mrb[44].mxu1 }
 0x85d   :  { %v2950_v55 = vadd.f32 %v2943_v54, %v2707_v49  ;;  %v2945_v56 = vpop.f32.mrb[45].mxu1  ;;  %v3052_v54 = vld [vmem:[%s4861_s5] sm:$0xf] }
 0x85e   :  { %v2951_v57 = vadd.f32 %v2945_v56, %v2709_v51  ;;  %v2947_v58 = vpop.f32.mrb[46].mxu1 }
 0x85f   :  { %v2948_v60 = vpop.f32.mrb[47].mxu1 }
 0x864   :  { %v2882_v61 = vpop.f32.mrb[40].mxu0 }
 0x865   :  { %v3013_v62 = vmul.f32 %v2882_v61, %v4179_v29  ;;  %v2884_v63 = vpop.f32.mrb[41].mxu0 }
 0x866   :  { %v3014_v59 = vmul.f32 %v2884_v63, %v4181_v30  ;;  %v2886_v0 = vpop.f32.mrb[42].mxu0  ;;  %v3794_v63 = vld [vmem:[%s4861_s5 + $0x10] sm:$0xf] }
 0x867   :  { %v3015_v1 = vadd.f32 %v3013_v62, %v2950_v55  ;;  %v2887_v2 = vpop.f32.mrb[43].mxu0 }
 0x868   :  { %v3016_v4 = vadd.f32 %v3014_v59, %v2951_v57 }
 0x86c   :  { %v3004_v5 = vpop.f32.mrb[48].mxu0 }
 0x86d   :  { %v3017_v6 = vmul.f32 %v3004_v5, %v4188_v40  ;;  %v3006_v8 = vpop.f32.mrb[49].mxu0 }
 0x86e   :  { %v3018_v9 = vmul.f32 %v3006_v8, %v4190_v41  ;;  %v3008_v10 = vpop.f32.mrb[50].mxu0  ;;  %v3799_v8 = vld [vmem:[%s4861_s5 + $0x14] sm:$0xf] }
 0x86f   :  { %v3019_v13 = vadd.f32 %v3017_v6, %v3015_v1  ;;  %v3009_v14 = vpop.f32.mrb[51].mxu0 }
 0x870   :  { %v3020_v15 = vadd.f32 %v3018_v9, %v3016_v4 }
 0x871   :  { %v3027_v16 = vadd.f32 %v3025_v12, %v3019_v13 }
 0x872   :  { %v3028_v11 = vadd.f32 %v3025_v12, %v3020_v15 }
 0x873   :  { %vm3029_vm4 = vcmp.ge.f32.partialorder %v3027_v16, 0.0  ;;  %v3031_v17 = vmul.f32 0.01, %v3027_v16 }
 0x874   :  { %vm3030_vm5 = vcmp.ge.f32.partialorder %v3028_v11, 0.0  ;;  %v3032_v18 = vmul.f32 0.01, %v3028_v11 }
 0x875   :  { %v3033_v19 = vsel %vm3029_vm4, %v3027_v16, %v3031_v17  ;;  %v3784_v16 = vld [vmem:[%s4861_s5 + $0x4] sm:$0xf] }
 0x876   :  { %v3034_v20 = vsel %vm3030_vm5, %v3028_v11, %v3032_v18 }
 0x877   :  { %v3818_v21 = vpack.c.bf16 %v3034_v20, %v3033_v19 }
 0x879   :  { %3042 = vrot.lane.b32.xlu1 %v3818_v21, %s3989_s2 }
 0x8eb   :  { %v3043_v22 = vpop.permute.xlu1 %3042 }
 0x8ec   :  { %v3044_v23 = vrot.slane %v3043_v22, 4 }
 0x8ee   :  { %v3045_v25 = vsel %vm1862_vm3, %v3044_v23, %v3043_v22  ;;  %3049 = vst.msk [vmem:[#allocation2 + $0x10] sm:$0xf] %vm2464_vm10, %v3044_v23  ;;  %vm4900_vm3 = vcmask 769024  }
 0x8ef   :  { %3048 = vst.msk [vmem:[#allocation2 + $0x8] sm:$0xff] %vm4601_vm2, %v3045_v25  ;;  %vm4901_vm2 = vmmov %vm4900_vm3 }
 0x8f5   :  { %v3954_v28 = vld [vmem:[#allocation2 + $0x10] ss:$0 sps:$4 sm:$0xff]  }
 0x8f6   :  { %v3050_v7 = vld [vmem:[#allocation2 + $0x8] sm:$0xff] }
 0x8f7   :  { %v3787_v26 = vcombine.low %v3050_v7, %v3050_v7  ;;  %v3788_v27 = vcombine.high %v3050_v7, %v3050_v7  ;;  %v3785_v7 = vld [vmem:[%s4861_s5 + $0x8] sm:$0xf] }
 0x8f9   :  { %3066 = vrot.lane.b32.xlu0 %v3788_v27, %s3990_s0  ;;  %3064 = vrot.lane.b32.xlu1 %v3787_v26, %s3990_s0 }
 0x8fd   :  { %3122 = vrot.lane.b32.xlu0 %v3787_v26, %s3988_s19  ;;  %3068 = vrot.lane.b32.xlu1 %v3954_v28, %s3990_s0 }
 0x901   :  { %3126 = vrot.lane.b32.xlu0 %v3954_v28, %s3988_s19  ;;  %3124 = vrot.lane.b32.xlu1 %v3788_v27, %s3988_s19 }
 0x905   :  { %3183 = vrot.lane.b32.xlu0 %v3788_v27, %s3991_s23  ;;  %3185 = vrot.lane.b32.xlu1 %v3954_v28, %s3991_s23 }
 0x909   :  { %3302 = vrot.lane.b32.xlu0 %v3954_v28, %s3992_s11  ;;  %3181 = vrot.lane.b32.xlu1 %v3787_v26, %s3991_s23 }
 0x90d   :  { %3298 = vrot.lane.b32.xlu0 %v3787_v26, %s3992_s11  ;;  %3360 = vrot.lane.b32.xlu1 %v3954_v28, %s3994_s13 }
 0x911   :  { %3243 = vrot.lane.b32.xlu0 %v3954_v28, %s3993_s12  ;;  %3300 = vrot.lane.b32.xlu1 %v3788_v27, %s3992_s11 }
 0x915   :  { %3480 = vrot.lane.b32.xlu0 %v3954_v28, %s3995_s14  ;;  %3419 = vrot.lane.b32.xlu1 %v3954_v28, %s3996_s15 }
 0x919   :  { %3358 = vrot.lane.b32.xlu0 %v3788_v27, %s3994_s13  ;;  %3356 = vrot.lane.b32.xlu1 %v3787_v26, %s3994_s13 }
 0x91d   :  { %3239 = vrot.lane.b32.xlu0 %v3787_v26, %s3993_s12  ;;  %3241 = vrot.lane.b32.xlu1 %v3788_v27, %s3993_s12 }
 0x921   :  { %3417 = vrot.lane.b32.xlu0 %v3788_v27, %s3996_s15  ;;  %3415 = vrot.lane.b32.xlu1 %v3787_v26, %s3996_s15 }
 0x925   :  { %3476 = vrot.lane.b32.xlu0 %v3787_v26, %s3995_s14  ;;  %3478 = vrot.lane.b32.xlu1 %v3788_v27, %s3995_s14 }
 0x929   :  { %3539 = vrot.lane.b32.xlu0 %v3788_v27, %s3997_s16  ;;  %3537 = vrot.lane.b32.xlu1 %v3787_v26, %s3997_s16  ;;  %v3807_v26 = vld [vmem:[%s4861_s5 + $0x1c] sm:$0xf] }
 0x92d   :  { %1831 = vperm.xlu0 %3938, %v1828_v24   ;;  %3541 = vrot.lane.b32.xlu1 %v3954_v28, %s3997_s16 }
 0x931   :  { %3608 = vperm.xlu1 %3937, %v1828_v24  }
 0x96b   :  { %v3067_v31 = vpop.permute.xlu0 %3066  ;;  %v3065_v32 = vpop.permute.xlu1 %3064 }
 0x96c   :  { %v3070_v33 = vsel %vm1891_vm11, %v3065_v32, %v3067_v31 }
 0x96d   :  { %v3076_v37 = vsel %vm100_vm12, %v3070_v33, 0 }
 0x96f   :  { %v3123_v34 = vpop.permute.xlu0 %3122  ;;  %v3069_v35 = vpop.permute.xlu1 %3068 }
 0x970   :  { %v3071_v36 = vsel %vm1891_vm11, %v3067_v31, %v3069_v35  ;;  %vm4902_vm11 = vmmov %vm4899_vm7 }
 0x971   :  { %3790 = vmatprep.subr.msk.bf16.mxu1 %vm100_vm12, %v3071_v36  ;;  %v3810_v36 = vld [vmem:[%s4861_s5 + $0x20] sm:$0xf] }
 0x972   :  { %3082 = vmatpush1.bf16.msra.mxu1 %v3076_v37 }
 0x973   :  { %v3127_v39 = vpop.permute.xlu0 %3126  ;;  %v3125_v42 = vpop.permute.xlu1 %3124 }
 0x974   :  { %v3128_v43 = vsel %vm4900_vm3, %v3123_v34, %v3125_v42  ;;  %v3129_v44 = vsel %vm4901_vm2, %v3125_v42, %v3127_v39  ;;  %v3804_v34 = vld [vmem:[%s4861_s5 + $0x18] sm:$0xf]  ;;  %s3998_s5 = smov [#allocation3]  }
 0x975   :  { %v3134_v45 = vsel %vm100_vm12, %v3128_v43, 0  ;;  %3791 = vmatmul.mubr.msk.bf16.vlgmr.msra.gmra.mrb[48].mxu1 %vm96_vm13, %v3786_v38  ;;  %3792 = vmatprep.subr.msk.bf16.mxu1 %vm100_vm12, %v3129_v44  ;;  %s3621_s17 = sshll.u32 %s3998_s5, 4  ;;  %s3622_s17 = int_to_ptr.vmem [resolvable:$true] %s3621_s17 }
 0x976   :  { %3140 = vmatpush1.bf16.msra.mxu1 %v3134_v45  ;;  %3171 = vmatprep.mubr.bf16.mxu1 %v3979_v3  ;;  %s3955_s18 = scalar_lea.vmem %s3622_s17, 512  ;;  %p3960_p1 = scmp.lt.s32.totalorder %s3622_s17, %s3622_s17 }
 0x977   :  { %v3184_v46 = vpop.permute.xlu0 %3183  ;;  %v3186_v49 = vpop.permute.xlu1 %3185  ;;  %p3956_p0 = scmp.ne.s32.totalorder %s3622_s17, %s3955_s18  ;;  %p3961_p2 = scmp.lt.s32.totalorder %s3955_s18, %s3955_s18 }
 0x978   :  { %v3188_v50 = vsel %vm2009_vm6, %v3184_v46, %v3186_v49 }
 0x979   :  { %3795 = vmatprep.subr.msk.bf16.mxu1 %vm100_vm12, %v3188_v50  ;;  %p3962_p3 = por %p3961_p2, %p3960_p1 }
 0x97b   :  { %v3303_v51 = vpop.permute.xlu0 %3302  ;;  %v3182_v52 = vpop.permute.xlu1 %3181  ;;  %p3963_p4 = pnand %p3962_p3, %p3956_p0 }
 0x97c   :  { %v3187_v53 = vsel %vm2009_vm6, %v3182_v52, %v3184_v46  ;;  %vm4903_vm6 = vmmov %vm4899_vm7 }
 0x97d   :  { %v3193_v57 = vsel %vm100_vm12, %v3187_v53, 0 }
 0x97f   :  { %v3299_v55 = vpop.permute.xlu0 %3298  ;;  %v3361_v56 = vpop.permute.xlu1 %3360 }
 0x981   :  { %3793 = vmatmul.mubr.msk.bf16.vlgmr.msra.gmra.mrb[48].mxu1 %vm96_vm13, %v3052_v54 }
 0x982   :  { %3199 = vmatpush1.bf16.msra.mxu1 %v3193_v57  ;;  %3230 = vmatprep.mubr.bf16.mxu1 %v3979_v3 }
 0x983   :  { %v3244_v58 = vpop.permute.xlu0 %3243  ;;  %v3301_v60 = vpop.permute.xlu1 %3300 }
 0x984   :  { %v3305_v61 = vsel %vm2128_vm0, %v3301_v60, %v3303_v51  ;;  %v3304_v62 = vsel %vm2128_vm0, %v3299_v55, %v3301_v60 }
 0x985   :  { %3800 = vmatprep.subr.msk.bf16.mxu1 %vm100_vm12, %v3305_v61  ;;  %v3310_v1 = vsel %vm100_vm12, %v3304_v62, 0 }
 0x987   :  { %v3481_v59 = vpop.permute.xlu0 %3480  ;;  %v3420_v0 = vpop.permute.xlu1 %3419 }
 0x989   :  { %3796 = vmatmul.mubr.msk.bf16.vlgmr.msra.gmra.mrb[52].mxu1 %vm96_vm13, %v3794_v63 }
 0x98a   :  { %3316 = vmatpush1.bf16.msra.mxu1 %v3310_v1  ;;  %3347 = vmatprep.mubr.bf16.mxu1 %v3979_v3 }
 0x98b   :  { %v3359_v2 = vpop.permute.xlu0 %3358  ;;  %v3357_v4 = vpop.permute.xlu1 %3356 }
 0x98c   :  { %v3363_v5 = vsel %vm2187_vm8, %v3359_v2, %v3361_v56  ;;  %v3362_v6 = vsel %vm2187_vm8, %v3357_v4, %v3359_v2 }
 0x98d   :  { %3802 = vmatprep.subr.msk.bf16.mxu1 %vm100_vm12, %v3363_v5  ;;  %v3368_v14 = vsel %vm100_vm12, %v3362_v6, 0 }
 0x98f   :  { %v3240_v9 = vpop.permute.xlu0 %3239  ;;  %v3242_v10 = vpop.permute.xlu1 %3241 }
 0x990   :  { %v3245_v12 = vsel %vm2068_vm15, %v3240_v9, %v3242_v10  ;;  %v3246_v13 = vsel %vm2068_vm15, %v3242_v10, %v3244_v58 }
 0x991   :  { %v3251_v15 = vsel %vm100_vm12, %v3245_v12, 0  ;;  %3797 = vmatprep.subr.msk.bf16.mxu0 %vm100_vm12, %v3246_v13  ;;  %3801 = vmatmul.mubr.msk.bf16.vlgmr.msra.gmra.mrb[56].mxu1 %vm96_vm13, %v3799_v8 }
 0x992   :  { %3374 = vmatpush1.bf16.msra.mxu1 %v3368_v14  ;;  %3257 = vmatpush1.bf16.msra.mxu0 %v3251_v15 }
 0x993   :  { %v3418_v11 = vpop.permute.xlu0 %3417  ;;  %v3416_v17 = vpop.permute.xlu1 %3415  ;;  %3405 = vmatprep.mubr.bf16.mxu1 %v3979_v3 }
 0x994   :  { %v3422_v18 = vsel %vm2247_vm14, %v3418_v11, %v3420_v0  ;;  %v3421_v25 = vsel %vm2247_vm14, %v3416_v17, %v3418_v11 }
 0x995   :  { %3798 = vmatmul.mubr.msk.bf16.vlgmr.msra.gmra.mrb[52].mxu0 %vm96_vm13, %v3784_v16  ;;  %3805 = vmatprep.subr.msk.bf16.mxu1 %vm100_vm12, %v3422_v18  ;;  %v3427_v28 = vsel %vm100_vm12, %v3421_v25, 0 }
 0x996   :  { %3525 = vmatprep.mubr.bf16.mxu0 %v3979_v3 }
 0x997   :  { %v3477_v19 = vpop.permute.xlu0 %3476  ;;  %v3479_v20 = vpop.permute.xlu1 %3478 }
 0x998   :  { %v3482_v21 = vsel %vm2309_vm1, %v3477_v19, %v3479_v20  ;;  %v3483_v22 = vsel %vm2309_vm1, %v3479_v20, %v3481_v59 }
 0x999   :  { %v3488_v23 = vsel %vm100_vm12, %v3482_v21, 0  ;;  %3808 = vmatprep.subr.msk.bf16.mxu0 %vm100_vm12, %v3483_v22 }
 0x99a   :  { %3494 = vmatpush1.bf16.msra.mxu0 %v3488_v23 }
 0x99b   :  { %v3538_v27 = vpop.permute.xlu1 %3537  ;;  %v3540_v24 = vpop.permute.xlu0 %3539 }
 0x99c   :  { %v3543_v33 = vsel %vm4903_vm6, %v3538_v27, %v3540_v24 }
 0x99d   :  { %3803 = vmatmul.mubr.msk.bf16.vlgmr.msra.gmra.mrb[56].mxu1 %vm96_vm13, %v3785_v7  ;;  %3809 = vmatmul.mubr.msk.bf16.vlgmr.msra.gmra.mrb[56].mxu0 %vm96_vm13, %v3807_v26  ;;  %v3549_v35 = vsel %vm100_vm12, %v3543_v33, 0 }
 0x99e   :  { %3433 = vmatpush1.bf16.msra.mxu1 %v3427_v28  ;;  %3464 = vmatprep.mubr.bf16.mxu1 %v3979_v3 }
 0x99f   :  { %v3542_v31 = vpop.permute.xlu1 %3541 }
 0x9a0   :  { %v3544_v32 = vsel %vm4902_vm11, %v3540_v24, %v3542_v31 }
 0x9a1   :  { %3811 = vmatprep.subr.msk.bf16.mxu1 %vm100_vm12, %v3544_v32 }
 0x9a5   :  { %3806 = vmatmul.mubr.msk.bf16.vlgmr.msra.gmra.mrb[48].mxu1 %vm96_vm13, %v3804_v34 }
 0x9a6   :  { %3555 = vmatpush1.bf16.msra.mxu1 %v3549_v35  ;;  %3586 = vmatprep.mubr.bf16.mxu1 %v3979_v3 }
 0x9ac   :  { %v1832_v37 = vpop.permute.xlu0 %1831 }
 0x9ad   :  { %v1834_v38 = vadd.f32 %v1832_v37, %v4591_v47  ;;  %v1835_v39 = vadd.f32 %v1832_v37, %v4593_v48  ;;  %3812 = vmatmul.mubr.msk.bf16.vlgmr.msra.gmra.mrb[56].mxu1 %vm96_vm13, %v3810_v36 }
 0x9af   :  { %1836 = vst [vmem:[#allocation3] sm:$0xff] %v1834_v38  ;;  %1837 = vst [vmem:[#allocation3 + $0x8] sm:$0xff] %v1835_v39 }
 0x9b0   :  { %v3609_v10 = vpop.permute.xlu1 %3608 }
 0xa5c   :  { %v3232_v42 = vpop.f32.mrb[52].mxu1 }
 0xa5d   :  { %v3234_v43 = vpop.f32.mrb[53].mxu1 }
 0xa5e   :  { %v3236_v44 = vpop.f32.mrb[54].mxu1 }
 0xa5f   :  { %v3237_v45 = vpop.f32.mrb[55].mxu1 }
 0xa68   :  { %v3290_v46 = vpop.f32.mrb[52].mxu0 }
 0xa69   :  { %v3291_v49 = vadd.f32 %v3290_v46, %v3232_v42  ;;  %v3292_v3 = vpop.f32.mrb[53].mxu0 }
 0xa6a   :  { %v3293_v50 = vadd.f32 %v3292_v3, %v3234_v43  ;;  %v3294_v51 = vpop.f32.mrb[54].mxu0 }
 0xa6b   :  { %v3295_v52 = vpop.f32.mrb[55].mxu0 }
 0xa70   :  { %v3527_v53 = vpop.f32.mrb[56].mxu0 }
 0xa71   :  { %v3534_v54 = vadd.f32 %v3527_v53, %v3291_v49  ;;  %v3529_v55 = vpop.f32.mrb[57].mxu0 }
 0xa72   :  { %v3535_v47 = vadd.f32 %v3529_v55, %v3293_v50  ;;  %v3531_v56 = vpop.f32.mrb[58].mxu0 }
 0xa73   :  { %v3532_v48 = vpop.f32.mrb[59].mxu0 }
 0xa78   :  { %v3466_v57 = vpop.f32.mrb[48].mxu1 }
 0xa79   :  { %v3597_v58 = vmul.f32 %v3466_v57, %v4179_v29  ;;  %v3468_v60 = vpop.f32.mrb[49].mxu1 }
 0xa7a   :  { %v3598_v61 = vmul.f32 %v3468_v60, %v4181_v30  ;;  %v3470_v62 = vpop.f32.mrb[50].mxu1 }
 0xa7b   :  { %v3599_v63 = vadd.f32 %v3597_v58, %v3534_v54  ;;  %v3471_v59 = vpop.f32.mrb[51].mxu1 }
 0xa7c   :  { %v3600_v0 = vadd.f32 %v3598_v61, %v3535_v47 }
 0xa80   :  { %v3588_v1 = vpop.f32.mrb[56].mxu1 }
 0xa81   :  { %v3601_v2 = vmul.f32 %v3588_v1, %v4188_v40  ;;  %v3590_v4 = vpop.f32.mrb[57].mxu1 }
 0xa82   :  { %v3602_v5 = vmul.f32 %v3590_v4, %v4190_v41  ;;  %v3592_v6 = vpop.f32.mrb[58].mxu1 }
 0xa83   :  { %v3603_v8 = vadd.f32 %v3601_v2, %v3599_v63  ;;  %v3593_v9 = vpop.f32.mrb[59].mxu1 }
 0xa84   :  { %v3604_v29 = vadd.f32 %v3602_v5, %v3600_v0 }
 0xa85   :  { %v3611_v12 = vadd.f32 %v3609_v10, %v3603_v8 }
 0xa86   :  { %v3612_v13 = vadd.f32 %v3609_v10, %v3604_v29 }
 0xa87   :  { %3614 = vst [vmem:[#allocation3 + $0x10] sm:$0xff] %v3611_v12 }
 0xa88   :  { %3615 = vst [vmem:[#allocation3 + $0x18] sm:$0xff] %v3612_v13 }
 0xa89   :  { %3966 = shalt.err (!%p3963_p4)
}
 0xa8a   :  { %s3967_s26 = scalar_lea.hbm %s4865_s9, 512 }
 0xa8b   :  { %p3968_p5 = scmp.ne.s32.totalorder %s4865_s9, %s3967_s26  ;;  %p3971_p6 = scmp.lt.u32.totalorder %s3967_s26, %s4865_s9 }
 0xa8d   :  { %p3973_p7 = pnand %p3971_p6, %p3968_p5 }
 0xa8f   :  { %3976 = shalt.err (!%p3973_p7)
}
 0xa90   :  { %s3999_s3 = smov 256   ;;  %s4000_s19 = smov 16  }
 0xa91   :  { %3627 = dma.vmem_to_hbm [thread:$0]  %s3622_s17, 512, %s4865_s9, [#allocation4], %s3999_s3, %s3999_s3, %s4000_s19  }
 0xa92   :  { %3977 = dma.done.wait [#allocation4], 512  }
 0xa93   :  { %3978 = vsyncadd [#allocation4], 4294966784 }
 0xa94   :  { %3631 = vsyncpa [#allocation4], 1 }

</bundles_post_ra>
